<compile_context>
chip_gen: v5e
topology: v5e:2x2
jax: 0.10.0
libtpu: 0.0.40
codegen_flags: <defaults>
</compile_context>

<pallas_src>
import math

import jax
import jax.numpy as jnp
from jax.experimental import pallas as pl
from jax.experimental.pallas import tpu as pltpu

# ----------------------------- hyperparameters -------------------------------
HIDDEN = 32            # img_feat_size == txt_feat_size == ViLT hidden size
FIXED = 32             # fixed_feat_size (== HIDDEN so linear_tim shapes line up)
NUM_LABELS = 3
NUM_HEADS = 4
HEAD_DIM = HIDDEN // NUM_HEADS
INTERMEDIATE = 64
NUM_LAYERS = 2
VOCAB = 100
MAX_LEN = 8            # text sequence length (max_length)
CHANNELS = 3
IMG = 16
PATCH = 8
NPATCH = (IMG // PATCH) ** 2
IMG_SEQ = 1 + NPATCH   # image CLS token + patches
SEQ = MAX_LEN + IMG_SEQ            # 13
SEQ_PAD = 16                       # sublane-aligned per-batch stride
LN_EPS = 1e-12
LOGIT_SCALE_INIT = 2.6592
NEG_INF = -1e9
OUT_LANES = 128                    # lane-dense output slab width


# ------------------------------ small helpers --------------------------------
def _layernorm(x, g, b):
    mu = jnp.mean(x, axis=-1, keepdims=True)
    xc = x - mu
    var = jnp.mean(xc * xc, axis=-1, keepdims=True)
    return xc * jax.lax.rsqrt(var + LN_EPS) * g + b


def _const_map(ndim):
    zeros = (0,) * ndim
    return lambda i: zeros


# --------------------------- fully fused kernel --------------------------------
def _make_vilt_kernel(nb_per_step, rows_per_step):
    """grid step 0 = main batch, step 1 = tim batch (independent -> parallel)."""
    inv_sqrt_d = 1.0 / math.sqrt(HEAD_DIM)

    def kernel(x_ref, bias_ref, emb_g_ref, emb_b_ref,
               ln1_g_ref, ln1_b_ref, wqkv_ref, bqkv_ref, wo_ref, bo_ref,
               ln2_g_ref, ln2_b_ref, w1_ref, b1_ref, w2_ref, b2_ref,
               fin_g_ref, fin_b_ref,
               cls_w_ref, cls_b_ref, txt_w_ref, vis_w_ref, scale_ref,
               tim_w_ref, tim_b_ref, o_ref):
        step = pl.program_id(0)
        x = _layernorm(x_ref[...], emb_g_ref[...], emb_b_ref[...])   # (nb*16, H)
        key_bias = bias_ref[...]                                      # (1, nb, 16)

        for l in range(NUM_LAYERS):                                   # static unroll
            # ---- pre-LN multi-head self-attention (fused QKV, per-batch scores) ----
            h = _layernorm(x, ln1_g_ref[l], ln1_b_ref[l])
            qkv = jnp.dot(h, wqkv_ref[l],
                          preferred_element_type=jnp.float32) + bqkv_ref[l]  # (rows, 3H)
            ctx_rows = []
            for b in range(nb_per_step):                              # static unroll
                r0 = b * SEQ_PAD
                qkv_b = qkv[r0:r0 + SEQ_PAD, :]                       # (16, 3H)
                kbias_b = key_bias[:, b, :]                           # (1, 16)
                heads = []
                for hd in range(NUM_HEADS):
                    lo = hd * HEAD_DIM
                    q = qkv_b[:, lo:lo + HEAD_DIM]                    # (16, 8)
                    k = qkv_b[:, HIDDEN + lo:HIDDEN + lo + HEAD_DIM]
                    v = qkv_b[:, 2 * HIDDEN + lo:2 * HIDDEN + lo + HEAD_DIM]
                    s = jax.lax.dot_general(q, k, (((1,), (1,)), ((), ())),
                                            preferred_element_type=jnp.float32)
                    s = s * inv_sqrt_d + kbias_b                      # (16, 16)
                    s = s - jnp.max(s, axis=-1, keepdims=True)
                    p = jnp.exp(s)
                    p = p / jnp.sum(p, axis=-1, keepdims=True)        # exact recip
                    heads.append(jnp.dot(p, v, preferred_element_type=jnp.float32))
                ctx_rows.append(jnp.concatenate(heads, axis=-1))      # (16, H)
            ctx = jnp.concatenate(ctx_rows, axis=0)                   # (rows, H)
            # single output projection for all heads / all batch rows
            x = x + jnp.dot(ctx, wo_ref[l],
                            preferred_element_type=jnp.float32) + bo_ref[l]

            # ---- pre-LN MLP ----
            h = _layernorm(x, ln2_g_ref[l], ln2_b_ref[l])
            h = jnp.dot(h, w1_ref[l], preferred_element_type=jnp.float32) + b1_ref[l]
            # TODO(synk): HF ViLT uses exact erf GELU; tanh approximation used here.
            h = jax.nn.gelu(h, approximate=True)
            x = x + jnp.dot(h, w2_ref[l], preferred_element_type=jnp.float32) + b2_ref[l]

        hidden = _layernorm(x, fin_g_ref[...], fin_b_ref[...])        # (rows, H)

        # rows 0 of each batch element (text CLS token)
        cls_rows = jnp.concatenate(
            [hidden[b * SEQ_PAD:b * SEQ_PAD + 1, :] for b in range(nb_per_step)],
            axis=0)                                                   # (nb, H)

        # lane-dense output slab; zero once, fill per-step pieces below.
        o_ref[...] = jnp.zeros_like(o_ref)

        @pl.when(step == 0)
        def _():
            # image CLS token rows (position MAX_LEN in each padded sequence)
            img_rows = jnp.concatenate(
                [hidden[b * SEQ_PAD + MAX_LEN:b * SEQ_PAD + MAX_LEN + 1, :]
                 for b in range(nb_per_step)], axis=0)                # (nb, H)
            lin = jnp.dot(cls_rows, cls_w_ref[...],
                          preferred_element_type=jnp.float32) + cls_b_ref[...]
            t_emb = jnp.dot(cls_rows, txt_w_ref[...],
                            preferred_element_type=jnp.float32)
            i_emb = jnp.dot(img_rows, vis_w_ref[...],
                            preferred_element_type=jnp.float32)
            t_n = t_emb * jax.lax.rsqrt(jnp.sum(t_emb * t_emb, axis=-1, keepdims=True))
            i_n = i_emb * jax.lax.rsqrt(jnp.sum(i_emb * i_emb, axis=-1, keepdims=True))
            logits = jax.lax.dot_general(t_n, i_n, (((1,), (1,)), ((), ())),
                                         preferred_element_type=jnp.float32)
            logits = logits * jnp.exp(scale_ref[0, 0])
            nb = nb_per_step
            o_ref[0:nb, 0:HIDDEN] = cls_rows                  # x_t
            o_ref[nb:2 * nb, 0:HIDDEN] = img_rows             # x_v
            o_ref[2 * nb:3 * nb, 0:NUM_LABELS] = lin          # classifier logits
            o_ref[3 * nb:4 * nb, 0:nb] = logits               # CLIP logits_per_text

        @pl.when(step == 1)
        def _():
            otim = jnp.dot(cls_rows, tim_w_ref[...],
                           preferred_element_type=jnp.float32) + tim_b_ref[...]
            o_ref[0:nb_per_step, 0:2] = otim                  # tim head

    return kernel


def pallas_vilt_fused(params, x_flat, key_bias, nb_per_step):
    """x_flat: (2*nb*SEQ_PAD, H) padded embeddings (main then tim batch);
       key_bias: (2, nb, SEQ_PAD) additive key-validity bias."""
    num_steps = key_bias.shape[0]
    m_step = nb_per_step * SEQ_PAD
    rows_per_step = ((4 * nb_per_step + 7) // 8) * 8          # output rows per step

    weights = [
        params["emb_ln_g"], params["emb_ln_b"],
        params["ln1_g"], params["ln1_b"], params["wqkv"], params["bqkv"],
        params["wo"], params["bo"], params["ln2_g"], params["ln2_b"],
        params["w1"], params["b1"], params["w2"], params["b2"],
        params["final_ln_g"], params["final_ln_b"],
        params["cls_w"], params["cls_b"].reshape(1, -1),
        params["txt_proj"], params["vis_proj"],
        params["logit_scale"].reshape(1, 1),
        params["tim_w"], params["tim_b"].reshape(1, -1),
    ]
    in_specs = [
        pl.BlockSpec((m_step, HIDDEN), lambda i: (i, 0)),
        pl.BlockSpec((1, nb_per_step, SEQ_PAD), lambda i: (i, 0, 0)),
    ] + [pl.BlockSpec(w.shape, _const_map(w.ndim)) for w in weights]

    kernel = _make_vilt_kernel(nb_per_step, rows_per_step)
    slab = pl.pallas_call(
        kernel,
        grid=(num_steps,),
        in_specs=in_specs,
        out_specs=pl.BlockSpec((rows_per_step, OUT_LANES), lambda i: (i, 0)),
        out_shape=jax.ShapeDtypeStruct((num_steps * rows_per_step, OUT_LANES),
                                       jnp.float32),
        compiler_params=pltpu.CompilerParams(
            dimension_semantics=("parallel",)),   # main/tim split -> 2 TCs on v7x
    )(x_flat, key_bias, *weights)
    return slab, rows_per_step


# ------------------------------ parameter init --------------------------------
def init_params(key):
    keys = iter(jax.random.split(key, 32))

    def dense(shape, scale=0.02):
        return jax.random.normal(next(keys), shape, jnp.float32) * scale

    L, H, I = NUM_LAYERS, HIDDEN, INTERMEDIATE
    p = {}
    p["word_emb"] = dense((VOCAB, H))
    p["text_pos_emb"] = dense((MAX_LEN, H))
    p["token_type_emb"] = dense((2, H))      # 0 = text, 1 = image
    p["img_cls"] = dense((1, H))
    p["img_pos_emb"] = dense((IMG_SEQ, H))
    p["patch_w"] = dense((H, CHANNELS, PATCH, PATCH))   # conv weight (D, C, P, P)
    p["patch_b"] = jnp.zeros((H,), jnp.float32)
    p["emb_ln_g"] = jnp.ones((1, H), jnp.float32)
    p["emb_ln_b"] = jnp.zeros((1, H), jnp.float32)

    # transformer layers, stacked along a leading layer axis; QKV weights fused.
    p["ln1_g"] = jnp.ones((L, 1, H), jnp.float32)
    p["ln1_b"] = jnp.zeros((L, 1, H), jnp.float32)
    p["wqkv"] = dense((L, H, 3 * H))
    p["bqkv"] = jnp.zeros((L, 1, 3 * H), jnp.float32)
    p["wo"] = dense((L, H, H))
    p["bo"] = jnp.zeros((L, 1, H), jnp.float32)
    p["ln2_g"] = jnp.ones((L, 1, H), jnp.float32)
    p["ln2_b"] = jnp.zeros((L, 1, H), jnp.float32)
    p["w1"] = dense((L, H, I))
    p["b1"] = jnp.zeros((L, 1, I), jnp.float32)
    p["w2"] = dense((L, I, H))
    p["b2"] = jnp.zeros((L, 1, H), jnp.float32)

    p["final_ln_g"] = jnp.ones((1, H), jnp.float32)
    p["final_ln_b"] = jnp.zeros((1, H), jnp.float32)

    # heads (from the PyTorch ViLT.__init__)
    p["cls_w"] = dense((H, NUM_LABELS)); p["cls_b"] = jnp.zeros((NUM_LABELS,), jnp.float32)
    p["vis_proj"] = dense((H, FIXED))    # visual_projection (no bias)
    p["txt_proj"] = dense((H, FIXED))    # text_projection (no bias)
    p["logit_scale"] = jnp.array(LOGIT_SCALE_INIT, jnp.float32)
    p["tim_w"] = dense((FIXED, 2)); p["tim_b"] = jnp.zeros((2,), jnp.float32)
    return p


# --------------------------- embedding prep (JAX) ------------------------------
def _text_embeddings(params, ids, token_type_ids):
    # TODO(synk): embedding-table gather has no clean Pallas equivalent; kept in JAX.
    tok = jnp.take(params["word_emb"], ids, axis=0)
    ttype = jnp.take(params["token_type_emb"], token_type_ids, axis=0)
    return tok + params["text_pos_emb"][None, :ids.shape[1], :] + ttype


def _image_embeddings(params, pixel_values):
    B = pixel_values.shape[0]
    Hp = IMG // PATCH
    patches = pixel_values.reshape(B, CHANNELS, Hp, PATCH, Hp, PATCH)
    patches = patches.transpose(0, 2, 4, 1, 3, 5).reshape(
        B * NPATCH, CHANNELS * PATCH * PATCH)
    pw = params["patch_w"].reshape(HIDDEN, -1).T          # (C*P*P, D)
    patch_emb = (patches @ pw + params["patch_b"]).reshape(B, NPATCH, HIDDEN)
    img_emb = jnp.concatenate(
        [jnp.broadcast_to(params["img_cls"][None], (B, 1, HIDDEN)), patch_emb], axis=1)
    return img_emb + params["img_pos_emb"][None] + params["token_type_emb"][1][None, None]


def _image_mask(pixel_mask):
    B = pixel_mask.shape[0]
    Hp = IMG // PATCH
    patch_mask = jnp.max(pixel_mask.reshape(B, Hp, PATCH, Hp, PATCH), axis=(2, 4))
    return jnp.concatenate(
        [jnp.ones((B, 1), jnp.float32),
         patch_mask.reshape(B, NPATCH).astype(jnp.float32)], axis=1)


def _prepare_sequence(params, ids, mask, tt, img_emb, img_mask):
    """Concatenate text+image embeddings/mask and pad seq to SEQ_PAD."""
    text_emb = _text_embeddings(params, ids, tt)                     # (B, MAX_LEN, H)
    x = jnp.concatenate([text_emb, img_emb], axis=1)                 # (B, SEQ, H)
    full_mask = jnp.concatenate([mask.astype(jnp.float32), img_mask], axis=1)
    pad = SEQ_PAD - SEQ
    x = jnp.pad(x, ((0, 0), (0, pad), (0, 0)))
    full_mask = jnp.pad(full_mask, ((0, 0), (0, pad)))               # pad keys invalid
    return x, full_mask


# ------------------------------ ViLT.forward ----------------------------------
def vilt_forward(params, ids, mask, token_type_ids, pixel_values, pixel_mask,
                 tim_inputs=None):
    B = ids.shape[0]

    # image side is identical for the main and tim encoder passes -> compute once.
    img_emb = _image_embeddings(params, pixel_values)           # (B, IMG_SEQ, H)
    img_mask = _image_mask(pixel_mask)                          # (B, IMG_SEQ)

    have_tim = tim_inputs is not None
    if not have_tim:
        # keep the fused 2-step kernel shape fixed; tim step result is discarded.
        tim_inputs = (ids, mask, token_type_ids)
    tim_ids, tim_mask, tim_tt = tim_inputs

    x_main, m_main = _prepare_sequence(params, ids, mask, token_type_ids,
                                       img_emb, img_mask)
    x_tim, m_tim = _prepare_sequence(params, tim_ids, tim_mask, tim_tt,
                                     img_emb, img_mask)

    x_flat = jnp.concatenate([x_main, x_tim], axis=0).reshape(2 * B * SEQ_PAD, HIDDEN)
    full_mask = jnp.stack([m_main, m_tim], axis=0)              # (2, B, SEQ_PAD)
    key_bias = jnp.where(full_mask > 0.5, 0.0, NEG_INF).astype(jnp.float32)

    # single fused launch: encoder (both batches) + all heads + CLIP logits.
    slab, rows = pallas_vilt_fused(params, x_flat, key_bias, B)

    # nn.Dropout(0.1) is identity at inference (deterministic, eval mode).
    x_t = slab[0:B, :HIDDEN]
    x_v = slab[B:2 * B, :HIDDEN]
    linear_output = slab[2 * B:3 * B, :NUM_LABELS]
    logits_per_text = slab[3 * B:4 * B, :B]
    out_tim = slab[rows:rows + B, :2] if have_tim else None
    return linear_output, x_t, x_v, out_tim, logits_per_text


# ----------------------------------- main --------------------------------------
if __name__ == "__main__":
    key = jax.random.PRNGKey(0)
    kp, kid, kpix = jax.random.split(key, 3)
    params = init_params(kp)

    B = 2
    ids = jax.random.randint(kid, (B, MAX_LEN), 0, VOCAB, dtype=jnp.int32)
    mask = jnp.ones((B, MAX_LEN), jnp.int32)
    token_type_ids = jnp.zeros((B, MAX_LEN), jnp.int32)
    pixel_values = jax.random.normal(kpix, (B, CHANNELS, IMG, IMG), jnp.float32)
    pixel_mask = jnp.ones((B, IMG, IMG), jnp.int32)

    @jax.jit
    def run(params, ids, mask, tt, pix, pmask):
        return vilt_forward(params, ids, mask, tt, pix, pmask,
                            tim_inputs=(ids, mask, tt))

    linear_output, x_t, x_v, out_tim, logits_per_text = run(
        params, ids, mask, token_type_ids, pixel_values, pixel_mask)
    jax.block_until_ready((linear_output, x_t, x_v, out_tim, logits_per_text))

    assert linear_output.shape == (B, NUM_LABELS)
    assert x_t.shape == (B, HIDDEN) and x_v.shape == (B, HIDDEN)
    assert out_tim.shape == (B, 2)
    assert logits_per_text.shape == (B, B)
    print("KERNEL_OK")
</pallas_src>

<mosaic_0001>
module attributes {stable_mosaic.version = 11 : i64} {
  func.func @kernel(%arg0: i32, %arg1: memref<32x32xf32, #tpu.memory_space<vmem>>, %arg2: memref<1x2x16xf32, #tpu.memory_space<vmem>>, %arg3: memref<1x32xf32, #tpu.memory_space<vmem>>, %arg4: memref<1x32xf32, #tpu.memory_space<vmem>>, %arg5: memref<2x1x32xf32, #tpu.memory_space<vmem>>, %arg6: memref<2x1x32xf32, #tpu.memory_space<vmem>>, %arg7: memref<2x32x96xf32, #tpu.memory_space<vmem>>, %arg8: memref<2x1x96xf32, #tpu.memory_space<vmem>>, %arg9: memref<2x32x32xf32, #tpu.memory_space<vmem>>, %arg10: memref<2x1x32xf32, #tpu.memory_space<vmem>>, %arg11: memref<2x1x32xf32, #tpu.memory_space<vmem>>, %arg12: memref<2x1x32xf32, #tpu.memory_space<vmem>>, %arg13: memref<2x32x64xf32, #tpu.memory_space<vmem>>, %arg14: memref<2x1x64xf32, #tpu.memory_space<vmem>>, %arg15: memref<2x64x32xf32, #tpu.memory_space<vmem>>, %arg16: memref<2x1x32xf32, #tpu.memory_space<vmem>>, %arg17: memref<1x32xf32, #tpu.memory_space<vmem>>, %arg18: memref<1x32xf32, #tpu.memory_space<vmem>>, %arg19: memref<32x3xf32, #tpu.memory_space<vmem>>, %arg20: memref<1x3xf32, #tpu.memory_space<vmem>>, %arg21: memref<32x32xf32, #tpu.memory_space<vmem>>, %arg22: memref<32x32xf32, #tpu.memory_space<vmem>>, %arg23: memref<1x1xf32, #tpu.memory_space<vmem>>, %arg24: memref<32x2xf32, #tpu.memory_space<vmem>>, %arg25: memref<1x2xf32, #tpu.memory_space<vmem>>, %arg26: memref<8x128xf32, #tpu.memory_space<vmem>>) attributes {dimension_semantics = [#tpu.dimension_semantics<parallel>], iteration_bounds = array<i64: 2>, scalar_prefetch = 0 : i64, scratch_operands = 0 : i64, tpu.core_type = #tpu.core_type<tc>, window_params = [{transform_indices = @transform_0, window_bounds = array<i64: 32, 32>}, {transform_indices = @transform_1, window_bounds = array<i64: 1, 2, 16>}, {pipeline_mode = #tpu.pipeline_mode<synchronous>, transform_indices = @transform_2, window_bounds = array<i64: 1, 32>}, {pipeline_mode = #tpu.pipeline_mode<synchronous>, transform_indices = @transform_3, window_bounds = array<i64: 1, 32>}, {pipeline_mode = #tpu.pipeline_mode<synchronous>, transform_indices = @transform_4, window_bounds = array<i64: 2, 1, 32>}, {pipeline_mode = #tpu.pipeline_mode<synchronous>, transform_indices = @transform_5, window_bounds = array<i64: 2, 1, 32>}, {pipeline_mode = #tpu.pipeline_mode<synchronous>, transform_indices = @transform_6, window_bounds = array<i64: 2, 32, 96>}, {pipeline_mode = #tpu.pipeline_mode<synchronous>, transform_indices = @transform_7, window_bounds = array<i64: 2, 1, 96>}, {pipeline_mode = #tpu.pipeline_mode<synchronous>, transform_indices = @transform_8, window_bounds = array<i64: 2, 32, 32>}, {pipeline_mode = #tpu.pipeline_mode<synchronous>, transform_indices = @transform_9, window_bounds = array<i64: 2, 1, 32>}, {pipeline_mode = #tpu.pipeline_mode<synchronous>, transform_indices = @transform_10, window_bounds = array<i64: 2, 1, 32>}, {pipeline_mode = #tpu.pipeline_mode<synchronous>, transform_indices = @transform_11, window_bounds = array<i64: 2, 1, 32>}, {pipeline_mode = #tpu.pipeline_mode<synchronous>, transform_indices = @transform_12, window_bounds = array<i64: 2, 32, 64>}, {pipeline_mode = #tpu.pipeline_mode<synchronous>, transform_indices = @transform_13, window_bounds = array<i64: 2, 1, 64>}, {pipeline_mode = #tpu.pipeline_mode<synchronous>, transform_indices = @transform_14, window_bounds = array<i64: 2, 64, 32>}, {pipeline_mode = #tpu.pipeline_mode<synchronous>, transform_indices = @transform_15, window_bounds = array<i64: 2, 1, 32>}, {pipeline_mode = #tpu.pipeline_mode<synchronous>, transform_indices = @transform_16, window_bounds = array<i64: 1, 32>}, {pipeline_mode = #tpu.pipeline_mode<synchronous>, transform_indices = @transform_17, window_bounds = array<i64: 1, 32>}, {pipeline_mode = #tpu.pipeline_mode<synchronous>, transform_indices = @transform_18, window_bounds = array<i64: 32, 3>}, {pipeline_mode = #tpu.pipeline_mode<synchronous>, transform_indices = @transform_19, window_bounds = array<i64: 1, 3>}, {pipeline_mode = #tpu.pipeline_mode<synchronous>, transform_indices = @transform_20, window_bounds = array<i64: 32, 32>}, {pipeline_mode = #tpu.pipeline_mode<synchronous>, transform_indices = @transform_21, window_bounds = array<i64: 32, 32>}, {pipeline_mode = #tpu.pipeline_mode<synchronous>, transform_indices = @transform_22, window_bounds = array<i64: 1, 1>}, {pipeline_mode = #tpu.pipeline_mode<synchronous>, transform_indices = @transform_23, window_bounds = array<i64: 32, 2>}, {pipeline_mode = #tpu.pipeline_mode<synchronous>, transform_indices = @transform_24, window_bounds = array<i64: 1, 2>}, {transform_indices = @transform_25, window_bounds = array<i64: 8, 128>}]} {
    %c0 = arith.constant 0 : index
    %c0_0 = arith.constant 0 : index
    %0 = vector.load %arg1[%c0, %c0_0] : memref<32x32xf32, #tpu.memory_space<vmem>>, vector<32x32xf32>
    %c0_1 = arith.constant 0 : index
    %c0_2 = arith.constant 0 : index
    %1 = vector.load %arg3[%c0_1, %c0_2] : memref<1x32xf32, #tpu.memory_space<vmem>>, vector<1x32xf32>
    %c0_3 = arith.constant 0 : index
    %c0_4 = arith.constant 0 : index
    %2 = vector.load %arg4[%c0_3, %c0_4] : memref<1x32xf32, #tpu.memory_space<vmem>>, vector<1x32xf32>
    %cst = arith.constant dense<0.000000e+00> : vector<32xf32>
    %3 = vector.multi_reduction <add>, %0, %cst [1] : vector<32x32xf32> to vector<32xf32>
    %4 = vector.shape_cast %3 : vector<32xf32> to vector<32x1xf32>
    %cst_5 = arith.constant 3.200000e+01 : f32
    %5 = vector.broadcast %cst_5 : f32 to vector<32x1xf32>
    %6 = arith.divf %4, %5 : vector<32x1xf32>
    %7 = vector.broadcast %6 : vector<32x1xf32> to vector<32x32xf32>
    %8 = arith.subf %0, %7 : vector<32x32xf32>
    %9 = arith.mulf %8, %8 : vector<32x32xf32>
    %cst_6 = arith.constant dense<0.000000e+00> : vector<32xf32>
    %10 = vector.multi_reduction <add>, %9, %cst_6 [1] : vector<32x32xf32> to vector<32xf32>
    %11 = vector.shape_cast %10 : vector<32xf32> to vector<32x1xf32>
    %cst_7 = arith.constant 3.200000e+01 : f32
    %12 = vector.broadcast %cst_7 : f32 to vector<32x1xf32>
    %13 = arith.divf %11, %12 : vector<32x1xf32>
    %cst_8 = arith.constant 9.99999996E-13 : f32
    %14 = vector.broadcast %cst_8 : f32 to vector<32x1xf32>
    %15 = arith.addf %13, %14 : vector<32x1xf32>
    %16 = math.rsqrt %15 : vector<32x1xf32>
    %17 = vector.broadcast %16 : vector<32x1xf32> to vector<32x32xf32>
    %18 = arith.mulf %8, %17 : vector<32x32xf32>
    %19 = vector.broadcast %1 : vector<1x32xf32> to vector<32x32xf32>
    %20 = arith.mulf %18, %19 : vector<32x32xf32>
    %21 = vector.broadcast %2 : vector<1x32xf32> to vector<32x32xf32>
    %22 = arith.addf %20, %21 : vector<32x32xf32>
    %c0_9 = arith.constant 0 : index
    %c0_10 = arith.constant 0 : index
    %c0_11 = arith.constant 0 : index
    %23 = vector.load %arg2[%c0_9, %c0_10, %c0_11] : memref<1x2x16xf32, #tpu.memory_space<vmem>>, vector<1x2x16xf32>
    %c0_12 = arith.constant 0 : index
    %c0_13 = arith.constant 0 : index
    %c0_14 = arith.constant 0 : index
    %24 = vector.load %arg5[%c0_12, %c0_13, %c0_14] : memref<2x1x32xf32, #tpu.memory_space<vmem>>, vector<1x1x32xf32>
    %25 = vector.shape_cast %24 : vector<1x1x32xf32> to vector<1x32xf32>
    %c0_15 = arith.constant 0 : index
    %c0_16 = arith.constant 0 : index
    %c0_17 = arith.constant 0 : index
    %26 = vector.load %arg6[%c0_15, %c0_16, %c0_17] : memref<2x1x32xf32, #tpu.memory_space<vmem>>, vector<1x1x32xf32>
    %27 = vector.shape_cast %26 : vector<1x1x32xf32> to vector<1x32xf32>
    %cst_18 = arith.constant dense<0.000000e+00> : vector<32xf32>
    %28 = vector.multi_reduction <add>, %22, %cst_18 [1] : vector<32x32xf32> to vector<32xf32>
    %29 = vector.shape_cast %28 : vector<32xf32> to vector<32x1xf32>
    %cst_19 = arith.constant 3.200000e+01 : f32
    %30 = vector.broadcast %cst_19 : f32 to vector<32x1xf32>
    %31 = arith.divf %29, %30 : vector<32x1xf32>
    %32 = vector.broadcast %31 : vector<32x1xf32> to vector<32x32xf32>
    %33 = arith.subf %22, %32 : vector<32x32xf32>
    %34 = arith.mulf %33, %33 : vector<32x32xf32>
    %cst_20 = arith.constant dense<0.000000e+00> : vector<32xf32>
    %35 = vector.multi_reduction <add>, %34, %cst_20 [1] : vector<32x32xf32> to vector<32xf32>
    %36 = vector.shape_cast %35 : vector<32xf32> to vector<32x1xf32>
    %cst_21 = arith.constant 3.200000e+01 : f32
    %37 = vector.broadcast %cst_21 : f32 to vector<32x1xf32>
    %38 = arith.divf %36, %37 : vector<32x1xf32>
    %cst_22 = arith.constant 9.99999996E-13 : f32
    %39 = vector.broadcast %cst_22 : f32 to vector<32x1xf32>
    %40 = arith.addf %38, %39 : vector<32x1xf32>
    %41 = math.rsqrt %40 : vector<32x1xf32>
    %42 = vector.broadcast %41 : vector<32x1xf32> to vector<32x32xf32>
    %43 = arith.mulf %33, %42 : vector<32x32xf32>
    %44 = vector.broadcast %25 : vector<1x32xf32> to vector<32x32xf32>
    %45 = arith.mulf %43, %44 : vector<32x32xf32>
    %46 = vector.broadcast %27 : vector<1x32xf32> to vector<32x32xf32>
    %47 = arith.addf %45, %46 : vector<32x32xf32>
    %c0_23 = arith.constant 0 : index
    %c0_24 = arith.constant 0 : index
    %c0_25 = arith.constant 0 : index
    %48 = vector.load %arg7[%c0_23, %c0_24, %c0_25] : memref<2x32x96xf32, #tpu.memory_space<vmem>>, vector<1x32x96xf32>
    %49 = vector.shape_cast %48 : vector<1x32x96xf32> to vector<32x96xf32>
    %cst_26 = arith.constant dense<0.000000e+00> : vector<32x96xf32>
    %50 = tpu.matmul %47, %49, %cst_26 {dimension_numbers = #tpu.dot_dimension_numbers<[1], [0], [0], [1], [0, 0, 1, 1], [], []>} : vector<32x32xf32>, vector<32x96xf32>, vector<32x96xf32> -> vector<32x96xf32>
    %c0_27 = arith.constant 0 : index
    %c0_28 = arith.constant 0 : index
    %c0_29 = arith.constant 0 : index
    %51 = vector.load %arg8[%c0_27, %c0_28, %c0_29] : memref<2x1x96xf32, #tpu.memory_space<vmem>>, vector<1x1x96xf32>
    %52 = vector.shape_cast %51 : vector<1x1x96xf32> to vector<1x96xf32>
    %53 = vector.broadcast %52 : vector<1x96xf32> to vector<32x96xf32>
    %54 = arith.addf %50, %53 : vector<32x96xf32>
    %55 = vector.extract_strided_slice %54 {offsets = [0, 0], sizes = [16, 96], strides = [1, 1]} : vector<32x96xf32> to vector<16x96xf32>
    %56 = vector.extract_strided_slice %23 {offsets = [0, 0, 0], sizes = [1, 1, 16], strides = [1, 1, 1]} : vector<1x2x16xf32> to vector<1x1x16xf32>
    %57 = vector.shape_cast %56 : vector<1x1x16xf32> to vector<1x16xf32>
    %58 = vector.extract_strided_slice %55 {offsets = [0, 0], sizes = [16, 8], strides = [1, 1]} : vector<16x96xf32> to vector<16x8xf32>
    %59 = vector.extract_strided_slice %55 {offsets = [0, 32], sizes = [16, 8], strides = [1, 1]} : vector<16x96xf32> to vector<16x8xf32>
    %60 = vector.extract_strided_slice %55 {offsets = [0, 64], sizes = [16, 8], strides = [1, 1]} : vector<16x96xf32> to vector<16x8xf32>
    %cst_30 = arith.constant dense<0.000000e+00> : vector<16x16xf32>
    %61 = tpu.matmul %58, %59, %cst_30 {dimension_numbers = #tpu.dot_dimension_numbers<[1], [1], [0], [0], [0, 0, 1, 0], [], []>} : vector<16x8xf32>, vector<16x8xf32>, vector<16x16xf32> -> vector<16x16xf32>
    %cst_31 = arith.constant 0.353553385 : f32
    %62 = vector.broadcast %cst_31 : f32 to vector<16x16xf32>
    %63 = arith.mulf %61, %62 : vector<16x16xf32>
    %64 = vector.broadcast %57 : vector<1x16xf32> to vector<16x16xf32>
    %65 = arith.addf %63, %64 : vector<16x16xf32>
    %cst_32 = arith.constant dense<0xFF800000> : vector<16xf32>
    %66 = vector.multi_reduction <maximumf>, %65, %cst_32 [1] : vector<16x16xf32> to vector<16xf32>
    %67 = vector.shape_cast %66 : vector<16xf32> to vector<16x1xf32>
    %68 = vector.broadcast %67 : vector<16x1xf32> to vector<16x16xf32>
    %69 = arith.subf %65, %68 : vector<16x16xf32>
    %70 = math.exp %69 : vector<16x16xf32>
    %cst_33 = arith.constant dense<0.000000e+00> : vector<16xf32>
    %71 = vector.multi_reduction <add>, %70, %cst_33 [1] : vector<16x16xf32> to vector<16xf32>
    %72 = vector.shape_cast %71 : vector<16xf32> to vector<16x1xf32>
    %73 = vector.broadcast %72 : vector<16x1xf32> to vector<16x16xf32>
    %74 = arith.divf %70, %73 : vector<16x16xf32>
    %cst_34 = arith.constant dense<0.000000e+00> : vector<16x8xf32>
    %75 = tpu.matmul %74, %60, %cst_34 {dimension_numbers = #tpu.dot_dimension_numbers<[1], [0], [0], [1], [0, 0, 1, 1], [], []>} : vector<16x16xf32>, vector<16x8xf32>, vector<16x8xf32> -> vector<16x8xf32>
    %76 = vector.extract_strided_slice %55 {offsets = [0, 8], sizes = [16, 8], strides = [1, 1]} : vector<16x96xf32> to vector<16x8xf32>
    %77 = vector.extract_strided_slice %55 {offsets = [0, 40], sizes = [16, 8], strides = [1, 1]} : vector<16x96xf32> to vector<16x8xf32>
    %78 = vector.extract_strided_slice %55 {offsets = [0, 72], sizes = [16, 8], strides = [1, 1]} : vector<16x96xf32> to vector<16x8xf32>
    %cst_35 = arith.constant dense<0.000000e+00> : vector<16x16xf32>
    %79 = tpu.matmul %76, %77, %cst_35 {dimension_numbers = #tpu.dot_dimension_numbers<[1], [1], [0], [0], [0, 0, 1, 0], [], []>} : vector<16x8xf32>, vector<16x8xf32>, vector<16x16xf32> -> vector<16x16xf32>
    %cst_36 = arith.constant 0.353553385 : f32
    %80 = vector.broadcast %cst_36 : f32 to vector<16x16xf32>
    %81 = arith.mulf %79, %80 : vector<16x16xf32>
    %82 = vector.broadcast %57 : vector<1x16xf32> to vector<16x16xf32>
    %83 = arith.addf %81, %82 : vector<16x16xf32>
    %cst_37 = arith.constant dense<0xFF800000> : vector<16xf32>
    %84 = vector.multi_reduction <maximumf>, %83, %cst_37 [1] : vector<16x16xf32> to vector<16xf32>
    %85 = vector.shape_cast %84 : vector<16xf32> to vector<16x1xf32>
    %86 = vector.broadcast %85 : vector<16x1xf32> to vector<16x16xf32>
    %87 = arith.subf %83, %86 : vector<16x16xf32>
    %88 = math.exp %87 : vector<16x16xf32>
    %cst_38 = arith.constant dense<0.000000e+00> : vector<16xf32>
    %89 = vector.multi_reduction <add>, %88, %cst_38 [1] : vector<16x16xf32> to vector<16xf32>
    %90 = vector.shape_cast %89 : vector<16xf32> to vector<16x1xf32>
    %91 = vector.broadcast %90 : vector<16x1xf32> to vector<16x16xf32>
    %92 = arith.divf %88, %91 : vector<16x16xf32>
    %cst_39 = arith.constant dense<0.000000e+00> : vector<16x8xf32>
    %93 = tpu.matmul %92, %78, %cst_39 {dimension_numbers = #tpu.dot_dimension_numbers<[1], [0], [0], [1], [0, 0, 1, 1], [], []>} : vector<16x16xf32>, vector<16x8xf32>, vector<16x8xf32> -> vector<16x8xf32>
    %94 = vector.extract_strided_slice %55 {offsets = [0, 16], sizes = [16, 8], strides = [1, 1]} : vector<16x96xf32> to vector<16x8xf32>
    %95 = vector.extract_strided_slice %55 {offsets = [0, 48], sizes = [16, 8], strides = [1, 1]} : vector<16x96xf32> to vector<16x8xf32>
    %96 = vector.extract_strided_slice %55 {offsets = [0, 80], sizes = [16, 8], strides = [1, 1]} : vector<16x96xf32> to vector<16x8xf32>
    %cst_40 = arith.constant dense<0.000000e+00> : vector<16x16xf32>
    %97 = tpu.matmul %94, %95, %cst_40 {dimension_numbers = #tpu.dot_dimension_numbers<[1], [1], [0], [0], [0, 0, 1, 0], [], []>} : vector<16x8xf32>, vector<16x8xf32>, vector<16x16xf32> -> vector<16x16xf32>
    %cst_41 = arith.constant 0.353553385 : f32
    %98 = vector.broadcast %cst_41 : f32 to vector<16x16xf32>
    %99 = arith.mulf %97, %98 : vector<16x16xf32>
    %100 = vector.broadcast %57 : vector<1x16xf32> to vector<16x16xf32>
    %101 = arith.addf %99, %100 : vector<16x16xf32>
    %cst_42 = arith.constant dense<0xFF800000> : vector<16xf32>
    %102 = vector.multi_reduction <maximumf>, %101, %cst_42 [1] : vector<16x16xf32> to vector<16xf32>
    %103 = vector.shape_cast %102 : vector<16xf32> to vector<16x1xf32>
    %104 = vector.broadcast %103 : vector<16x1xf32> to vector<16x16xf32>
    %105 = arith.subf %101, %104 : vector<16x16xf32>
    %106 = math.exp %105 : vector<16x16xf32>
    %cst_43 = arith.constant dense<0.000000e+00> : vector<16xf32>
    %107 = vector.multi_reduction <add>, %106, %cst_43 [1] : vector<16x16xf32> to vector<16xf32>
    %108 = vector.shape_cast %107 : vector<16xf32> to vector<16x1xf32>
    %109 = vector.broadcast %108 : vector<16x1xf32> to vector<16x16xf32>
    %110 = arith.divf %106, %109 : vector<16x16xf32>
    %cst_44 = arith.constant dense<0.000000e+00> : vector<16x8xf32>
    %111 = tpu.matmul %110, %96, %cst_44 {dimension_numbers = #tpu.dot_dimension_numbers<[1], [0], [0], [1], [0, 0, 1, 1], [], []>} : vector<16x16xf32>, vector<16x8xf32>, vector<16x8xf32> -> vector<16x8xf32>
    %112 = vector.extract_strided_slice %55 {offsets = [0, 24], sizes = [16, 8], strides = [1, 1]} : vector<16x96xf32> to vector<16x8xf32>
    %113 = vector.extract_strided_slice %55 {offsets = [0, 56], sizes = [16, 8], strides = [1, 1]} : vector<16x96xf32> to vector<16x8xf32>
    %114 = vector.extract_strided_slice %55 {offsets = [0, 88], sizes = [16, 8], strides = [1, 1]} : vector<16x96xf32> to vector<16x8xf32>
    %cst_45 = arith.constant dense<0.000000e+00> : vector<16x16xf32>
    %115 = tpu.matmul %112, %113, %cst_45 {dimension_numbers = #tpu.dot_dimension_numbers<[1], [1], [0], [0], [0, 0, 1, 0], [], []>} : vector<16x8xf32>, vector<16x8xf32>, vector<16x16xf32> -> vector<16x16xf32>
    %cst_46 = arith.constant 0.353553385 : f32
    %116 = vector.broadcast %cst_46 : f32 to vector<16x16xf32>
    %117 = arith.mulf %115, %116 : vector<16x16xf32>
    %118 = vector.broadcast %57 : vector<1x16xf32> to vector<16x16xf32>
    %119 = arith.addf %117, %118 : vector<16x16xf32>
    %cst_47 = arith.constant dense<0xFF800000> : vector<16xf32>
    %120 = vector.multi_reduction <maximumf>, %119, %cst_47 [1] : vector<16x16xf32> to vector<16xf32>
    %121 = vector.shape_cast %120 : vector<16xf32> to vector<16x1xf32>
    %122 = vector.broadcast %121 : vector<16x1xf32> to vector<16x16xf32>
    %123 = arith.subf %119, %122 : vector<16x16xf32>
    %124 = math.exp %123 : vector<16x16xf32>
    %cst_48 = arith.constant dense<0.000000e+00> : vector<16xf32>
    %125 = vector.multi_reduction <add>, %124, %cst_48 [1] : vector<16x16xf32> to vector<16xf32>
    %126 = vector.shape_cast %125 : vector<16xf32> to vector<16x1xf32>
    %127 = vector.broadcast %126 : vector<16x1xf32> to vector<16x16xf32>
    %128 = arith.divf %124, %127 : vector<16x16xf32>
    %cst_49 = arith.constant dense<0.000000e+00> : vector<16x8xf32>
    %129 = tpu.matmul %128, %114, %cst_49 {dimension_numbers = #tpu.dot_dimension_numbers<[1], [0], [0], [1], [0, 0, 1, 1], [], []>} : vector<16x16xf32>, vector<16x8xf32>, vector<16x8xf32> -> vector<16x8xf32>
    %130 = tpu.concatenate %75, %93, %111, %129 in 1 : vector<16x8xf32>, vector<16x8xf32>, vector<16x8xf32>, vector<16x8xf32> -> vector<16x32xf32>
    %131 = vector.extract_strided_slice %54 {offsets = [16, 0], sizes = [16, 96], strides = [1, 1]} : vector<32x96xf32> to vector<16x96xf32>
    %132 = vector.extract_strided_slice %23 {offsets = [0, 1, 0], sizes = [1, 1, 16], strides = [1, 1, 1]} : vector<1x2x16xf32> to vector<1x1x16xf32>
    %133 = vector.shape_cast %132 : vector<1x1x16xf32> to vector<1x16xf32>
    %134 = vector.extract_strided_slice %131 {offsets = [0, 0], sizes = [16, 8], strides = [1, 1]} : vector<16x96xf32> to vector<16x8xf32>
    %135 = vector.extract_strided_slice %131 {offsets = [0, 32], sizes = [16, 8], strides = [1, 1]} : vector<16x96xf32> to vector<16x8xf32>
    %136 = vector.extract_strided_slice %131 {offsets = [0, 64], sizes = [16, 8], strides = [1, 1]} : vector<16x96xf32> to vector<16x8xf32>
    %cst_50 = arith.constant dense<0.000000e+00> : vector<16x16xf32>
    %137 = tpu.matmul %134, %135, %cst_50 {dimension_numbers = #tpu.dot_dimension_numbers<[1], [1], [0], [0], [0, 0, 1, 0], [], []>} : vector<16x8xf32>, vector<16x8xf32>, vector<16x16xf32> -> vector<16x16xf32>
    %cst_51 = arith.constant 0.353553385 : f32
    %138 = vector.broadcast %cst_51 : f32 to vector<16x16xf32>
    %139 = arith.mulf %137, %138 : vector<16x16xf32>
    %140 = vector.broadcast %133 : vector<1x16xf32> to vector<16x16xf32>
    %141 = arith.addf %139, %140 : vector<16x16xf32>
    %cst_52 = arith.constant dense<0xFF800000> : vector<16xf32>
    %142 = vector.multi_reduction <maximumf>, %141, %cst_52 [1] : vector<16x16xf32> to vector<16xf32>
    %143 = vector.shape_cast %142 : vector<16xf32> to vector<16x1xf32>
    %144 = vector.broadcast %143 : vector<16x1xf32> to vector<16x16xf32>
    %145 = arith.subf %141, %144 : vector<16x16xf32>
    %146 = math.exp %145 : vector<16x16xf32>
    %cst_53 = arith.constant dense<0.000000e+00> : vector<16xf32>
    %147 = vector.multi_reduction <add>, %146, %cst_53 [1] : vector<16x16xf32> to vector<16xf32>
    %148 = vector.shape_cast %147 : vector<16xf32> to vector<16x1xf32>
    %149 = vector.broadcast %148 : vector<16x1xf32> to vector<16x16xf32>
    %150 = arith.divf %146, %149 : vector<16x16xf32>
    %cst_54 = arith.constant dense<0.000000e+00> : vector<16x8xf32>
    %151 = tpu.matmul %150, %136, %cst_54 {dimension_numbers = #tpu.dot_dimension_numbers<[1], [0], [0], [1], [0, 0, 1, 1], [], []>} : vector<16x16xf32>, vector<16x8xf32>, vector<16x8xf32> -> vector<16x8xf32>
    %152 = vector.extract_strided_slice %131 {offsets = [0, 8], sizes = [16, 8], strides = [1, 1]} : vector<16x96xf32> to vector<16x8xf32>
    %153 = vector.extract_strided_slice %131 {offsets = [0, 40], sizes = [16, 8], strides = [1, 1]} : vector<16x96xf32> to vector<16x8xf32>
    %154 = vector.extract_strided_slice %131 {offsets = [0, 72], sizes = [16, 8], strides = [1, 1]} : vector<16x96xf32> to vector<16x8xf32>
    %cst_55 = arith.constant dense<0.000000e+00> : vector<16x16xf32>
    %155 = tpu.matmul %152, %153, %cst_55 {dimension_numbers = #tpu.dot_dimension_numbers<[1], [1], [0], [0], [0, 0, 1, 0], [], []>} : vector<16x8xf32>, vector<16x8xf32>, vector<16x16xf32> -> vector<16x16xf32>
    %cst_56 = arith.constant 0.353553385 : f32
    %156 = vector.broadcast %cst_56 : f32 to vector<16x16xf32>
    %157 = arith.mulf %155, %156 : vector<16x16xf32>
    %158 = vector.broadcast %133 : vector<1x16xf32> to vector<16x16xf32>
    %159 = arith.addf %157, %158 : vector<16x16xf32>
    %cst_57 = arith.constant dense<0xFF800000> : vector<16xf32>
    %160 = vector.multi_reduction <maximumf>, %159, %cst_57 [1] : vector<16x16xf32> to vector<16xf32>
    %161 = vector.shape_cast %160 : vector<16xf32> to vector<16x1xf32>
    %162 = vector.broadcast %161 : vector<16x1xf32> to vector<16x16xf32>
    %163 = arith.subf %159, %162 : vector<16x16xf32>
    %164 = math.exp %163 : vector<16x16xf32>
    %cst_58 = arith.constant dense<0.000000e+00> : vector<16xf32>
    %165 = vector.multi_reduction <add>, %164, %cst_58 [1] : vector<16x16xf32> to vector<16xf32>
    %166 = vector.shape_cast %165 : vector<16xf32> to vector<16x1xf32>
    %167 = vector.broadcast %166 : vector<16x1xf32> to vector<16x16xf32>
    %168 = arith.divf %164, %167 : vector<16x16xf32>
    %cst_59 = arith.constant dense<0.000000e+00> : vector<16x8xf32>
    %169 = tpu.matmul %168, %154, %cst_59 {dimension_numbers = #tpu.dot_dimension_numbers<[1], [0], [0], [1], [0, 0, 1, 1], [], []>} : vector<16x16xf32>, vector<16x8xf32>, vector<16x8xf32> -> vector<16x8xf32>
    %170 = vector.extract_strided_slice %131 {offsets = [0, 16], sizes = [16, 8], strides = [1, 1]} : vector<16x96xf32> to vector<16x8xf32>
    %171 = vector.extract_strided_slice %131 {offsets = [0, 48], sizes = [16, 8], strides = [1, 1]} : vector<16x96xf32> to vector<16x8xf32>
    %172 = vector.extract_strided_slice %131 {offsets = [0, 80], sizes = [16, 8], strides = [1, 1]} : vector<16x96xf32> to vector<16x8xf32>
    %cst_60 = arith.constant dense<0.000000e+00> : vector<16x16xf32>
    %173 = tpu.matmul %170, %171, %cst_60 {dimension_numbers = #tpu.dot_dimension_numbers<[1], [1], [0], [0], [0, 0, 1, 0], [], []>} : vector<16x8xf32>, vector<16x8xf32>, vector<16x16xf32> -> vector<16x16xf32>
    %cst_61 = arith.constant 0.353553385 : f32
    %174 = vector.broadcast %cst_61 : f32 to vector<16x16xf32>
    %175 = arith.mulf %173, %174 : vector<16x16xf32>
    %176 = vector.broadcast %133 : vector<1x16xf32> to vector<16x16xf32>
    %177 = arith.addf %175, %176 : vector<16x16xf32>
    %cst_62 = arith.constant dense<0xFF800000> : vector<16xf32>
    %178 = vector.multi_reduction <maximumf>, %177, %cst_62 [1] : vector<16x16xf32> to vector<16xf32>
    %179 = vector.shape_cast %178 : vector<16xf32> to vector<16x1xf32>
    %180 = vector.broadcast %179 : vector<16x1xf32> to vector<16x16xf32>
    %181 = arith.subf %177, %180 : vector<16x16xf32>
    %182 = math.exp %181 : vector<16x16xf32>
    %cst_63 = arith.constant dense<0.000000e+00> : vector<16xf32>
    %183 = vector.multi_reduction <add>, %182, %cst_63 [1] : vector<16x16xf32> to vector<16xf32>
    %184 = vector.shape_cast %183 : vector<16xf32> to vector<16x1xf32>
    %185 = vector.broadcast %184 : vector<16x1xf32> to vector<16x16xf32>
    %186 = arith.divf %182, %185 : vector<16x16xf32>
    %cst_64 = arith.constant dense<0.000000e+00> : vector<16x8xf32>
    %187 = tpu.matmul %186, %172, %cst_64 {dimension_numbers = #tpu.dot_dimension_numbers<[1], [0], [0], [1], [0, 0, 1, 1], [], []>} : vector<16x16xf32>, vector<16x8xf32>, vector<16x8xf32> -> vector<16x8xf32>
    %188 = vector.extract_strided_slice %131 {offsets = [0, 24], sizes = [16, 8], strides = [1, 1]} : vector<16x96xf32> to vector<16x8xf32>
    %189 = vector.extract_strided_slice %131 {offsets = [0, 56], sizes = [16, 8], strides = [1, 1]} : vector<16x96xf32> to vector<16x8xf32>
    %190 = vector.extract_strided_slice %131 {offsets = [0, 88], sizes = [16, 8], strides = [1, 1]} : vector<16x96xf32> to vector<16x8xf32>
    %cst_65 = arith.constant dense<0.000000e+00> : vector<16x16xf32>
    %191 = tpu.matmul %188, %189, %cst_65 {dimension_numbers = #tpu.dot_dimension_numbers<[1], [1], [0], [0], [0, 0, 1, 0], [], []>} : vector<16x8xf32>, vector<16x8xf32>, vector<16x16xf32> -> vector<16x16xf32>
    %cst_66 = arith.constant 0.353553385 : f32
    %192 = vector.broadcast %cst_66 : f32 to vector<16x16xf32>
    %193 = arith.mulf %191, %192 : vector<16x16xf32>
    %194 = vector.broadcast %133 : vector<1x16xf32> to vector<16x16xf32>
    %195 = arith.addf %193, %194 : vector<16x16xf32>
    %cst_67 = arith.constant dense<0xFF800000> : vector<16xf32>
    %196 = vector.multi_reduction <maximumf>, %195, %cst_67 [1] : vector<16x16xf32> to vector<16xf32>
    %197 = vector.shape_cast %196 : vector<16xf32> to vector<16x1xf32>
    %198 = vector.broadcast %197 : vector<16x1xf32> to vector<16x16xf32>
    %199 = arith.subf %195, %198 : vector<16x16xf32>
    %200 = math.exp %199 : vector<16x16xf32>
    %cst_68 = arith.constant dense<0.000000e+00> : vector<16xf32>
    %201 = vector.multi_reduction <add>, %200, %cst_68 [1] : vector<16x16xf32> to vector<16xf32>
    %202 = vector.shape_cast %201 : vector<16xf32> to vector<16x1xf32>
    %203 = vector.broadcast %202 : vector<16x1xf32> to vector<16x16xf32>
    %204 = arith.divf %200, %203 : vector<16x16xf32>
    %cst_69 = arith.constant dense<0.000000e+00> : vector<16x8xf32>
    %205 = tpu.matmul %204, %190, %cst_69 {dimension_numbers = #tpu.dot_dimension_numbers<[1], [0], [0], [1], [0, 0, 1, 1], [], []>} : vector<16x16xf32>, vector<16x8xf32>, vector<16x8xf32> -> vector<16x8xf32>
    %206 = tpu.concatenate %151, %169, %187, %205 in 1 : vector<16x8xf32>, vector<16x8xf32>, vector<16x8xf32>, vector<16x8xf32> -> vector<16x32xf32>
    %207 = tpu.concatenate %130, %206 in 0 : vector<16x32xf32>, vector<16x32xf32> -> vector<32x32xf32>
    %c0_70 = arith.constant 0 : index
    %c0_71 = arith.constant 0 : index
    %c0_72 = arith.constant 0 : index
    %208 = vector.load %arg9[%c0_70, %c0_71, %c0_72] : memref<2x32x32xf32, #tpu.memory_space<vmem>>, vector<1x32x32xf32>
    %209 = vector.shape_cast %208 : vector<1x32x32xf32> to vector<32x32xf32>
    %cst_73 = arith.constant dense<0.000000e+00> : vector<32x32xf32>
    %210 = tpu.matmul %207, %209, %cst_73 {dimension_numbers = #tpu.dot_dimension_numbers<[1], [0], [0], [1], [0, 0, 1, 1], [], []>} : vector<32x32xf32>, vector<32x32xf32>, vector<32x32xf32> -> vector<32x32xf32>
    %211 = arith.addf %22, %210 : vector<32x32xf32>
    %c0_74 = arith.constant 0 : index
    %c0_75 = arith.constant 0 : index
    %c0_76 = arith.constant 0 : index
    %212 = vector.load %arg10[%c0_74, %c0_75, %c0_76] : memref<2x1x32xf32, #tpu.memory_space<vmem>>, vector<1x1x32xf32>
    %213 = vector.shape_cast %212 : vector<1x1x32xf32> to vector<1x32xf32>
    %214 = vector.broadcast %213 : vector<1x32xf32> to vector<32x32xf32>
    %215 = arith.addf %211, %214 : vector<32x32xf32>
    %c0_77 = arith.constant 0 : index
    %c0_78 = arith.constant 0 : index
    %c0_79 = arith.constant 0 : index
    %216 = vector.load %arg11[%c0_77, %c0_78, %c0_79] : memref<2x1x32xf32, #tpu.memory_space<vmem>>, vector<1x1x32xf32>
    %217 = vector.shape_cast %216 : vector<1x1x32xf32> to vector<1x32xf32>
    %c0_80 = arith.constant 0 : index
    %c0_81 = arith.constant 0 : index
    %c0_82 = arith.constant 0 : index
    %218 = vector.load %arg12[%c0_80, %c0_81, %c0_82] : memref<2x1x32xf32, #tpu.memory_space<vmem>>, vector<1x1x32xf32>
    %219 = vector.shape_cast %218 : vector<1x1x32xf32> to vector<1x32xf32>
    %cst_83 = arith.constant dense<0.000000e+00> : vector<32xf32>
    %220 = vector.multi_reduction <add>, %215, %cst_83 [1] : vector<32x32xf32> to vector<32xf32>
    %221 = vector.shape_cast %220 : vector<32xf32> to vector<32x1xf32>
    %cst_84 = arith.constant 3.200000e+01 : f32
    %222 = vector.broadcast %cst_84 : f32 to vector<32x1xf32>
    %223 = arith.divf %221, %222 : vector<32x1xf32>
    %224 = vector.broadcast %223 : vector<32x1xf32> to vector<32x32xf32>
    %225 = arith.subf %215, %224 : vector<32x32xf32>
    %226 = arith.mulf %225, %225 : vector<32x32xf32>
    %cst_85 = arith.constant dense<0.000000e+00> : vector<32xf32>
    %227 = vector.multi_reduction <add>, %226, %cst_85 [1] : vector<32x32xf32> to vector<32xf32>
    %228 = vector.shape_cast %227 : vector<32xf32> to vector<32x1xf32>
    %cst_86 = arith.constant 3.200000e+01 : f32
    %229 = vector.broadcast %cst_86 : f32 to vector<32x1xf32>
    %230 = arith.divf %228, %229 : vector<32x1xf32>
    %cst_87 = arith.constant 9.99999996E-13 : f32
    %231 = vector.broadcast %cst_87 : f32 to vector<32x1xf32>
    %232 = arith.addf %230, %231 : vector<32x1xf32>
    %233 = math.rsqrt %232 : vector<32x1xf32>
    %234 = vector.broadcast %233 : vector<32x1xf32> to vector<32x32xf32>
    %235 = arith.mulf %225, %234 : vector<32x32xf32>
    %236 = vector.broadcast %217 : vector<1x32xf32> to vector<32x32xf32>
    %237 = arith.mulf %235, %236 : vector<32x32xf32>
    %238 = vector.broadcast %219 : vector<1x32xf32> to vector<32x32xf32>
    %239 = arith.addf %237, %238 : vector<32x32xf32>
    %c0_88 = arith.constant 0 : index
    %c0_89 = arith.constant 0 : index
    %c0_90 = arith.constant 0 : index
    %240 = vector.load %arg13[%c0_88, %c0_89, %c0_90] : memref<2x32x64xf32, #tpu.memory_space<vmem>>, vector<1x32x64xf32>
    %241 = vector.shape_cast %240 : vector<1x32x64xf32> to vector<32x64xf32>
    %cst_91 = arith.constant dense<0.000000e+00> : vector<32x64xf32>
    %242 = tpu.matmul %239, %241, %cst_91 {dimension_numbers = #tpu.dot_dimension_numbers<[1], [0], [0], [1], [0, 0, 1, 1], [], []>} : vector<32x32xf32>, vector<32x64xf32>, vector<32x64xf32> -> vector<32x64xf32>
    %c0_92 = arith.constant 0 : index
    %c0_93 = arith.constant 0 : index
    %c0_94 = arith.constant 0 : index
    %243 = vector.load %arg14[%c0_92, %c0_93, %c0_94] : memref<2x1x64xf32, #tpu.memory_space<vmem>>, vector<1x1x64xf32>
    %244 = vector.shape_cast %243 : vector<1x1x64xf32> to vector<1x64xf32>
    %245 = vector.broadcast %244 : vector<1x64xf32> to vector<32x64xf32>
    %246 = arith.addf %242, %245 : vector<32x64xf32>
    %247 = arith.mulf %246, %246 : vector<32x64xf32>
    %248 = arith.mulf %246, %247 : vector<32x64xf32>
    %cst_95 = arith.constant 4.471500e-02 : f32
    %249 = vector.broadcast %cst_95 : f32 to vector<32x64xf32>
    %250 = arith.mulf %249, %248 : vector<32x64xf32>
    %251 = arith.addf %246, %250 : vector<32x64xf32>
    %cst_96 = arith.constant 0.797884583 : f32
    %252 = vector.broadcast %cst_96 : f32 to vector<32x64xf32>
    %253 = arith.mulf %252, %251 : vector<32x64xf32>
    %254 = math.tanh %253 : vector<32x64xf32>
    %cst_97 = arith.constant 1.000000e+00 : f32
    %255 = vector.broadcast %cst_97 : f32 to vector<32x64xf32>
    %256 = arith.addf %255, %254 : vector<32x64xf32>
    %cst_98 = arith.constant 5.000000e-01 : f32
    %257 = vector.broadcast %cst_98 : f32 to vector<32x64xf32>
    %258 = arith.mulf %257, %256 : vector<32x64xf32>
    %259 = arith.mulf %246, %258 : vector<32x64xf32>
    %c0_99 = arith.constant 0 : index
    %c0_100 = arith.constant 0 : index
    %c0_101 = arith.constant 0 : index
    %260 = vector.load %arg15[%c0_99, %c0_100, %c0_101] : memref<2x64x32xf32, #tpu.memory_space<vmem>>, vector<1x64x32xf32>
    %261 = vector.shape_cast %260 : vector<1x64x32xf32> to vector<64x32xf32>
    %cst_102 = arith.constant dense<0.000000e+00> : vector<32x32xf32>
    %262 = tpu.matmul %259, %261, %cst_102 {dimension_numbers = #tpu.dot_dimension_numbers<[1], [0], [0], [1], [0, 0, 1, 1], [], []>} : vector<32x64xf32>, vector<64x32xf32>, vector<32x32xf32> -> vector<32x32xf32>
    %263 = arith.addf %215, %262 : vector<32x32xf32>
    %c0_103 = arith.constant 0 : index
    %c0_104 = arith.constant 0 : index
    %c0_105 = arith.constant 0 : index
    %264 = vector.load %arg16[%c0_103, %c0_104, %c0_105] : memref<2x1x32xf32, #tpu.memory_space<vmem>>, vector<1x1x32xf32>
    %265 = vector.shape_cast %264 : vector<1x1x32xf32> to vector<1x32xf32>
    %266 = vector.broadcast %265 : vector<1x32xf32> to vector<32x32xf32>
    %267 = arith.addf %263, %266 : vector<32x32xf32>
    %c1 = arith.constant 1 : index
    %c0_106 = arith.constant 0 : index
    %c0_107 = arith.constant 0 : index
    %268 = vector.load %arg5[%c1, %c0_106, %c0_107] : memref<2x1x32xf32, #tpu.memory_space<vmem>>, vector<1x1x32xf32>
    %269 = vector.shape_cast %268 : vector<1x1x32xf32> to vector<1x32xf32>
    %c1_108 = arith.constant 1 : index
    %c0_109 = arith.constant 0 : index
    %c0_110 = arith.constant 0 : index
    %270 = vector.load %arg6[%c1_108, %c0_109, %c0_110] : memref<2x1x32xf32, #tpu.memory_space<vmem>>, vector<1x1x32xf32>
    %271 = vector.shape_cast %270 : vector<1x1x32xf32> to vector<1x32xf32>
    %cst_111 = arith.constant dense<0.000000e+00> : vector<32xf32>
    %272 = vector.multi_reduction <add>, %267, %cst_111 [1] : vector<32x32xf32> to vector<32xf32>
    %273 = vector.shape_cast %272 : vector<32xf32> to vector<32x1xf32>
    %cst_112 = arith.constant 3.200000e+01 : f32
    %274 = vector.broadcast %cst_112 : f32 to vector<32x1xf32>
    %275 = arith.divf %273, %274 : vector<32x1xf32>
    %276 = vector.broadcast %275 : vector<32x1xf32> to vector<32x32xf32>
    %277 = arith.subf %267, %276 : vector<32x32xf32>
    %278 = arith.mulf %277, %277 : vector<32x32xf32>
    %cst_113 = arith.constant dense<0.000000e+00> : vector<32xf32>
    %279 = vector.multi_reduction <add>, %278, %cst_113 [1] : vector<32x32xf32> to vector<32xf32>
    %280 = vector.shape_cast %279 : vector<32xf32> to vector<32x1xf32>
    %cst_114 = arith.constant 3.200000e+01 : f32
    %281 = vector.broadcast %cst_114 : f32 to vector<32x1xf32>
    %282 = arith.divf %280, %281 : vector<32x1xf32>
    %cst_115 = arith.constant 9.99999996E-13 : f32
    %283 = vector.broadcast %cst_115 : f32 to vector<32x1xf32>
    %284 = arith.addf %282, %283 : vector<32x1xf32>
    %285 = math.rsqrt %284 : vector<32x1xf32>
    %286 = vector.broadcast %285 : vector<32x1xf32> to vector<32x32xf32>
    %287 = arith.mulf %277, %286 : vector<32x32xf32>
    %288 = vector.broadcast %269 : vector<1x32xf32> to vector<32x32xf32>
    %289 = arith.mulf %287, %288 : vector<32x32xf32>
    %290 = vector.broadcast %271 : vector<1x32xf32> to vector<32x32xf32>
    %291 = arith.addf %289, %290 : vector<32x32xf32>
    %c1_116 = arith.constant 1 : index
    %c0_117 = arith.constant 0 : index
    %c0_118 = arith.constant 0 : index
    %292 = vector.load %arg7[%c1_116, %c0_117, %c0_118] : memref<2x32x96xf32, #tpu.memory_space<vmem>>, vector<1x32x96xf32>
    %293 = vector.shape_cast %292 : vector<1x32x96xf32> to vector<32x96xf32>
    %cst_119 = arith.constant dense<0.000000e+00> : vector<32x96xf32>
    %294 = tpu.matmul %291, %293, %cst_119 {dimension_numbers = #tpu.dot_dimension_numbers<[1], [0], [0], [1], [0, 0, 1, 1], [], []>} : vector<32x32xf32>, vector<32x96xf32>, vector<32x96xf32> -> vector<32x96xf32>
    %c1_120 = arith.constant 1 : index
    %c0_121 = arith.constant 0 : index
    %c0_122 = arith.constant 0 : index
    %295 = vector.load %arg8[%c1_120, %c0_121, %c0_122] : memref<2x1x96xf32, #tpu.memory_space<vmem>>, vector<1x1x96xf32>
    %296 = vector.shape_cast %295 : vector<1x1x96xf32> to vector<1x96xf32>
    %297 = vector.broadcast %296 : vector<1x96xf32> to vector<32x96xf32>
    %298 = arith.addf %294, %297 : vector<32x96xf32>
    %299 = vector.extract_strided_slice %298 {offsets = [0, 0], sizes = [16, 96], strides = [1, 1]} : vector<32x96xf32> to vector<16x96xf32>
    %300 = vector.extract_strided_slice %23 {offsets = [0, 0, 0], sizes = [1, 1, 16], strides = [1, 1, 1]} : vector<1x2x16xf32> to vector<1x1x16xf32>
    %301 = vector.shape_cast %300 : vector<1x1x16xf32> to vector<1x16xf32>
    %302 = vector.extract_strided_slice %299 {offsets = [0, 0], sizes = [16, 8], strides = [1, 1]} : vector<16x96xf32> to vector<16x8xf32>
    %303 = vector.extract_strided_slice %299 {offsets = [0, 32], sizes = [16, 8], strides = [1, 1]} : vector<16x96xf32> to vector<16x8xf32>
    %304 = vector.extract_strided_slice %299 {offsets = [0, 64], sizes = [16, 8], strides = [1, 1]} : vector<16x96xf32> to vector<16x8xf32>
    %cst_123 = arith.constant dense<0.000000e+00> : vector<16x16xf32>
    %305 = tpu.matmul %302, %303, %cst_123 {dimension_numbers = #tpu.dot_dimension_numbers<[1], [1], [0], [0], [0, 0, 1, 0], [], []>} : vector<16x8xf32>, vector<16x8xf32>, vector<16x16xf32> -> vector<16x16xf32>
    %cst_124 = arith.constant 0.353553385 : f32
    %306 = vector.broadcast %cst_124 : f32 to vector<16x16xf32>
    %307 = arith.mulf %305, %306 : vector<16x16xf32>
    %308 = vector.broadcast %301 : vector<1x16xf32> to vector<16x16xf32>
    %309 = arith.addf %307, %308 : vector<16x16xf32>
    %cst_125 = arith.constant dense<0xFF800000> : vector<16xf32>
    %310 = vector.multi_reduction <maximumf>, %309, %cst_125 [1] : vector<16x16xf32> to vector<16xf32>
    %311 = vector.shape_cast %310 : vector<16xf32> to vector<16x1xf32>
    %312 = vector.broadcast %311 : vector<16x1xf32> to vector<16x16xf32>
    %313 = arith.subf %309, %312 : vector<16x16xf32>
    %314 = math.exp %313 : vector<16x16xf32>
    %cst_126 = arith.constant dense<0.000000e+00> : vector<16xf32>
    %315 = vector.multi_reduction <add>, %314, %cst_126 [1] : vector<16x16xf32> to vector<16xf32>
    %316 = vector.shape_cast %315 : vector<16xf32> to vector<16x1xf32>
    %317 = vector.broadcast %316 : vector<16x1xf32> to vector<16x16xf32>
    %318 = arith.divf %314, %317 : vector<16x16xf32>
    %cst_127 = arith.constant dense<0.000000e+00> : vector<16x8xf32>
    %319 = tpu.matmul %318, %304, %cst_127 {dimension_numbers = #tpu.dot_dimension_numbers<[1], [0], [0], [1], [0, 0, 1, 1], [], []>} : vector<16x16xf32>, vector<16x8xf32>, vector<16x8xf32> -> vector<16x8xf32>
    %320 = vector.extract_strided_slice %299 {offsets = [0, 8], sizes = [16, 8], strides = [1, 1]} : vector<16x96xf32> to vector<16x8xf32>
    %321 = vector.extract_strided_slice %299 {offsets = [0, 40], sizes = [16, 8], strides = [1, 1]} : vector<16x96xf32> to vector<16x8xf32>
    %322 = vector.extract_strided_slice %299 {offsets = [0, 72], sizes = [16, 8], strides = [1, 1]} : vector<16x96xf32> to vector<16x8xf32>
    %cst_128 = arith.constant dense<0.000000e+00> : vector<16x16xf32>
    %323 = tpu.matmul %320, %321, %cst_128 {dimension_numbers = #tpu.dot_dimension_numbers<[1], [1], [0], [0], [0, 0, 1, 0], [], []>} : vector<16x8xf32>, vector<16x8xf32>, vector<16x16xf32> -> vector<16x16xf32>
    %cst_129 = arith.constant 0.353553385 : f32
    %324 = vector.broadcast %cst_129 : f32 to vector<16x16xf32>
    %325 = arith.mulf %323, %324 : vector<16x16xf32>
    %326 = vector.broadcast %301 : vector<1x16xf32> to vector<16x16xf32>
    %327 = arith.addf %325, %326 : vector<16x16xf32>
    %cst_130 = arith.constant dense<0xFF800000> : vector<16xf32>
    %328 = vector.multi_reduction <maximumf>, %327, %cst_130 [1] : vector<16x16xf32> to vector<16xf32>
    %329 = vector.shape_cast %328 : vector<16xf32> to vector<16x1xf32>
    %330 = vector.broadcast %329 : vector<16x1xf32> to vector<16x16xf32>
    %331 = arith.subf %327, %330 : vector<16x16xf32>
    %332 = math.exp %331 : vector<16x16xf32>
    %cst_131 = arith.constant dense<0.000000e+00> : vector<16xf32>
    %333 = vector.multi_reduction <add>, %332, %cst_131 [1] : vector<16x16xf32> to vector<16xf32>
    %334 = vector.shape_cast %333 : vector<16xf32> to vector<16x1xf32>
    %335 = vector.broadcast %334 : vector<16x1xf32> to vector<16x16xf32>
    %336 = arith.divf %332, %335 : vector<16x16xf32>
    %cst_132 = arith.constant dense<0.000000e+00> : vector<16x8xf32>
    %337 = tpu.matmul %336, %322, %cst_132 {dimension_numbers = #tpu.dot_dimension_numbers<[1], [0], [0], [1], [0, 0, 1, 1], [], []>} : vector<16x16xf32>, vector<16x8xf32>, vector<16x8xf32> -> vector<16x8xf32>
    %338 = vector.extract_strided_slice %299 {offsets = [0, 16], sizes = [16, 8], strides = [1, 1]} : vector<16x96xf32> to vector<16x8xf32>
    %339 = vector.extract_strided_slice %299 {offsets = [0, 48], sizes = [16, 8], strides = [1, 1]} : vector<16x96xf32> to vector<16x8xf32>
    %340 = vector.extract_strided_slice %299 {offsets = [0, 80], sizes = [16, 8], strides = [1, 1]} : vector<16x96xf32> to vector<16x8xf32>
    %cst_133 = arith.constant dense<0.000000e+00> : vector<16x16xf32>
    %341 = tpu.matmul %338, %339, %cst_133 {dimension_numbers = #tpu.dot_dimension_numbers<[1], [1], [0], [0], [0, 0, 1, 0], [], []>} : vector<16x8xf32>, vector<16x8xf32>, vector<16x16xf32> -> vector<16x16xf32>
    %cst_134 = arith.constant 0.353553385 : f32
    %342 = vector.broadcast %cst_134 : f32 to vector<16x16xf32>
    %343 = arith.mulf %341, %342 : vector<16x16xf32>
    %344 = vector.broadcast %301 : vector<1x16xf32> to vector<16x16xf32>
    %345 = arith.addf %343, %344 : vector<16x16xf32>
    %cst_135 = arith.constant dense<0xFF800000> : vector<16xf32>
    %346 = vector.multi_reduction <maximumf>, %345, %cst_135 [1] : vector<16x16xf32> to vector<16xf32>
    %347 = vector.shape_cast %346 : vector<16xf32> to vector<16x1xf32>
    %348 = vector.broadcast %347 : vector<16x1xf32> to vector<16x16xf32>
    %349 = arith.subf %345, %348 : vector<16x16xf32>
    %350 = math.exp %349 : vector<16x16xf32>
    %cst_136 = arith.constant dense<0.000000e+00> : vector<16xf32>
    %351 = vector.multi_reduction <add>, %350, %cst_136 [1] : vector<16x16xf32> to vector<16xf32>
    %352 = vector.shape_cast %351 : vector<16xf32> to vector<16x1xf32>
    %353 = vector.broadcast %352 : vector<16x1xf32> to vector<16x16xf32>
    %354 = arith.divf %350, %353 : vector<16x16xf32>
    %cst_137 = arith.constant dense<0.000000e+00> : vector<16x8xf32>
    %355 = tpu.matmul %354, %340, %cst_137 {dimension_numbers = #tpu.dot_dimension_numbers<[1], [0], [0], [1], [0, 0, 1, 1], [], []>} : vector<16x16xf32>, vector<16x8xf32>, vector<16x8xf32> -> vector<16x8xf32>
    %356 = vector.extract_strided_slice %299 {offsets = [0, 24], sizes = [16, 8], strides = [1, 1]} : vector<16x96xf32> to vector<16x8xf32>
    %357 = vector.extract_strided_slice %299 {offsets = [0, 56], sizes = [16, 8], strides = [1, 1]} : vector<16x96xf32> to vector<16x8xf32>
    %358 = vector.extract_strided_slice %299 {offsets = [0, 88], sizes = [16, 8], strides = [1, 1]} : vector<16x96xf32> to vector<16x8xf32>
    %cst_138 = arith.constant dense<0.000000e+00> : vector<16x16xf32>
    %359 = tpu.matmul %356, %357, %cst_138 {dimension_numbers = #tpu.dot_dimension_numbers<[1], [1], [0], [0], [0, 0, 1, 0], [], []>} : vector<16x8xf32>, vector<16x8xf32>, vector<16x16xf32> -> vector<16x16xf32>
    %cst_139 = arith.constant 0.353553385 : f32
    %360 = vector.broadcast %cst_139 : f32 to vector<16x16xf32>
    %361 = arith.mulf %359, %360 : vector<16x16xf32>
    %362 = vector.broadcast %301 : vector<1x16xf32> to vector<16x16xf32>
    %363 = arith.addf %361, %362 : vector<16x16xf32>
    %cst_140 = arith.constant dense<0xFF800000> : vector<16xf32>
    %364 = vector.multi_reduction <maximumf>, %363, %cst_140 [1] : vector<16x16xf32> to vector<16xf32>
    %365 = vector.shape_cast %364 : vector<16xf32> to vector<16x1xf32>
    %366 = vector.broadcast %365 : vector<16x1xf32> to vector<16x16xf32>
    %367 = arith.subf %363, %366 : vector<16x16xf32>
    %368 = math.exp %367 : vector<16x16xf32>
    %cst_141 = arith.constant dense<0.000000e+00> : vector<16xf32>
    %369 = vector.multi_reduction <add>, %368, %cst_141 [1] : vector<16x16xf32> to vector<16xf32>
    %370 = vector.shape_cast %369 : vector<16xf32> to vector<16x1xf32>
    %371 = vector.broadcast %370 : vector<16x1xf32> to vector<16x16xf32>
    %372 = arith.divf %368, %371 : vector<16x16xf32>
    %cst_142 = arith.constant dense<0.000000e+00> : vector<16x8xf32>
    %373 = tpu.matmul %372, %358, %cst_142 {dimension_numbers = #tpu.dot_dimension_numbers<[1], [0], [0], [1], [0, 0, 1, 1], [], []>} : vector<16x16xf32>, vector<16x8xf32>, vector<16x8xf32> -> vector<16x8xf32>
    %374 = tpu.concatenate %319, %337, %355, %373 in 1 : vector<16x8xf32>, vector<16x8xf32>, vector<16x8xf32>, vector<16x8xf32> -> vector<16x32xf32>
    %375 = vector.extract_strided_slice %298 {offsets = [16, 0], sizes = [16, 96], strides = [1, 1]} : vector<32x96xf32> to vector<16x96xf32>
    %376 = vector.extract_strided_slice %23 {offsets = [0, 1, 0], sizes = [1, 1, 16], strides = [1, 1, 1]} : vector<1x2x16xf32> to vector<1x1x16xf32>
    %377 = vector.shape_cast %376 : vector<1x1x16xf32> to vector<1x16xf32>
    %378 = vector.extract_strided_slice %375 {offsets = [0, 0], sizes = [16, 8], strides = [1, 1]} : vector<16x96xf32> to vector<16x8xf32>
    %379 = vector.extract_strided_slice %375 {offsets = [0, 32], sizes = [16, 8], strides = [1, 1]} : vector<16x96xf32> to vector<16x8xf32>
    %380 = vector.extract_strided_slice %375 {offsets = [0, 64], sizes = [16, 8], strides = [1, 1]} : vector<16x96xf32> to vector<16x8xf32>
    %cst_143 = arith.constant dense<0.000000e+00> : vector<16x16xf32>
    %381 = tpu.matmul %378, %379, %cst_143 {dimension_numbers = #tpu.dot_dimension_numbers<[1], [1], [0], [0], [0, 0, 1, 0], [], []>} : vector<16x8xf32>, vector<16x8xf32>, vector<16x16xf32> -> vector<16x16xf32>
    %cst_144 = arith.constant 0.353553385 : f32
    %382 = vector.broadcast %cst_144 : f32 to vector<16x16xf32>
    %383 = arith.mulf %381, %382 : vector<16x16xf32>
    %384 = vector.broadcast %377 : vector<1x16xf32> to vector<16x16xf32>
    %385 = arith.addf %383, %384 : vector<16x16xf32>
    %cst_145 = arith.constant dense<0xFF800000> : vector<16xf32>
    %386 = vector.multi_reduction <maximumf>, %385, %cst_145 [1] : vector<16x16xf32> to vector<16xf32>
    %387 = vector.shape_cast %386 : vector<16xf32> to vector<16x1xf32>
    %388 = vector.broadcast %387 : vector<16x1xf32> to vector<16x16xf32>
    %389 = arith.subf %385, %388 : vector<16x16xf32>
    %390 = math.exp %389 : vector<16x16xf32>
    %cst_146 = arith.constant dense<0.000000e+00> : vector<16xf32>
    %391 = vector.multi_reduction <add>, %390, %cst_146 [1] : vector<16x16xf32> to vector<16xf32>
    %392 = vector.shape_cast %391 : vector<16xf32> to vector<16x1xf32>
    %393 = vector.broadcast %392 : vector<16x1xf32> to vector<16x16xf32>
    %394 = arith.divf %390, %393 : vector<16x16xf32>
    %cst_147 = arith.constant dense<0.000000e+00> : vector<16x8xf32>
    %395 = tpu.matmul %394, %380, %cst_147 {dimension_numbers = #tpu.dot_dimension_numbers<[1], [0], [0], [1], [0, 0, 1, 1], [], []>} : vector<16x16xf32>, vector<16x8xf32>, vector<16x8xf32> -> vector<16x8xf32>
    %396 = vector.extract_strided_slice %375 {offsets = [0, 8], sizes = [16, 8], strides = [1, 1]} : vector<16x96xf32> to vector<16x8xf32>
    %397 = vector.extract_strided_slice %375 {offsets = [0, 40], sizes = [16, 8], strides = [1, 1]} : vector<16x96xf32> to vector<16x8xf32>
    %398 = vector.extract_strided_slice %375 {offsets = [0, 72], sizes = [16, 8], strides = [1, 1]} : vector<16x96xf32> to vector<16x8xf32>
    %cst_148 = arith.constant dense<0.000000e+00> : vector<16x16xf32>
    %399 = tpu.matmul %396, %397, %cst_148 {dimension_numbers = #tpu.dot_dimension_numbers<[1], [1], [0], [0], [0, 0, 1, 0], [], []>} : vector<16x8xf32>, vector<16x8xf32>, vector<16x16xf32> -> vector<16x16xf32>
    %cst_149 = arith.constant 0.353553385 : f32
    %400 = vector.broadcast %cst_149 : f32 to vector<16x16xf32>
    %401 = arith.mulf %399, %400 : vector<16x16xf32>
    %402 = vector.broadcast %377 : vector<1x16xf32> to vector<16x16xf32>
    %403 = arith.addf %401, %402 : vector<16x16xf32>
    %cst_150 = arith.constant dense<0xFF800000> : vector<16xf32>
    %404 = vector.multi_reduction <maximumf>, %403, %cst_150 [1] : vector<16x16xf32> to vector<16xf32>
    %405 = vector.shape_cast %404 : vector<16xf32> to vector<16x1xf32>
    %406 = vector.broadcast %405 : vector<16x1xf32> to vector<16x16xf32>
    %407 = arith.subf %403, %406 : vector<16x16xf32>
    %408 = math.exp %407 : vector<16x16xf32>
    %cst_151 = arith.constant dense<0.000000e+00> : vector<16xf32>
    %409 = vector.multi_reduction <add>, %408, %cst_151 [1] : vector<16x16xf32> to vector<16xf32>
    %410 = vector.shape_cast %409 : vector<16xf32> to vector<16x1xf32>
    %411 = vector.broadcast %410 : vector<16x1xf32> to vector<16x16xf32>
    %412 = arith.divf %408, %411 : vector<16x16xf32>
    %cst_152 = arith.constant dense<0.000000e+00> : vector<16x8xf32>
    %413 = tpu.matmul %412, %398, %cst_152 {dimension_numbers = #tpu.dot_dimension_numbers<[1], [0], [0], [1], [0, 0, 1, 1], [], []>} : vector<16x16xf32>, vector<16x8xf32>, vector<16x8xf32> -> vector<16x8xf32>
    %414 = vector.extract_strided_slice %375 {offsets = [0, 16], sizes = [16, 8], strides = [1, 1]} : vector<16x96xf32> to vector<16x8xf32>
    %415 = vector.extract_strided_slice %375 {offsets = [0, 48], sizes = [16, 8], strides = [1, 1]} : vector<16x96xf32> to vector<16x8xf32>
    %416 = vector.extract_strided_slice %375 {offsets = [0, 80], sizes = [16, 8], strides = [1, 1]} : vector<16x96xf32> to vector<16x8xf32>
    %cst_153 = arith.constant dense<0.000000e+00> : vector<16x16xf32>
    %417 = tpu.matmul %414, %415, %cst_153 {dimension_numbers = #tpu.dot_dimension_numbers<[1], [1], [0], [0], [0, 0, 1, 0], [], []>} : vector<16x8xf32>, vector<16x8xf32>, vector<16x16xf32> -> vector<16x16xf32>
    %cst_154 = arith.constant 0.353553385 : f32
    %418 = vector.broadcast %cst_154 : f32 to vector<16x16xf32>
    %419 = arith.mulf %417, %418 : vector<16x16xf32>
    %420 = vector.broadcast %377 : vector<1x16xf32> to vector<16x16xf32>
    %421 = arith.addf %419, %420 : vector<16x16xf32>
    %cst_155 = arith.constant dense<0xFF800000> : vector<16xf32>
    %422 = vector.multi_reduction <maximumf>, %421, %cst_155 [1] : vector<16x16xf32> to vector<16xf32>
    %423 = vector.shape_cast %422 : vector<16xf32> to vector<16x1xf32>
    %424 = vector.broadcast %423 : vector<16x1xf32> to vector<16x16xf32>
    %425 = arith.subf %421, %424 : vector<16x16xf32>
    %426 = math.exp %425 : vector<16x16xf32>
    %cst_156 = arith.constant dense<0.000000e+00> : vector<16xf32>
    %427 = vector.multi_reduction <add>, %426, %cst_156 [1] : vector<16x16xf32> to vector<16xf32>
    %428 = vector.shape_cast %427 : vector<16xf32> to vector<16x1xf32>
    %429 = vector.broadcast %428 : vector<16x1xf32> to vector<16x16xf32>
    %430 = arith.divf %426, %429 : vector<16x16xf32>
    %cst_157 = arith.constant dense<0.000000e+00> : vector<16x8xf32>
    %431 = tpu.matmul %430, %416, %cst_157 {dimension_numbers = #tpu.dot_dimension_numbers<[1], [0], [0], [1], [0, 0, 1, 1], [], []>} : vector<16x16xf32>, vector<16x8xf32>, vector<16x8xf32> -> vector<16x8xf32>
    %432 = vector.extract_strided_slice %375 {offsets = [0, 24], sizes = [16, 8], strides = [1, 1]} : vector<16x96xf32> to vector<16x8xf32>
    %433 = vector.extract_strided_slice %375 {offsets = [0, 56], sizes = [16, 8], strides = [1, 1]} : vector<16x96xf32> to vector<16x8xf32>
    %434 = vector.extract_strided_slice %375 {offsets = [0, 88], sizes = [16, 8], strides = [1, 1]} : vector<16x96xf32> to vector<16x8xf32>
    %cst_158 = arith.constant dense<0.000000e+00> : vector<16x16xf32>
    %435 = tpu.matmul %432, %433, %cst_158 {dimension_numbers = #tpu.dot_dimension_numbers<[1], [1], [0], [0], [0, 0, 1, 0], [], []>} : vector<16x8xf32>, vector<16x8xf32>, vector<16x16xf32> -> vector<16x16xf32>
    %cst_159 = arith.constant 0.353553385 : f32
    %436 = vector.broadcast %cst_159 : f32 to vector<16x16xf32>
    %437 = arith.mulf %435, %436 : vector<16x16xf32>
    %438 = vector.broadcast %377 : vector<1x16xf32> to vector<16x16xf32>
    %439 = arith.addf %437, %438 : vector<16x16xf32>
    %cst_160 = arith.constant dense<0xFF800000> : vector<16xf32>
    %440 = vector.multi_reduction <maximumf>, %439, %cst_160 [1] : vector<16x16xf32> to vector<16xf32>
    %441 = vector.shape_cast %440 : vector<16xf32> to vector<16x1xf32>
    %442 = vector.broadcast %441 : vector<16x1xf32> to vector<16x16xf32>
    %443 = arith.subf %439, %442 : vector<16x16xf32>
    %444 = math.exp %443 : vector<16x16xf32>
    %cst_161 = arith.constant dense<0.000000e+00> : vector<16xf32>
    %445 = vector.multi_reduction <add>, %444, %cst_161 [1] : vector<16x16xf32> to vector<16xf32>
    %446 = vector.shape_cast %445 : vector<16xf32> to vector<16x1xf32>
    %447 = vector.broadcast %446 : vector<16x1xf32> to vector<16x16xf32>
    %448 = arith.divf %444, %447 : vector<16x16xf32>
    %cst_162 = arith.constant dense<0.000000e+00> : vector<16x8xf32>
    %449 = tpu.matmul %448, %434, %cst_162 {dimension_numbers = #tpu.dot_dimension_numbers<[1], [0], [0], [1], [0, 0, 1, 1], [], []>} : vector<16x16xf32>, vector<16x8xf32>, vector<16x8xf32> -> vector<16x8xf32>
    %450 = tpu.concatenate %395, %413, %431, %449 in 1 : vector<16x8xf32>, vector<16x8xf32>, vector<16x8xf32>, vector<16x8xf32> -> vector<16x32xf32>
    %451 = tpu.concatenate %374, %450 in 0 : vector<16x32xf32>, vector<16x32xf32> -> vector<32x32xf32>
    %c1_163 = arith.constant 1 : index
    %c0_164 = arith.constant 0 : index
    %c0_165 = arith.constant 0 : index
    %452 = vector.load %arg9[%c1_163, %c0_164, %c0_165] : memref<2x32x32xf32, #tpu.memory_space<vmem>>, vector<1x32x32xf32>
    %453 = vector.shape_cast %452 : vector<1x32x32xf32> to vector<32x32xf32>
    %cst_166 = arith.constant dense<0.000000e+00> : vector<32x32xf32>
    %454 = tpu.matmul %451, %453, %cst_166 {dimension_numbers = #tpu.dot_dimension_numbers<[1], [0], [0], [1], [0, 0, 1, 1], [], []>} : vector<32x32xf32>, vector<32x32xf32>, vector<32x32xf32> -> vector<32x32xf32>
    %455 = arith.addf %267, %454 : vector<32x32xf32>
    %c1_167 = arith.constant 1 : index
    %c0_168 = arith.constant 0 : index
    %c0_169 = arith.constant 0 : index
    %456 = vector.load %arg10[%c1_167, %c0_168, %c0_169] : memref<2x1x32xf32, #tpu.memory_space<vmem>>, vector<1x1x32xf32>
    %457 = vector.shape_cast %456 : vector<1x1x32xf32> to vector<1x32xf32>
    %458 = vector.broadcast %457 : vector<1x32xf32> to vector<32x32xf32>
    %459 = arith.addf %455, %458 : vector<32x32xf32>
    %c1_170 = arith.constant 1 : index
    %c0_171 = arith.constant 0 : index
    %c0_172 = arith.constant 0 : index
    %460 = vector.load %arg11[%c1_170, %c0_171, %c0_172] : memref<2x1x32xf32, #tpu.memory_space<vmem>>, vector<1x1x32xf32>
    %461 = vector.shape_cast %460 : vector<1x1x32xf32> to vector<1x32xf32>
    %c1_173 = arith.constant 1 : index
    %c0_174 = arith.constant 0 : index
    %c0_175 = arith.constant 0 : index
    %462 = vector.load %arg12[%c1_173, %c0_174, %c0_175] : memref<2x1x32xf32, #tpu.memory_space<vmem>>, vector<1x1x32xf32>
    %463 = vector.shape_cast %462 : vector<1x1x32xf32> to vector<1x32xf32>
    %cst_176 = arith.constant dense<0.000000e+00> : vector<32xf32>
    %464 = vector.multi_reduction <add>, %459, %cst_176 [1] : vector<32x32xf32> to vector<32xf32>
    %465 = vector.shape_cast %464 : vector<32xf32> to vector<32x1xf32>
    %cst_177 = arith.constant 3.200000e+01 : f32
    %466 = vector.broadcast %cst_177 : f32 to vector<32x1xf32>
    %467 = arith.divf %465, %466 : vector<32x1xf32>
    %468 = vector.broadcast %467 : vector<32x1xf32> to vector<32x32xf32>
    %469 = arith.subf %459, %468 : vector<32x32xf32>
    %470 = arith.mulf %469, %469 : vector<32x32xf32>
    %cst_178 = arith.constant dense<0.000000e+00> : vector<32xf32>
    %471 = vector.multi_reduction <add>, %470, %cst_178 [1] : vector<32x32xf32> to vector<32xf32>
    %472 = vector.shape_cast %471 : vector<32xf32> to vector<32x1xf32>
    %cst_179 = arith.constant 3.200000e+01 : f32
    %473 = vector.broadcast %cst_179 : f32 to vector<32x1xf32>
    %474 = arith.divf %472, %473 : vector<32x1xf32>
    %cst_180 = arith.constant 9.99999996E-13 : f32
    %475 = vector.broadcast %cst_180 : f32 to vector<32x1xf32>
    %476 = arith.addf %474, %475 : vector<32x1xf32>
    %477 = math.rsqrt %476 : vector<32x1xf32>
    %478 = vector.broadcast %477 : vector<32x1xf32> to vector<32x32xf32>
    %479 = arith.mulf %469, %478 : vector<32x32xf32>
    %480 = vector.broadcast %461 : vector<1x32xf32> to vector<32x32xf32>
    %481 = arith.mulf %479, %480 : vector<32x32xf32>
    %482 = vector.broadcast %463 : vector<1x32xf32> to vector<32x32xf32>
    %483 = arith.addf %481, %482 : vector<32x32xf32>
    %c1_181 = arith.constant 1 : index
    %c0_182 = arith.constant 0 : index
    %c0_183 = arith.constant 0 : index
    %484 = vector.load %arg13[%c1_181, %c0_182, %c0_183] : memref<2x32x64xf32, #tpu.memory_space<vmem>>, vector<1x32x64xf32>
    %485 = vector.shape_cast %484 : vector<1x32x64xf32> to vector<32x64xf32>
    %cst_184 = arith.constant dense<0.000000e+00> : vector<32x64xf32>
    %486 = tpu.matmul %483, %485, %cst_184 {dimension_numbers = #tpu.dot_dimension_numbers<[1], [0], [0], [1], [0, 0, 1, 1], [], []>} : vector<32x32xf32>, vector<32x64xf32>, vector<32x64xf32> -> vector<32x64xf32>
    %c1_185 = arith.constant 1 : index
    %c0_186 = arith.constant 0 : index
    %c0_187 = arith.constant 0 : index
    %487 = vector.load %arg14[%c1_185, %c0_186, %c0_187] : memref<2x1x64xf32, #tpu.memory_space<vmem>>, vector<1x1x64xf32>
    %488 = vector.shape_cast %487 : vector<1x1x64xf32> to vector<1x64xf32>
    %489 = vector.broadcast %488 : vector<1x64xf32> to vector<32x64xf32>
    %490 = arith.addf %486, %489 : vector<32x64xf32>
    %491 = arith.mulf %490, %490 : vector<32x64xf32>
    %492 = arith.mulf %490, %491 : vector<32x64xf32>
    %cst_188 = arith.constant 4.471500e-02 : f32
    %493 = vector.broadcast %cst_188 : f32 to vector<32x64xf32>
    %494 = arith.mulf %493, %492 : vector<32x64xf32>
    %495 = arith.addf %490, %494 : vector<32x64xf32>
    %cst_189 = arith.constant 0.797884583 : f32
    %496 = vector.broadcast %cst_189 : f32 to vector<32x64xf32>
    %497 = arith.mulf %496, %495 : vector<32x64xf32>
    %498 = math.tanh %497 : vector<32x64xf32>
    %cst_190 = arith.constant 1.000000e+00 : f32
    %499 = vector.broadcast %cst_190 : f32 to vector<32x64xf32>
    %500 = arith.addf %499, %498 : vector<32x64xf32>
    %cst_191 = arith.constant 5.000000e-01 : f32
    %501 = vector.broadcast %cst_191 : f32 to vector<32x64xf32>
    %502 = arith.mulf %501, %500 : vector<32x64xf32>
    %503 = arith.mulf %490, %502 : vector<32x64xf32>
    %c1_192 = arith.constant 1 : index
    %c0_193 = arith.constant 0 : index
    %c0_194 = arith.constant 0 : index
    %504 = vector.load %arg15[%c1_192, %c0_193, %c0_194] : memref<2x64x32xf32, #tpu.memory_space<vmem>>, vector<1x64x32xf32>
    %505 = vector.shape_cast %504 : vector<1x64x32xf32> to vector<64x32xf32>
    %cst_195 = arith.constant dense<0.000000e+00> : vector<32x32xf32>
    %506 = tpu.matmul %503, %505, %cst_195 {dimension_numbers = #tpu.dot_dimension_numbers<[1], [0], [0], [1], [0, 0, 1, 1], [], []>} : vector<32x64xf32>, vector<64x32xf32>, vector<32x32xf32> -> vector<32x32xf32>
    %507 = arith.addf %459, %506 : vector<32x32xf32>
    %c1_196 = arith.constant 1 : index
    %c0_197 = arith.constant 0 : index
    %c0_198 = arith.constant 0 : index
    %508 = vector.load %arg16[%c1_196, %c0_197, %c0_198] : memref<2x1x32xf32, #tpu.memory_space<vmem>>, vector<1x1x32xf32>
    %509 = vector.shape_cast %508 : vector<1x1x32xf32> to vector<1x32xf32>
    %510 = vector.broadcast %509 : vector<1x32xf32> to vector<32x32xf32>
    %511 = arith.addf %507, %510 : vector<32x32xf32>
    %c0_199 = arith.constant 0 : index
    %c0_200 = arith.constant 0 : index
    %512 = vector.load %arg17[%c0_199, %c0_200] : memref<1x32xf32, #tpu.memory_space<vmem>>, vector<1x32xf32>
    %c0_201 = arith.constant 0 : index
    %c0_202 = arith.constant 0 : index
    %513 = vector.load %arg18[%c0_201, %c0_202] : memref<1x32xf32, #tpu.memory_space<vmem>>, vector<1x32xf32>
    %cst_203 = arith.constant dense<0.000000e+00> : vector<32xf32>
    %514 = vector.multi_reduction <add>, %511, %cst_203 [1] : vector<32x32xf32> to vector<32xf32>
    %515 = vector.shape_cast %514 : vector<32xf32> to vector<32x1xf32>
    %cst_204 = arith.constant 3.200000e+01 : f32
    %516 = vector.broadcast %cst_204 : f32 to vector<32x1xf32>
    %517 = arith.divf %515, %516 : vector<32x1xf32>
    %518 = vector.broadcast %517 : vector<32x1xf32> to vector<32x32xf32>
    %519 = arith.subf %511, %518 : vector<32x32xf32>
    %520 = arith.mulf %519, %519 : vector<32x32xf32>
    %cst_205 = arith.constant dense<0.000000e+00> : vector<32xf32>
    %521 = vector.multi_reduction <add>, %520, %cst_205 [1] : vector<32x32xf32> to vector<32xf32>
    %522 = vector.shape_cast %521 : vector<32xf32> to vector<32x1xf32>
    %cst_206 = arith.constant 3.200000e+01 : f32
    %523 = vector.broadcast %cst_206 : f32 to vector<32x1xf32>
    %524 = arith.divf %522, %523 : vector<32x1xf32>
    %cst_207 = arith.constant 9.99999996E-13 : f32
    %525 = vector.broadcast %cst_207 : f32 to vector<32x1xf32>
    %526 = arith.addf %524, %525 : vector<32x1xf32>
    %527 = math.rsqrt %526 : vector<32x1xf32>
    %528 = vector.broadcast %527 : vector<32x1xf32> to vector<32x32xf32>
    %529 = arith.mulf %519, %528 : vector<32x32xf32>
    %530 = vector.broadcast %512 : vector<1x32xf32> to vector<32x32xf32>
    %531 = arith.mulf %529, %530 : vector<32x32xf32>
    %532 = vector.broadcast %513 : vector<1x32xf32> to vector<32x32xf32>
    %533 = arith.addf %531, %532 : vector<32x32xf32>
    %534 = vector.extract_strided_slice %533 {offsets = [0, 0], sizes = [1, 32], strides = [1, 1]} : vector<32x32xf32> to vector<1x32xf32>
    %535 = vector.extract_strided_slice %533 {offsets = [16, 0], sizes = [1, 32], strides = [1, 1]} : vector<32x32xf32> to vector<1x32xf32>
    %536 = tpu.concatenate %534, %535 in 0 : vector<1x32xf32>, vector<1x32xf32> -> vector<2x32xf32>
    %cst_208 = arith.constant 0.000000e+00 : f32
    %537 = vector.broadcast %cst_208 : f32 to vector<8x128xf32>
    %c0_209 = arith.constant 0 : index
    %c0_210 = arith.constant 0 : index
    %538 = vector.load %arg26[%c0_209, %c0_210] : memref<8x128xf32, #tpu.memory_space<vmem>>, vector<8x128xf32>
    tpu.vector_store %arg26[%c0_209, %c0_210], %537 {strides = array<i32>} : memref<8x128xf32, #tpu.memory_space<vmem>>, vector<8x128xf32>,
    %c0_i32 = arith.constant 0 : i32
    %539 = arith.cmpi eq, %arg0, %c0_i32 : i32
    %540 = arith.extui %539 : i1 to i32
    %c0_i32_211 = arith.constant 0 : i32
    %541 = arith.cmpi ne, %540, %c0_i32_211 : i32
    scf.if %541 {
      %545 = vector.extract_strided_slice %533 {offsets = [8, 0], sizes = [1, 32], strides = [1, 1]} : vector<32x32xf32> to vector<1x32xf32>
      %546 = vector.extract_strided_slice %533 {offsets = [24, 0], sizes = [1, 32], strides = [1, 1]} : vector<32x32xf32> to vector<1x32xf32>
      %547 = tpu.concatenate %545, %546 in 0 : vector<1x32xf32>, vector<1x32xf32> -> vector<2x32xf32>
      %c0_213 = arith.constant 0 : index
      %c0_214 = arith.constant 0 : index
      %548 = vector.load %arg19[%c0_213, %c0_214] : memref<32x3xf32, #tpu.memory_space<vmem>>, vector<32x3xf32>
      %cst_215 = arith.constant dense<0.000000e+00> : vector<2x3xf32>
      %549 = tpu.matmul %536, %548, %cst_215 {dimension_numbers = #tpu.dot_dimension_numbers<[1], [0], [0], [1], [0, 0, 1, 1], [], []>} : vector<2x32xf32>, vector<32x3xf32>, vector<2x3xf32> -> vector<2x3xf32>
      %c0_216 = arith.constant 0 : index
      %c0_217 = arith.constant 0 : index
      %550 = vector.load %arg20[%c0_216, %c0_217] : memref<1x3xf32, #tpu.memory_space<vmem>>, vector<1x3xf32>
      %551 = vector.broadcast %550 : vector<1x3xf32> to vector<2x3xf32>
      %552 = arith.addf %549, %551 : vector<2x3xf32>
      %c0_218 = arith.constant 0 : index
      %c0_219 = arith.constant 0 : index
      %553 = vector.load %arg21[%c0_218, %c0_219] : memref<32x32xf32, #tpu.memory_space<vmem>>, vector<32x32xf32>
      %cst_220 = arith.constant dense<0.000000e+00> : vector<2x32xf32>
      %554 = tpu.matmul %536, %553, %cst_220 {dimension_numbers = #tpu.dot_dimension_numbers<[1], [0], [0], [1], [0, 0, 1, 1], [], []>} : vector<2x32xf32>, vector<32x32xf32>, vector<2x32xf32> -> vector<2x32xf32>
      %c0_221 = arith.constant 0 : index
      %c0_222 = arith.constant 0 : index
      %555 = vector.load %arg22[%c0_221, %c0_222] : memref<32x32xf32, #tpu.memory_space<vmem>>, vector<32x32xf32>
      %cst_223 = arith.constant dense<0.000000e+00> : vector<2x32xf32>
      %556 = tpu.matmul %547, %555, %cst_223 {dimension_numbers = #tpu.dot_dimension_numbers<[1], [0], [0], [1], [0, 0, 1, 1], [], []>} : vector<2x32xf32>, vector<32x32xf32>, vector<2x32xf32> -> vector<2x32xf32>
      %557 = arith.mulf %554, %554 : vector<2x32xf32>
      %cst_224 = arith.constant dense<0.000000e+00> : vector<2xf32>
      %558 = vector.multi_reduction <add>, %557, %cst_224 [1] : vector<2x32xf32> to vector<2xf32>
      %559 = vector.shape_cast %558 : vector<2xf32> to vector<2x1xf32>
      %560 = math.rsqrt %559 : vector<2x1xf32>
      %561 = vector.broadcast %560 : vector<2x1xf32> to vector<2x32xf32>
      %562 = arith.mulf %554, %561 : vector<2x32xf32>
      %563 = arith.mulf %556, %556 : vector<2x32xf32>
      %cst_225 = arith.constant dense<0.000000e+00> : vector<2xf32>
      %564 = vector.multi_reduction <add>, %563, %cst_225 [1] : vector<2x32xf32> to vector<2xf32>
      %565 = vector.shape_cast %564 : vector<2xf32> to vector<2x1xf32>
      %566 = math.rsqrt %565 : vector<2x1xf32>
      %567 = vector.broadcast %566 : vector<2x1xf32> to vector<2x32xf32>
      %568 = arith.mulf %556, %567 : vector<2x32xf32>
      %cst_226 = arith.constant dense<0.000000e+00> : vector<2x2xf32>
      %569 = tpu.matmul %562, %568, %cst_226 {dimension_numbers = #tpu.dot_dimension_numbers<[1], [1], [0], [0], [0, 0, 1, 0], [], []>} : vector<2x32xf32>, vector<2x32xf32>, vector<2x2xf32> -> vector<2x2xf32>
      %c0_227 = arith.constant 0 : index
      %c0_228 = arith.constant 0 : index
      %570 = vector.load %arg23[%c0_227, %c0_228] : memref<1x1xf32, #tpu.memory_space<vmem>>, vector<1x1xf32>
      %571 = vector.extract %570[0, 0] : f32 from vector<1x1xf32>
      %572 = math.exp %571 : f32
      %573 = vector.broadcast %572 : f32 to vector<2x2xf32>
      %574 = arith.mulf %569, %573 : vector<2x2xf32>
      %c0_229 = arith.constant 0 : index
      %c0_230 = arith.constant 0 : index
      %575 = vector.load %arg26[%c0_229, %c0_230] : memref<8x128xf32, #tpu.memory_space<vmem>>, vector<2x32xf32>
      tpu.vector_store %arg26[%c0_229, %c0_230], %536 {strides = array<i32>} : memref<8x128xf32, #tpu.memory_space<vmem>>, vector<2x32xf32>,
      %c2 = arith.constant 2 : index
      %c0_231 = arith.constant 0 : index
      %576 = vector.load %arg26[%c2, %c0_231] : memref<8x128xf32, #tpu.memory_space<vmem>>, vector<2x32xf32>
      tpu.vector_store %arg26[%c2, %c0_231], %547 {strides = array<i32>} : memref<8x128xf32, #tpu.memory_space<vmem>>, vector<2x32xf32>,
      %c4 = arith.constant 4 : index
      %c0_232 = arith.constant 0 : index
      %577 = vector.load %arg26[%c4, %c0_232] : memref<8x128xf32, #tpu.memory_space<vmem>>, vector<2x3xf32>
      tpu.vector_store %arg26[%c4, %c0_232], %552 {strides = array<i32>} : memref<8x128xf32, #tpu.memory_space<vmem>>, vector<2x3xf32>,
      %c6 = arith.constant 6 : index
      %c0_233 = arith.constant 0 : index
      %578 = vector.load %arg26[%c6, %c0_233] : memref<8x128xf32, #tpu.memory_space<vmem>>, vector<2x2xf32>
      tpu.vector_store %arg26[%c6, %c0_233], %574 {strides = array<i32>} : memref<8x128xf32, #tpu.memory_space<vmem>>, vector<2x2xf32>,
    } else {
    }
    %c1_i32 = arith.constant 1 : i32
    %542 = arith.cmpi eq, %arg0, %c1_i32 : i32
    %543 = arith.extui %542 : i1 to i32
    %c0_i32_212 = arith.constant 0 : i32
    %544 = arith.cmpi ne, %543, %c0_i32_212 : i32
    scf.if %544 {
      %c0_213 = arith.constant 0 : index
      %c0_214 = arith.constant 0 : index
      %545 = vector.load %arg24[%c0_213, %c0_214] : memref<32x2xf32, #tpu.memory_space<vmem>>, vector<32x2xf32>
      %cst_215 = arith.constant dense<0.000000e+00> : vector<2x2xf32>
      %546 = tpu.matmul %536, %545, %cst_215 {dimension_numbers = #tpu.dot_dimension_numbers<[1], [0], [0], [1], [0, 0, 1, 1], [], []>} : vector<2x32xf32>, vector<32x2xf32>, vector<2x2xf32> -> vector<2x2xf32>
      %c0_216 = arith.constant 0 : index
      %c0_217 = arith.constant 0 : index
      %547 = vector.load %arg25[%c0_216, %c0_217] : memref<1x2xf32, #tpu.memory_space<vmem>>, vector<1x2xf32>
      %548 = vector.broadcast %547 : vector<1x2xf32> to vector<2x2xf32>
      %549 = arith.addf %546, %548 : vector<2x2xf32>
      %c0_218 = arith.constant 0 : index
      %c0_219 = arith.constant 0 : index
      %550 = vector.load %arg26[%c0_218, %c0_219] : memref<8x128xf32, #tpu.memory_space<vmem>>, vector<2x2xf32>
      tpu.vector_store %arg26[%c0_218, %c0_219], %549 {strides = array<i32>} : memref<8x128xf32, #tpu.memory_space<vmem>>, vector<2x2xf32>,
    } else {
    }
    return
  }
  func.func @transform_0(%arg0: i32) -> (i32, i32) {
    %c0_i32 = arith.constant 0 : i32
    %c0_i32_0 = arith.constant 0 : i32
    return %arg0, %c0_i32 : i32, i32
  }
  func.func @transform_1(%arg0: i32) -> (i32, i32, i32) {
    %c0_i32 = arith.constant 0 : i32
    %c0_i32_0 = arith.constant 0 : i32
    %c0_i32_1 = arith.constant 0 : i32
    return %arg0, %c0_i32, %c0_i32_0 : i32, i32, i32
  }
  func.func @transform_2(%arg0: i32) -> (i32, i32) {
    %c0_i32 = arith.constant 0 : i32
    %c0_i32_0 = arith.constant 0 : i32
    %c0_i32_1 = arith.constant 0 : i32
    return %c0_i32, %c0_i32_0 : i32, i32
  }
  func.func @transform_3(%arg0: i32) -> (i32, i32) {
    %c0_i32 = arith.constant 0 : i32
    %c0_i32_0 = arith.constant 0 : i32
    %c0_i32_1 = arith.constant 0 : i32
    return %c0_i32, %c0_i32_0 : i32, i32
  }
  func.func @transform_4(%arg0: i32) -> (i32, i32, i32) {
    %c0_i32 = arith.constant 0 : i32
    %c0_i32_0 = arith.constant 0 : i32
    %c0_i32_1 = arith.constant 0 : i32
    %c0_i32_2 = arith.constant 0 : i32
    return %c0_i32, %c0_i32_0, %c0_i32_1 : i32, i32, i32
  }
  func.func @transform_5(%arg0: i32) -> (i32, i32, i32) {
    %c0_i32 = arith.constant 0 : i32
    %c0_i32_0 = arith.constant 0 : i32
    %c0_i32_1 = arith.constant 0 : i32
    %c0_i32_2 = arith.constant 0 : i32
    return %c0_i32, %c0_i32_0, %c0_i32_1 : i32, i32, i32
  }
  func.func @transform_6(%arg0: i32) -> (i32, i32, i32) {
    %c0_i32 = arith.constant 0 : i32
    %c0_i32_0 = arith.constant 0 : i32
    %c0_i32_1 = arith.constant 0 : i32
    %c0_i32_2 = arith.constant 0 : i32
    return %c0_i32, %c0_i32_0, %c0_i32_1 : i32, i32, i32
  }
  func.func @transform_7(%arg0: i32) -> (i32, i32, i32) {
    %c0_i32 = arith.constant 0 : i32
    %c0_i32_0 = arith.constant 0 : i32
    %c0_i32_1 = arith.constant 0 : i32
    %c0_i32_2 = arith.constant 0 : i32
    return %c0_i32, %c0_i32_0, %c0_i32_1 : i32, i32, i32
  }
  func.func @transform_8(%arg0: i32) -> (i32, i32, i32) {
    %c0_i32 = arith.constant 0 : i32
    %c0_i32_0 = arith.constant 0 : i32
    %c0_i32_1 = arith.constant 0 : i32
    %c0_i32_2 = arith.constant 0 : i32
    return %c0_i32, %c0_i32_0, %c0_i32_1 : i32, i32, i32
  }
  func.func @transform_9(%arg0: i32) -> (i32, i32, i32) {
    %c0_i32 = arith.constant 0 : i32
    %c0_i32_0 = arith.constant 0 : i32
    %c0_i32_1 = arith.constant 0 : i32
    %c0_i32_2 = arith.constant 0 : i32
    return %c0_i32, %c0_i32_0, %c0_i32_1 : i32, i32, i32
  }
  func.func @transform_10(%arg0: i32) -> (i32, i32, i32) {
    %c0_i32 = arith.constant 0 : i32
    %c0_i32_0 = arith.constant 0 : i32
    %c0_i32_1 = arith.constant 0 : i32
    %c0_i32_2 = arith.constant 0 : i32
    return %c0_i32, %c0_i32_0, %c0_i32_1 : i32, i32, i32
  }
  func.func @transform_11(%arg0: i32) -> (i32, i32, i32) {
    %c0_i32 = arith.constant 0 : i32
    %c0_i32_0 = arith.constant 0 : i32
    %c0_i32_1 = arith.constant 0 : i32
    %c0_i32_2 = arith.constant 0 : i32
    return %c0_i32, %c0_i32_0, %c0_i32_1 : i32, i32, i32
  }
  func.func @transform_12(%arg0: i32) -> (i32, i32, i32) {
    %c0_i32 = arith.constant 0 : i32
    %c0_i32_0 = arith.constant 0 : i32
    %c0_i32_1 = arith.constant 0 : i32
    %c0_i32_2 = arith.constant 0 : i32
    return %c0_i32, %c0_i32_0, %c0_i32_1 : i32, i32, i32
  }
  func.func @transform_13(%arg0: i32) -> (i32, i32, i32) {
    %c0_i32 = arith.constant 0 : i32
    %c0_i32_0 = arith.constant 0 : i32
    %c0_i32_1 = arith.constant 0 : i32
    %c0_i32_2 = arith.constant 0 : i32
    return %c0_i32, %c0_i32_0, %c0_i32_1 : i32, i32, i32
  }
  func.func @transform_14(%arg0: i32) -> (i32, i32, i32) {
    %c0_i32 = arith.constant 0 : i32
    %c0_i32_0 = arith.constant 0 : i32
    %c0_i32_1 = arith.constant 0 : i32
    %c0_i32_2 = arith.constant 0 : i32
    return %c0_i32, %c0_i32_0, %c0_i32_1 : i32, i32, i32
  }
  func.func @transform_15(%arg0: i32) -> (i32, i32, i32) {
    %c0_i32 = arith.constant 0 : i32
    %c0_i32_0 = arith.constant 0 : i32
    %c0_i32_1 = arith.constant 0 : i32
    %c0_i32_2 = arith.constant 0 : i32
    return %c0_i32, %c0_i32_0, %c0_i32_1 : i32, i32, i32
  }
  func.func @transform_16(%arg0: i32) -> (i32, i32) {
    %c0_i32 = arith.constant 0 : i32
    %c0_i32_0 = arith.constant 0 : i32
    %c0_i32_1 = arith.constant 0 : i32
    return %c0_i32, %c0_i32_0 : i32, i32
  }
  func.func @transform_17(%arg0: i32) -> (i32, i32) {
    %c0_i32 = arith.constant 0 : i32
    %c0_i32_0 = arith.constant 0 : i32
    %c0_i32_1 = arith.constant 0 : i32
    return %c0_i32, %c0_i32_0 : i32, i32
  }
  func.func @transform_18(%arg0: i32) -> (i32, i32) {
    %c0_i32 = arith.constant 0 : i32
    %c0_i32_0 = arith.constant 0 : i32
    %c0_i32_1 = arith.constant 0 : i32
    return %c0_i32, %c0_i32_0 : i32, i32
  }
  func.func @transform_19(%arg0: i32) -> (i32, i32) {
    %c0_i32 = arith.constant 0 : i32
    %c0_i32_0 = arith.constant 0 : i32
    %c0_i32_1 = arith.constant 0 : i32
    return %c0_i32, %c0_i32_0 : i32, i32
  }
  func.func @transform_20(%arg0: i32) -> (i32, i32) {
    %c0_i32 = arith.constant 0 : i32
    %c0_i32_0 = arith.constant 0 : i32
    %c0_i32_1 = arith.constant 0 : i32
    return %c0_i32, %c0_i32_0 : i32, i32
  }
  func.func @transform_21(%arg0: i32) -> (i32, i32) {
    %c0_i32 = arith.constant 0 : i32
    %c0_i32_0 = arith.constant 0 : i32
    %c0_i32_1 = arith.constant 0 : i32
    return %c0_i32, %c0_i32_0 : i32, i32
  }
  func.func @transform_22(%arg0: i32) -> (i32, i32) {
    %c0_i32 = arith.constant 0 : i32
    %c0_i32_0 = arith.constant 0 : i32
    %c0_i32_1 = arith.constant 0 : i32
    return %c0_i32, %c0_i32_0 : i32, i32
  }
  func.func @transform_23(%arg0: i32) -> (i32, i32) {
    %c0_i32 = arith.constant 0 : i32
    %c0_i32_0 = arith.constant 0 : i32
    %c0_i32_1 = arith.constant 0 : i32
    return %c0_i32, %c0_i32_0 : i32, i32
  }
  func.func @transform_24(%arg0: i32) -> (i32, i32) {
    %c0_i32 = arith.constant 0 : i32
    %c0_i32_0 = arith.constant 0 : i32
    %c0_i32_1 = arith.constant 0 : i32
    return %c0_i32, %c0_i32_0 : i32, i32
  }
  func.func @transform_25(%arg0: i32) -> (i32, i32) {
    %c0_i32 = arith.constant 0 : i32
    %c0_i32_0 = arith.constant 0 : i32
    return %arg0, %c0_i32 : i32, i32
  }
}

</mosaic_0001>

<bundles_post_ra>
// kernel: run.1
= control target key start
LH: loop header
LB: loop body
LE: loop exit
PB: predicated region body
PF: predicated region fallthrough
CT: control target
= control target key end

     0   :  { %s6414_s0 = inlined_call_operand.vmem [shape: f32[64,32], index: 0, kind: input, shape index: {}]   ;;  %s6415_s1 = inlined_call_operand.vmem [shape: f32[2,2,16], index: 1, kind: input, shape index: {}]   ;;  %s6416_s2 = inlined_call_operand.vmem [shape: f32[1,32], index: 2, kind: input, shape index: {}]   ;;  %s6417_s3 = inlined_call_operand.vmem [shape: f32[1,32], index: 3, kind: input, shape index: {}]   ;;  %s6418_s4 = inlined_call_operand.vmem [shape: f32[2,1,32], index: 4, kind: input, shape index: {}]   ;;  %s6419_s5 = inlined_call_operand.vmem [shape: f32[2,1,32], index: 5, kind: input, shape index: {}]   ;;  %s6420_s6 = inlined_call_operand.vmem [shape: f32[2,32,96], index: 6, kind: input, shape index: {}]   ;;  %s6421_s7 = inlined_call_operand.vmem [shape: f32[2,1,96], index: 7, kind: input, shape index: {}]   ;;  %s6422_s8 = inlined_call_operand.vmem [shape: f32[2,32,32], index: 8, kind: input, shape index: {}]   ;;  %s6423_s9 = inlined_call_operand.vmem [shape: f32[2,1,32], index: 9, kind: input, shape index: {}]   ;;  %s6424_s10 = inlined_call_operand.vmem [shape: f32[2,1,32], index: 10, kind: input, shape index: {}]   ;;  %s6425_s11 = inlined_call_operand.vmem [shape: f32[2,1,32], index: 11, kind: input, shape index: {}]   ;;  %s6426_s12 = inlined_call_operand.vmem [shape: f32[2,32,64], index: 12, kind: input, shape index: {}]   ;;  %s6427_s13 = inlined_call_operand.vmem [shape: f32[2,1,64], index: 13, kind: input, shape index: {}]   ;;  %s6428_s14 = inlined_call_operand.vmem [shape: f32[2,64,32], index: 14, kind: input, shape index: {}]   ;;  %s6429_s15 = inlined_call_operand.vmem [shape: f32[2,1,32], index: 15, kind: input, shape index: {}]   ;;  %s6430_s16 = inlined_call_operand.vmem [shape: f32[1,32], index: 16, kind: input, shape index: {}]   ;;  %s6431_s17 = inlined_call_operand.vmem [shape: f32[1,32], index: 17, kind: input, shape index: {}]   ;;  %s6432_s18 = inlined_call_operand.vmem [shape: f32[32,3], index: 18, kind: input, shape index: {}]   ;;  %s6433_s19 = inlined_call_operand.vmem [shape: f32[1,3], index: 19, kind: input, shape index: {}]   ;;  %s6434_s20 = inlined_call_operand.vmem [shape: f32[32,32], index: 20, kind: input, shape index: {}]   ;;  %s6435_s21 = inlined_call_operand.vmem [shape: f32[32,32], index: 21, kind: input, shape index: {}]   ;;  %s6436_s22 = inlined_call_operand.<no memory space> [shape: f32[1,1], index: 22, kind: input, shape index: {}]   ;;  %s6437_s23 = inlined_call_operand.vmem [shape: f32[32,2], index: 23, kind: input, shape index: {}]   ;;  %s6438_s24 = inlined_call_operand.vmem [shape: f32[1,2], index: 24, kind: input, shape index: {}]   ;;  %s6439_s25 = inlined_call_operand.vmem [shape: f32[16,128], index: 25, kind: output, shape index: {}]  }
   0x1   :  { %6480 = sst [smem:[#allocation5_spill]] %s6414_s0  ;;  %v30_v0 = vstv %s6436_s22 }
   0x2   :  { %6481 = sst [smem:[#allocation6_spill]] %s6415_s1  ;;  %31 = vst [vmem:[#allocation2] sm:$0x1] %v30_v0 }
   0x3   :  { %6482 = sst [smem:[#allocation7_spill]] %s6416_s2 }
   0x4   :  { %6483 = sst [smem:[#allocation8_spill]] %s6417_s3 }
   0x5   :  { %6484 = sst [smem:[#allocation9_spill]] %s6418_s4 }
   0x6   :  { %6485 = sst [smem:[#allocation10_spill]] %s6419_s5 }
   0x7   :  { %6486 = sst [smem:[#allocation11_spill]] %s6420_s6  ;;  %s5002_s6 = smov 0  }
   0x8   :  { %6487 = sst [smem:[#allocation12_spill]] %s6421_s7 }
   0x9   :  { %6488 = sst [smem:[#allocation13_spill]] %s6422_s8 }
   0xa   :  { %6489 = sst [smem:[#allocation14_spill]] %s6423_s9 }
   0xb   :  { %6490 = sst [smem:[#allocation15_spill]] %s6432_s18 }
   0xc   :  { %6491 = sst [smem:[#allocation16_spill]] %s6433_s19 }
   0xd   :  { %6492 = sst [smem:[#allocation17_spill]] %s6434_s20 }
   0xe   :  { %6493 = sst [smem:[#allocation18_spill]] %s6437_s23 }
   0xf   :  { %6494 = sst [smem:[#allocation19_spill]] %s6438_s24 }
  0x10   :  { %6495 = sst [smem:[#allocation20_spill]] %s6439_s25 }
  0x11 LB: > { %6496 = sst [smem:[#allocation3_spill]] %s4851_s6  ;;  %s5008_s30 = sadd.s32 4294967295, %s4851_s6   ;;  %s4851_s6 = sphi %s5002_s6, %s37_s6  }
  0x12   : > { %p4344_p0 = scmp.ge.s32.totalorder %s4851_s6, 1  ;;  %p699_p1 = scmp.lt.s32.totalorder %s4851_s6, 3 }
  0x14   : > { %p700_p2 = pnand %p4344_p0, %p699_p1 }
  0x16   : > { %703 = sbr.rel (%p700_p2) target bundleno = 5552 (0x15b0), region = 120 }
  0x1b   : > { %s4345_s7 = sshll.u32 %s5008_s30, 2  ;;  %vm790_vm0 = vcmask 261120   ;;  %s6497_s1 = sld [smem:[#allocation5_spill]]  ;;  %v4853_v5 = vmov 32.0  }
  0x1c   : > { %p771_p3 = scmp.lt.s32.totalorder %s4345_s7, 7  ;;  %4643 = vrcp.f32 %v4853_v5  ;;  %s6498_s28 = sld [smem:[#allocation7_spill]] }
  0x1d   : > { %s6499_s0 = sld [smem:[#allocation8_spill]]  ;;  %s6448_s26 = smov 88  }
  0x1e   : > { %s6540_s7 = smov (!%p771_p3, %s4345_s7), 7  ;;  %s6501_s9 = sld [smem:[#allocation9_spill]] }
  0x1f   : > { %s4346_s22 = sshll.u32 %s6540_s7, 3  ;;  %s6500_s7 = sld [smem:[#allocation11_spill]] }
  0x20   : > { %s6502_s29 = sld [smem:[#allocation10_spill]]  ;;  %s6453_s27 = smov 72  }
  0x21   : > { %s5016_s8 = scalar_lea.vmem %s6497_s1, %s4346_s22  ;;  %s6503_s3 = sld [smem:[#allocation12_spill]] }
  0x22   : > { %v784_v1 = vld [vmem:[%s5016_s8] sm:$0xff]  ;;  %v785_v3 = vld [vmem:[%s5016_s8 + $0x8] sm:$0xff]  ;;  %v4644_v6 = vpop.eup %4643  ;;  %v786_v52 = vld [vmem:[%s5016_s8 + $0x10] sm:$0xff]  ;;  %s6446_s1 = smov 120   ;;  %s6465_s4 = smov 112  }
  0x23   : > { %v791_v2 = vsel %vm790_vm0, %v784_v1, 0.0  ;;  %v794_v4 = vsel %vm790_vm0, %v785_v3, 0.0  ;;  %v804_v7 = vmul.f32 32.0, %v4644_v6  ;;  %vm808_vm1 = vweird.f32 %v4644_v6  ;;  %v5033_v36 = vld [vmem:[%s6498_s28] ss:$0 sm:$0xff]  ;;  %v787_v61 = vld [vmem:[%s5016_s8 + $0x18] sm:$0xff] }
  0x24   : > { %792 = vadd.xlane.f32.xlu0 %v791_v2  ;;  %v5038_v40 = vld [vmem:[%s6499_s0] ss:$0 sm:$0xff]  ;;  %v797_v53 = vsel %vm790_vm0, %v786_v52, 0.0  ;;  %v800_v63 = vsel %vm790_vm0, %v787_v61, 0.0  ;;  %s6450_s8 = smov 96   ;;  %p776_p4 = scmp.lt.s32.totalorder %s5008_s30, 1 }
  0x25   : > { %v805_v8 = vsub.f32 1.0, %v804_v7  ;;  %v1008_v7 = vld [vmem:[%s6500_s7 + $0x18] sm:$0xff]  ;;  %s6504_s25 = sld [smem:[#allocation20_spill]]  ;;  %s6461_s0 = smov 48  }
  0x26   : > { %1037 = vmatpush.msra.mxu0 %v1008_v7  ;;  %s777_s28 = scalar_select %p776_p4, %s5008_s30, 1 }
  0x27   : > { %v806_v9 = vmul.f32 %v4644_v6, %v805_v8  ;;  %v1007_v8 = vld [vmem:[%s6500_s7 + $0x10] sm:$0xff]  ;;  %s6506_s6 = sld [smem:[#allocation6_spill]]  ;;  %s6455_s2 = smov 64  }
  0x28   : > { %1038 = vmatpush.msra.mxu0 %v1007_v8  ;;  %s4348_s5 = sshll.u32 %s777_s28, 3  ;;  %s6516_s18 = smov 80  }
  0x29   : > { %v807_v10 = vadd.f32 %v4644_v6, %v806_v9  ;;  %v1006_v9 = vld [vmem:[%s6500_s7 + $0x8] sm:$0xff]  ;;  %s6517_s19 = smov 112   ;;  %s6528_s20 = smov 24  }
  0x2a   : > { %1039 = vmatpush.msra.mxu0 %v1006_v9  ;;  %p4505_p5 = scmp.ne.s32.totalorder %s5008_s30, 0 }
  0x2b   : > { %v5022_v11 = vsel %vm808_vm1, %v4644_v6, %v807_v10  ;;  %v1005_v10 = vld [vmem:[%s6500_s7] sm:$0xff]  ;;  %s5168_s22 = scalar_lea.vmem %s6504_s25, %s4348_s5  ;;  %s6510_s5 = smov 120  }
  0x2c   : > { %795 = vadd.xlane.f32.xlu0 %v794_v4  ;;  %1040 = vmatpush.msra.mxu0 %v1005_v10  ;;  %6505 = sst [smem:[#allocation4_spill]] %s5168_s22 }
  0x2d   : > { %s6531_s23 = sld [smem:[#allocation4_spill]] (!%p4505_p5) }
  0x2e   : > { %s6534_s24 = sld [smem:[#allocation16_spill]] (!%p4505_p5) }
  0x97   : > { %v793_v12 = vpop.xlane.xlu0 %792 }
  0x98   : > { %v810_v13 = vmul.f32 %v5022_v11, %v793_v12 }
  0x9a   : > { %v814_v14 = vsub.f32 %v784_v1, %v810_v13 }
  0x9c   : > { %v818_v15 = vmul.f32 %v814_v14, %v814_v14 }
  0x9e   : > { %v822_v16 = vsel %vm790_vm0, %v818_v15, 0.0 }
  0x9f   : > { %823 = vadd.xlane.f32.xlu1 %v822_v16  ;;  %v796_v17 = vpop.xlane.xlu0 %795 }
  0xa0   : > { %v811_v18 = vmul.f32 %v5022_v11, %v796_v17 }
  0xa2   : > { %v815_v19 = vsub.f32 %v785_v3, %v811_v18 }
  0xa4   : > { %v819_v20 = vmul.f32 %v815_v19, %v815_v19 }
  0xa6   : > { %v825_v21 = vsel %vm790_vm0, %v819_v20, 0.0 }
  0xa7   : > { %826 = vadd.xlane.f32.xlu1 %v825_v21 }
 0x112   : > { %v824_v22 = vpop.xlane.xlu1 %823 }
 0x113   : > { %v834_v23 = vmul.f32 %v824_v22, %v5022_v11 }
 0x115   : > { %v838_v24 = vadd.f32 1e-12, %v834_v23 }
 0x117   : > { %4645 = vrsqrt.f32 %v838_v24  ;;  %vm848_vm3 = vweird.f32 %v838_v24 }
 0x11a   : > { %v827_v25 = vpop.xlane.xlu1 %826 }
 0x11b   : > { %v835_v26 = vmul.f32 %v827_v25, %v5022_v11 }
 0x11d   : > { %v4646_v27 = vpop.eup %4645  ;;  %v839_v28 = vadd.f32 1e-12, %v835_v26 }
 0x11e   : > { %v843_v29 = vmul.f32 %v4646_v27, %v838_v24  ;;  %vm849_vm2 = vweird.f32 %v4646_v27 }
 0x11f   : > { %4647 = vrsqrt.f32 %v839_v28  ;;  %vm850_vm4 = vmor %vm848_vm3, %vm849_vm2  ;;  %vm858_vm5 = vweird.f32 %v839_v28 }
 0x120   : > { %v844_v30 = vmul.f32 %v4646_v27, %v843_v29 }
 0x122   : > { %v845_v31 = vmul.f32 0.5, %v844_v30 }
 0x124   : > { %v846_v32 = vsub.f32 1.5, %v845_v31  ;;  %v5091_v31 = vld [vmem:[%s6501_s9] ss:$0 sm:$0xff] }
 0x125   : > { %v4648_v33 = vpop.eup %4647 }
 0x126   : > { %v847_v34 = vmul.f32 %v4646_v27, %v846_v32  ;;  %v853_v35 = vmul.f32 %v4648_v33, %v839_v28  ;;  %vm859_vm6 = vweird.f32 %v4648_v33 }
 0x127   : > { %vm860_vm7 = vmor %vm858_vm5, %vm859_vm6  ;;  %vm1060_vm5 = vcmask 64512   ;;  %vm1097_vm6 = vcmask 130048  }
 0x128   : > { %v854_v37 = vmul.f32 %v4648_v33, %v853_v35  ;;  %v851_v38 = vsel %vm850_vm4, %v4646_v27, %v847_v34  ;;  %v5096_v35 = vld [vmem:[%s6502_s29] ss:$0 sm:$0xff] }
 0x129   : > { %v882_v39 = vmul.f32 %v851_v38, %v814_v14 }
 0x12a   : > { %v855_v41 = vmul.f32 0.5, %v854_v37 }
 0x12b   : > { %v889_v42 = vmul.f32 %v5033_v36, %v882_v39 }
 0x12c   : > { %v856_v43 = vsub.f32 1.5, %v855_v41 }
 0x12d   : > { %v5042_v44 = vadd.f32 %v5038_v40, %v889_v42 }
 0x12e   : > { %v857_v45 = vmul.f32 %v4648_v33, %v856_v43 }
 0x12f   : > { %v903_v46 = vsel %vm790_vm0, %v5042_v44, 0.0 }
 0x130   : > { %904 = vadd.xlane.f32.xlu2 %v903_v46  ;;  %v861_v47 = vsel %vm860_vm7, %v4648_v33, %v857_v45 }
 0x131   : > { %v883_v48 = vmul.f32 %v861_v47, %v815_v19 }
 0x133   : > { %v890_v49 = vmul.f32 %v5033_v36, %v883_v48 }
 0x135   : > { %v5048_v50 = vadd.f32 %v5038_v40, %v890_v49 }
 0x137   : > { %v906_v51 = vsel %vm790_vm0, %v5048_v50, 0.0 }
 0x138   : > { %907 = vadd.xlane.f32.xlu2 %v906_v51 }
 0x140   : > { %798 = vadd.xlane.f32.xlu2 %v797_v53 }
 0x1a3   : > { %v905_v54 = vpop.xlane.xlu2 %904 }
 0x1a4   : > { %v915_v55 = vmul.f32 %v905_v54, %v5022_v11 }
 0x1a6   : > { %v919_v56 = vsub.f32 %v5042_v44, %v915_v55  ;;  %v5109_v55 = vld [vmem:[%s6503_s3] ss:$0 sm:$0xff] }
 0x1a8   : > { %v923_v57 = vmul.f32 %v919_v56, %v919_v56 }
 0x1aa   : > { %v927_v58 = vsel %vm790_vm0, %v923_v57, 0.0 }
 0x1ab   : > { %928 = vadd.xlane.f32.xlu0 %v927_v58  ;;  %v908_v59 = vpop.xlane.xlu2 %907 }
 0x1ac   : > { %v916_v60 = vmul.f32 %v908_v59, %v5022_v11 }
 0x1ae   : > { %v920_v62 = vsub.f32 %v5048_v50, %v916_v60 }
 0x1b0   : > { %v924_v0 = vmul.f32 %v920_v62, %v920_v62 }
 0x1b2   : > { %v930_v1 = vsel %vm790_vm0, %v924_v0, 0.0 }
 0x1b3   : > { %801 = vadd.xlane.f32.xlu0 %v800_v63  ;;  %931 = vadd.xlane.f32.xlu1 %v930_v1  ;;  %v799_v2 = vpop.xlane.xlu2 %798 }
 0x1b4   : > { %v812_v3 = vmul.f32 %v5022_v11, %v799_v2 }
 0x1b6   : > { %v5063_v4 = vsub.f32 %v786_v52, %v812_v3 }
 0x1b8   : > { %v820_v5 = vmul.f32 %v5063_v4, %v5063_v4 }
 0x1ba   : > { %v828_v6 = vsel %vm790_vm0, %v820_v5, 0.0 }
 0x1bb   : > { %829 = vadd.xlane.f32.xlu1 %v828_v6 }
 0x21e   : > { %v929_v12 = vpop.xlane.xlu0 %928 }
 0x21f   : > { %v939_v13 = vmul.f32 %v929_v12, %v5022_v11 }
 0x221   : > { %v943_v14 = vadd.f32 1e-12, %v939_v13 }
 0x223   : > { %4649 = vrsqrt.f32 %v943_v14  ;;  %vm953_vm9 = vweird.f32 %v943_v14 }
 0x226   : > { %v932_v15 = vpop.xlane.xlu1 %931  ;;  %v802_v16 = vpop.xlane.xlu0 %801 }
 0x227   : > { %v940_v17 = vmul.f32 %v932_v15, %v5022_v11  ;;  %v813_v18 = vmul.f32 %v5022_v11, %v802_v16 }
 0x229   : > { %v4650_v19 = vpop.eup %4649  ;;  %v944_v20 = vadd.f32 1e-12, %v940_v17  ;;  %v5083_v21 = vsub.f32 %v787_v61, %v813_v18 }
 0x22a   : > { %v948_v22 = vmul.f32 %v4650_v19, %v943_v14  ;;  %vm954_vm8 = vweird.f32 %v4650_v19 }
 0x22b   : > { %4651 = vrsqrt.f32 %v944_v20  ;;  %v821_v23 = vmul.f32 %v5083_v21, %v5083_v21  ;;  %vm955_vm10 = vmor %vm953_vm9, %vm954_vm8  ;;  %vm963_vm12 = vweird.f32 %v944_v20 }
 0x22c   : > { %v949_v24 = vmul.f32 %v4650_v19, %v948_v22 }
 0x22d   : > { %v831_v25 = vsel %vm790_vm0, %v821_v23, 0.0 }
 0x22e   : > { %v950_v26 = vmul.f32 0.5, %v949_v24  ;;  %832 = vadd.xlane.f32.xlu2 %v831_v25  ;;  %v830_v48 = vpop.xlane.xlu1 %829 }
 0x22f   : > { %v836_v51 = vmul.f32 %v830_v48, %v5022_v11 }
 0x230   : > { %v951_v27 = vsub.f32 1.5, %v950_v26 }
 0x231   : > { %v4652_v28 = vpop.eup %4651  ;;  %v840_v53 = vadd.f32 1e-12, %v836_v51 }
 0x232   : > { %v952_v29 = vmul.f32 %v4650_v19, %v951_v27  ;;  %v958_v30 = vmul.f32 %v4652_v28, %v944_v20  ;;  %vm964_vm11 = vweird.f32 %v4652_v28 }
 0x233   : > { %vm965_vm13 = vmor %vm963_vm12, %vm964_vm11  ;;  %4653 = vrsqrt.f32 %v840_v53  ;;  %vm868_vm14 = vweird.f32 %v840_v53 }
 0x234   : > { %v959_v32 = vmul.f32 %v4652_v28, %v958_v30  ;;  %v956_v33 = vsel %vm955_vm10, %v4650_v19, %v952_v29 }
 0x235   : > { %v987_v34 = vmul.f32 %v956_v33, %v919_v56 }
 0x236   : > { %v960_v37 = vmul.f32 0.5, %v959_v32  ;;  %v4859_v32 = vmov 0.0  }
 0x237   : > { %v994_v38 = vmul.f32 %v5091_v31, %v987_v34  ;;  %4076 = vst [vmem:[%s5168_s22] sm:$0xff] %v4859_v32 }
 0x238   : > { %v961_v39 = vsub.f32 1.5, %v960_v37 }
 0x239   : > { %v1001_v41 = vadd.f32 %v5096_v35, %v994_v38  ;;  %v4654_v58 = vpop.eup %4653 }
 0x23a   : > { %v962_v42 = vmul.f32 %v4652_v28, %v961_v39  ;;  %v863_v60 = vmul.f32 %v4654_v58, %v840_v53  ;;  %vm869_vm15 = vweird.f32 %v4654_v58 }
 0x23b   : > { %4349 = vmatmul.msk.f32.vlgmr.msra.gmra.mxu0 %vm790_vm0, %v1001_v41  ;;  %vm870_vm3 = vmor %vm868_vm14, %vm869_vm15 }
 0x23c   : > { %v966_v43 = vsel %vm965_vm13, %v4652_v28, %v962_v42  ;;  %v864_v0 = vmul.f32 %v4654_v58, %v863_v60 }
 0x23d   : > { %v988_v45 = vmul.f32 %v966_v43, %v920_v62 }
 0x23e   : > { %v865_v2 = vmul.f32 0.5, %v864_v0 }
 0x23f   : > { %v995_v46 = vmul.f32 %v5091_v31, %v988_v45 }
 0x240   : > { %v866_v5 = vsub.f32 1.5, %v865_v2 }
 0x241   : > { %v1002_v47 = vadd.f32 %v5096_v35, %v995_v46 }
 0x242   : > { %v867_v7 = vmul.f32 %v4654_v58, %v866_v5 }
 0x243   : > { %4350 = vmatmul.msk.f32.gmra.mxu0 %vm790_vm0, %v1002_v47 }
 0x244   : > { %v871_v9 = vsel %vm870_vm3, %v4654_v58, %v867_v7 }
 0x245   : > { %v884_v12 = vmul.f32 %v871_v9, %v5063_v4 }
 0x247   : > { %v891_v14 = vmul.f32 %v5033_v36, %v884_v12 }
 0x249   : > { %v5130_v16 = vadd.f32 %v5038_v40, %v891_v14 }
 0x24b   : > { %v909_v18 = vsel %vm790_vm0, %v5130_v16, 0.0 }
 0x2a1   : > { %v833_v49 = vpop.xlane.xlu2 %832 }
 0x2a2   : > { %v837_v52 = vmul.f32 %v833_v49, %v5022_v11 }
 0x2a4   : > { %v841_v54 = vadd.f32 1e-12, %v837_v52 }
 0x2a6   : > { %4655 = vrsqrt.f32 %v841_v54  ;;  %vm878_vm1 = vweird.f32 %v841_v54 }
 0x2ac   : > { %v4656_v59 = vpop.eup %4655 }
 0x2ad   : > { %v873_v62 = vmul.f32 %v4656_v59, %v841_v54  ;;  %vm879_vm2 = vweird.f32 %v4656_v59 }
 0x2ae   : > { %vm880_vm4 = vmor %vm878_vm1, %vm879_vm2 }
 0x2af   : > { %v874_v1 = vmul.f32 %v4656_v59, %v873_v62 }
 0x2b1   : > { %v875_v3 = vmul.f32 0.5, %v874_v1 }
 0x2b3   : > { %v876_v6 = vsub.f32 1.5, %v875_v3 }
 0x2b5   : > { %v877_v8 = vmul.f32 %v4656_v59, %v876_v6 }
 0x2b7   : > { %v881_v10 = vsel %vm880_vm4, %v4656_v59, %v877_v8 }
 0x2b8   : > { %v1042_v56 = vpop.f32.mrf.mxu0  ;;  %v885_v13 = vmul.f32 %v881_v10, %v5083_v21 }
 0x2b9   : > { %v5112_v57 = vadd.f32 %v5109_v55, %v1042_v56 }
 0x2ba   : > { %v892_v15 = vmul.f32 %v5033_v36, %v885_v13 }
 0x2bb   : > { %1185 = vrot.lane.b32.xlu1 %v5112_v57, %s6448_s26  ;;  %1181 = vrot.lane.b32.xlu2 %v5112_v57, %s6446_s1 }
 0x2bc   : > { %v5133_v17 = vadd.f32 %v5038_v40, %v892_v15 }
 0x2be   : > { %v912_v19 = vsel %vm790_vm0, %v5133_v17, 0.0 }
 0x2c0   : > { %v1045_v61 = vpop.f32.mrf.mxu0 }
 0x2c1   : > { %v5119_v63 = vadd.f32 %v5109_v55, %v1045_v61 }
 0x2c3   : > { %1187 = vrot.lane.b32.xlu0 %v5119_v63, %s6448_s26  ;;  %v5190_v56 = vpack.i.bf16 %v5112_v57, %v5119_v63  ;;  %s6507_s26 = smov 96  }
 0x2cb   : > { %1183 = vrot.lane.b32.xlu0 %v5119_v63, %s6446_s1  ;;  %s4347_s1 = sshll.u32 %s777_s28, 1  ;;  %s6509_s28 = smov 88  }
 0x2e4   : > { %910 = vadd.xlane.f32.xlu2 %v909_v18 }
 0x2e5   : > { %913 = vadd.xlane.f32.xlu1 %v912_v19 }
 0x315   : > { %v1182_v36 = vpop.permute.xlu2 %1181 }
 0x32d   : > { %v1186_v20 = vpop.permute.xlu1 %1185 }
 0x335   : > { %v1188_v4 = vpop.permute.xlu0 %1187 }
 0x336   : > { %4359 = vmatpush.xpose.msk.msra.mxu3 %vm1060_vm5, %v1188_v4 }
 0x33a   : > { %4360 = vmatpush.xpose.msk.msra.mxu3 %vm1060_vm5, %v1186_v20 }
 0x33d   : > { %4361 = vmatmul.msk.f32.vlgmr.msra.gmra.mxu3 %vm1060_vm5, %v1182_v36  ;;  %v1184_v40 = vpop.permute.xlu0 %1183 }
 0x345   : > { %4362 = vmatmul.msk.f32.gmra.mxu3 %vm1060_vm5, %v1184_v40 }
 0x357   : > { %v911_v21 = vpop.xlane.xlu2 %910 }
 0x358   : > { %v917_v22 = vmul.f32 %v911_v21, %v5022_v11  ;;  %v914_v23 = vpop.xlane.xlu1 %913 }
 0x359   : > { %v918_v24 = vmul.f32 %v914_v23, %v5022_v11 }
 0x35a   : > { %v5146_v25 = vsub.f32 %v5130_v16, %v917_v22 }
 0x35b   : > { %v5149_v26 = vsub.f32 %v5133_v17, %v918_v24 }
 0x35c   : > { %v925_v27 = vmul.f32 %v5146_v25, %v5146_v25 }
 0x35d   : > { %v926_v28 = vmul.f32 %v5149_v26, %v5149_v26 }
 0x35e   : > { %v933_v29 = vsel %vm790_vm0, %v925_v27, 0.0 }
 0x35f   : > { %934 = vadd.xlane.f32.xlu0 %v933_v29  ;;  %v936_v30 = vsel %vm790_vm0, %v926_v28, 0.0 }
 0x360   : > { %937 = vadd.xlane.f32.xlu2 %v936_v30 }
 0x378   : > { %1056 = vrot.lane.b32.xlu2 %v5112_v57, %s6450_s8  ;;  %s6467_s8 = smov 80  }
 0x380   : > { %1439 = vrot.lane.b32.xlu2 %v5119_v63, %s6453_s27  ;;  %s779_s27 = scalar_lea.vmem %s6506_s6, %s4347_s1  ;;  %s6457_s6 = smov 56  }
 0x381   : > { %v5174_v33 = vld [vmem:[%s779_s27] sm:$0x3]  ;;  %s6508_s1 = smov 72   ;;  %s6463_s27 = smov 104  }
 0x382   : > { %v5177_v34 = vperm.slane %v5174_v33, 0 }
 0x388   : > { %1307 = vrot.lane.b32.xlu2 %v5112_v57, %s6465_s4 }
 0x3c0   : > { %v1214_v37 = vpop.f32.mrf.mxu3 }
 0x3c1   : > { %v1220_v38 = vmul.f32 0.35355338, %v1214_v37 }
 0x3c3   : > { %v1222_v39 = vadd.f32 %v1220_v38, %v5177_v34 }
 0x3c5   : > { %v1224_v41 = vsel %vm1097_vm6, %v1222_v39, -inf }
 0x3c6   : > { %1225 = vmax.xlane.f32.xlu1 %v1224_v41 }
 0x3c8   : > { %v1217_v42 = vpop.f32.mrf.mxu3 }
 0x3c9   : > { %v1221_v43 = vmul.f32 0.35355338, %v1217_v42 }
 0x3cb   : > { %v5182_v45 = vadd.f32 %v1221_v43, %v5177_v34 }
 0x3cd   : > { %v1227_v46 = vsel %vm1097_vm6, %v5182_v45, -inf }
 0x3ce   : > { %1228 = vmax.xlane.f32.xlu0 %v1227_v46 }
 0x3d2   : > { %v935_v47 = vpop.xlane.xlu0 %934 }
 0x3d3   : > { %v941_v48 = vmul.f32 %v935_v47, %v5022_v11  ;;  %v938_v49 = vpop.xlane.xlu2 %937 }
 0x3d4   : > { %v942_v51 = vmul.f32 %v938_v49, %v5022_v11 }
 0x3d5   : > { %v945_v52 = vadd.f32 1e-12, %v941_v48 }
 0x3d6   : > { %v946_v53 = vadd.f32 1e-12, %v942_v51 }
 0x3d7   : > { %4657 = vrsqrt.f32 %v945_v52  ;;  %vm973_vm8 = vweird.f32 %v945_v52 }
 0x3d8   : > { %4659 = vrsqrt.f32 %v946_v53  ;;  %vm983_vm11 = vweird.f32 %v946_v53 }
 0x3db   : > { %v1057_v36 = vpop.permute.xlu2 %1056 }
 0x3dd   : > { %v4658_v54 = vpop.eup %4657 }
 0x3de   : > { %v4660_v58 = vpop.eup %4659  ;;  %v968_v59 = vmul.f32 %v4658_v54, %v945_v52  ;;  %vm974_vm7 = vweird.f32 %v4658_v54 }
 0x3df   : > { %v978_v60 = vmul.f32 %v4660_v58, %v946_v53  ;;  %4544 = vrot.lane.b32.xlu1 %v5190_v56, %s6457_s6  ;;  %vm984_vm9 = vweird.f32 %v4660_v58  ;;  %vm975_vm10 = vmor %vm973_vm8, %vm974_vm7 }
 0x3e0   : > { %v969_v61 = vmul.f32 %v4658_v54, %v968_v59  ;;  %vm985_vm12 = vmor %vm983_vm11, %vm984_vm9 }
 0x3e1   : > { %v979_v62 = vmul.f32 %v4660_v58, %v978_v60 }
 0x3e2   : > { %v970_v0 = vmul.f32 0.5, %v969_v61  ;;  %1058 = vrot.lane.b32.xlu0 %v5119_v63, %s6507_s26 }
 0x3e3   : > { %v980_v1 = vmul.f32 0.5, %v979_v62  ;;  %v1440_v24 = vpop.permute.xlu2 %1439 }
 0x3e4   : > { %v971_v2 = vsub.f32 1.5, %v970_v0 }
 0x3e5   : > { %v981_v3 = vsub.f32 1.5, %v980_v1 }
 0x3e6   : > { %v972_v5 = vmul.f32 %v4658_v54, %v971_v2 }
 0x3e7   : > { %v982_v6 = vmul.f32 %v4660_v58, %v981_v3  ;;  %1437 = vrot.lane.b32.xlu1 %v5112_v57, %s6508_s1 }
 0x3e8   : > { %v976_v7 = vsel %vm975_vm10, %v4658_v54, %v972_v5 }
 0x3e9   : > { %v989_v8 = vmul.f32 %v976_v7, %v5146_v25  ;;  %v986_v9 = vsel %vm985_vm12, %v4660_v58, %v982_v6 }
 0x3ea   : > { %1313 = vrot.lane.b32.xlu0 %v5119_v63, %s6467_s8  ;;  %v990_v13 = vmul.f32 %v986_v9, %v5149_v26 }
 0x3eb   : > { %v996_v10 = vmul.f32 %v5091_v31, %v989_v8  ;;  %v1308_v28 = vpop.permute.xlu2 %1307 }
 0x3ec   : > { %v997_v14 = vmul.f32 %v5091_v31, %v990_v13 }
 0x3ed   : > { %v1003_v12 = vadd.f32 %v5096_v35, %v996_v10 }
 0x3ee   : > { %v1004_v15 = vadd.f32 %v5096_v35, %v997_v14 }
 0x3ef   : > { %1309 = vrot.lane.b32.xlu1 %v5119_v63, %s6465_s4  ;;  %4351 = vmatmul.msk.f32.gmra.mxu0 %vm790_vm0, %v1003_v12 }
 0x3f2   : > { %1311 = vrot.lane.b32.xlu0 %v5112_v57, %s6467_s8 }
 0x3f7   : > { %4352 = vmatmul.msk.f32.gmra.mxu0 %vm790_vm0, %v1004_v15 }
 0x3fa   : > { %1433 = vrot.lane.b32.xlu0 %v5112_v57, %s6463_s27 }
 0x439   : > { %v1226_v18 = vpop.xlane.xlu1 %1225 }
 0x43a   : > { %v1230_v19 = vsub.f32 %v1222_v39, %v1226_v18 }
 0x43c   : > { %v1232_v4 = vmul.f32 1.442695, %v1230_v19 }
 0x43e   : > { %4661 = vpow2.f32 %v1232_v4 }
 0x441   : > { %v1229_v40 = vpop.xlane.xlu0 %1228 }
 0x444   : > { %v5214_v20 = vpop.eup %4661 }
 0x445   : > { %v1236_v31 = vsel %vm1097_vm6, %v5214_v20, 0.0 }
 0x446   : > { %1237 = vadd.xlane.f32.xlu2 %v1236_v31 }
 0x451   : > { %v4545_v21 = vpop.permute.xlu1 %4544 }
 0x452   : > { %v4546_v35 = vunpack.i.l.bf16 %v4545_v21  ;;  %v4547_v23 = vunpack.i.h.bf16 %v4545_v21 }
 0x454   : > { %1298 = vmatpush.msra.mxu2 %v4546_v35  ;;  %v1059_v22 = vpop.permute.xlu0 %1058 }
 0x455   : > { %4353 = vmatpush.xpose.msk.msra.mxu1 %vm1060_vm5, %v1059_v22 }
 0x456   : > { %1299 = vmatpush.msra.mxu2 %v4547_v23 }
 0x458   : > { %4371 = vmatpush.xpose.msk.msrb.mxu2 %vm1060_vm5, %v1440_v24 }
 0x459   : > { %v1438_v25 = vpop.permute.xlu1 %1437  ;;  %4354 = vmatpush.xpose.msk.msra.mxu1 %vm1060_vm5, %v1057_v36 }
 0x45c   : > { %4372 = vmatpush.xpose.msk.msrb.mxu2 %vm1060_vm5, %v1438_v25  ;;  %4355 = vmatmul.msk.f32.vlgmr.msra.gmra.mxu1 %vm1060_vm5, %v5112_v57  ;;  %v1314_v26 = vpop.permute.xlu0 %1313 }
 0x45d   : > { %4365 = vmatpush.xpose.msk.msrb.mxu1 %vm1060_vm5, %v1314_v26 }
 0x45e   : > { %1435 = vrot.lane.b32.xlu2 %v5119_v63, %s6463_s27 }
 0x461   : > { %v1310_v57 = vpop.permute.xlu1 %1309 }
 0x464   : > { %4356 = vmatmul.msk.f32.gmra.mxu1 %vm1060_vm5, %v5119_v63  ;;  %v1312_v27 = vpop.permute.xlu0 %1311 }
 0x465   : > { %4366 = vmatpush.xpose.msk.msrb.mxu1 %vm1060_vm5, %v1312_v27 }
 0x46c   : > { %v1048_v29 = vpop.f32.mrf.mxu0  ;;  %4367 = vmatmul.msk.f32.vlgmr.msrb.gmra.mxu1 %vm1060_vm5, %v1308_v28  ;;  %v1434_v1 = vpop.permute.xlu0 %1433 }
 0x46d   : > { %v5232_v30 = vadd.f32 %v5109_v55, %v1048_v29 }
 0x46f   : > { %1592 = vrot.lane.b32.xlu2 %v5232_v30, %s6507_s26 }
 0x474   : > { %v1051_v32 = vpop.f32.mrf.mxu0  ;;  %4368 = vmatmul.msk.f32.gmra.mxu1 %vm1060_vm5, %v1310_v57 }
 0x475   : > { %v5238_v37 = vadd.f32 %v5109_v55, %v1051_v32  ;;  %v1231_v55 = vsub.f32 %v5182_v45, %v1229_v40 }
 0x477   : > { %1721 = vrot.lane.b32.xlu1 %v5238_v37, %s6509_s28  ;;  %1594 = vrot.lane.b32.xlu0 %v5238_v37, %s6507_s26  ;;  %v1234_v63 = vmul.f32 1.442695, %v1231_v55 }
 0x478   : > { %1717 = vrot.lane.b32.xlu2 %v5238_v37, %s6510_s5 }
 0x479   : > { %4663 = vpow2.f32 %v1234_v63 }
 0x47f   : > { %1715 = vrot.lane.b32.xlu1 %v5232_v30, %s6510_s5  ;;  %1719 = vrot.lane.b32.xlu0 %v5232_v30, %s6509_s28  ;;  %v5265_v38 = vpop.eup %4663 }
 0x480   : > { %1845 = vrot.lane.b32.xlu2 %v5232_v30, %s6467_s8  ;;  %v1239_v39 = vsel %vm1097_vm6, %v5265_v38, 0.0 }
 0x487   : > { %1973 = vrot.lane.b32.xlu1 %v5238_v37, %s6508_s1  ;;  %1847 = vrot.lane.b32.xlu0 %v5238_v37, %s6467_s8  ;;  %s6513_s8 = sld [smem:[#allocation13_spill]] }
 0x488   : > { %1967 = vrot.lane.b32.xlu2 %v5232_v30, %s6463_s27 }
 0x48f   : > { %1841 = vrot.lane.b32.xlu1 %v5232_v30, %s6465_s4  ;;  %1971 = vrot.lane.b32.xlu0 %v5232_v30, %s6508_s1 }
 0x497   : > { %1843 = vrot.lane.b32.xlu0 %v5238_v37, %s6465_s4  ;;  %s6514_s4 = smov 16  }
 0x4b9   : > { %v1238_v41 = vpop.xlane.xlu2 %1237  ;;  %1240 = vadd.xlane.f32.xlu1 %v1239_v39 }
 0x4ba   : > { %4665 = vrcp.f32 %v1238_v41  ;;  %v1253_v47 = vand.u32 2147483648, %v1238_v41  ;;  %v1251_v49 = vand.u32 2147483647, %v1238_v41  ;;  %vm1247_vm14 = vweird.f32 %v1238_v41 }
 0x4bc   : > { %v1254_v45 = vor.u32 1.1754944e-38, %v1253_v47  ;;  %vm1252_vm1 = vcmp.eq.f32.partialorder %v1251_v49, 8.507059e+37 }
 0x4c0   : > { %v4666_v42 = vpop.eup %4665 }
 0x4c1   : > { %v1243_v43 = vmul.f32 %v4666_v42, %v1238_v41  ;;  %vm1248_vm13 = vweird.f32 %v4666_v42  ;;  %v1436_v62 = vpop.permute.xlu2 %1435 }
 0x4c2   : > { %vm1249_vm15 = vmor %vm1247_vm14, %vm1248_vm13 }
 0x4c3   : > { %v1244_v46 = vsub.f32 1.0, %v1243_v43  ;;  %v5315_v43 = vperm.slane %v5174_v33, 1 }
 0x4c5   : > { %v1245_v48 = vmul.f32 %v4666_v42, %v1244_v46 }
 0x4c7   : > { %v1246_v51 = vadd.f32 %v4666_v42, %v1245_v48 }
 0x4c9   : > { %v1250_v52 = vsel %vm1249_vm15, %v4666_v42, %v1246_v51  ;;  %v1593_v8 = vpop.permute.xlu2 %1592 }
 0x4ca   : > { %v1255_v53 = vsel %vm1252_vm1, %v1254_v45, %v1250_v52 }
 0x4cb   : > { %v1256_v54 = vmul.f32 %v5214_v20, %v1255_v53 }
 0x4cd   : > { %4363 = vmatmul.msk.f32.vlgmr.msra.gmra.mxu2 %vm1097_vm6, %v1256_v54 }
 0x4d2   : > { %1969 = vrot.lane.b32.xlu1 %v5238_v37, %s6463_s27  ;;  %v1718_v18 = vpop.permute.xlu2 %1717  ;;  %s6515_s27 = sld [smem:[#allocation14_spill]] }
 0x4d9   : > { %v1086_v58 = vpop.f32.mrf.mxu1 }
 0x4da   : > { %v1092_v59 = vmul.f32 0.35355338, %v1086_v58  ;;  %v1846_v21 = vpop.permute.xlu2 %1845 }
 0x4dc   : > { %v5274_v60 = vadd.f32 %v5177_v34, %v1092_v59 }
 0x4de   : > { %v1098_v61 = vsel %vm1097_vm6, %v5274_v60, -inf }
 0x4df   : > { %1099 = vmax.xlane.f32.xlu2 %v1098_v61 }
 0x4e1   : > { %v1089_v0 = vpop.f32.mrf.mxu1 }
 0x4e2   : > { %v1093_v2 = vmul.f32 0.35355338, %v1089_v0  ;;  %v1968_v42 = vpop.permute.xlu2 %1967 }
 0x4e4   : > { %v5279_v3 = vadd.f32 %v5177_v34, %v1093_v2 }
 0x4e6   : > { %v1101_v5 = vsel %vm1097_vm6, %v5279_v3, -inf }
 0x4e7   : > { %1102 = vmax.xlane.f32.xlu0 %v1101_v5 }
 0x4e9   : > { %v1722_v6 = vpop.permute.xlu1 %1721  ;;  %v1340_v7 = vpop.f32.mrf.mxu1 }
 0x4ea   : > { %v1595_v9 = vpop.permute.xlu0 %1594  ;;  %4383 = vmatpush.xpose.msk.msra.mxu2 %vm1060_vm5, %v1722_v6  ;;  %v1346_v15 = vmul.f32 0.35355338, %v1340_v7 }
 0x4eb   : > { %4377 = vmatpush.xpose.msk.msra.mxu1 %vm1060_vm5, %v1595_v9 }
 0x4ec   : > { %v5295_v20 = vadd.f32 %v1346_v15, %v5177_v34 }
 0x4ee   : > { %v1350_v40 = vsel %vm1097_vm6, %v5295_v20, -inf }
 0x4ef   : > { %4378 = vmatpush.xpose.msk.msra.mxu1 %vm1060_vm5, %v1593_v8 }
 0x4f1   : > { %v1716_v10 = vpop.permute.xlu1 %1715  ;;  %v1343_v12 = vpop.f32.mrf.mxu1 }
 0x4f2   : > { %v1347_v13 = vmul.f32 0.35355338, %v1343_v12  ;;  %4379 = vmatmul.msk.f32.vlgmr.msra.gmra.mxu1 %vm1060_vm5, %v5232_v30  ;;  %v1720_v14 = vpop.permute.xlu0 %1719 }
 0x4f3   : > { %4384 = vmatpush.xpose.msk.msra.mxu2 %vm1060_vm5, %v1720_v14 }
 0x4f4   : > { %v5290_v19 = vadd.f32 %v1347_v13, %v5177_v34 }
 0x4f6   : > { %v1353_v4 = vsel %vm1097_vm6, %v5290_v19, -inf }
 0x4f7   : > { %1354 = vmax.xlane.f32.xlu0 %v1353_v4 }
 0x4f9   : > { %v1974_v31 = vpop.permute.xlu1 %1973 }
 0x4fa   : > { %4380 = vmatmul.msk.f32.gmra.mxu1 %vm1060_vm5, %v5238_v37  ;;  %v1848_v36 = vpop.permute.xlu0 %1847 }
 0x4fb   : > { %4389 = vmatpush.xpose.msk.msrb.mxu1 %vm1060_vm5, %v1848_v36 }
 0x4fc   : > { %1351 = vmax.xlane.f32.xlu1 %v1350_v40 }
 0x4ff   : > { %4390 = vmatpush.xpose.msk.msrb.mxu1 %vm1060_vm5, %v1846_v21 }
 0x501   : > { %v1842_v35 = vpop.permute.xlu1 %1841 }
 0x502   : > { %v1972_v22 = vpop.permute.xlu0 %1971  ;;  %4391 = vmatmul.msk.f32.vlgmr.msrb.gmra.mxu1 %vm1060_vm5, %v1842_v35 }
 0x50a   : > { %v1844_v23 = vpop.permute.xlu0 %1843 }
 0x50b   : > { %4392 = vmatmul.msk.f32.gmra.mxu1 %vm1060_vm5, %v1844_v23 }
 0x52c   : > { %v1241_v24 = vpop.xlane.xlu1 %1240 }
 0x52d   : > { %4667 = vrcp.f32 %v1241_v24  ;;  %v1268_v28 = vand.u32 2147483648, %v1241_v24  ;;  %v1266_v57 = vand.u32 2147483647, %v1241_v24  ;;  %vm1262_vm3 = vweird.f32 %v1241_v24 }
 0x52f   : > { %v1269_v55 = vor.u32 1.1754944e-38, %v1268_v28  ;;  %vm1267_vm7 = vcmp.eq.f32.partialorder %v1266_v57, 8.507059e+37 }
 0x533   : > { %v4668_v25 = vpop.eup %4667 }
 0x534   : > { %v1258_v26 = vmul.f32 %v4668_v25, %v1241_v24  ;;  %vm1263_vm2 = vweird.f32 %v4668_v25 }
 0x535   : > { %vm1264_vm4 = vmor %vm1262_vm3, %vm1263_vm2 }
 0x536   : > { %v1259_v27 = vsub.f32 1.0, %v1258_v26 }
 0x538   : > { %v1260_v29 = vmul.f32 %v4668_v25, %v1259_v27 }
 0x53a   : > { %v1261_v32 = vadd.f32 %v4668_v25, %v1260_v29 }
 0x53c   : > { %v1265_v63 = vsel %vm1264_vm4, %v4668_v25, %v1261_v32 }
 0x53d   : > { %v1270_v39 = vsel %vm1267_vm7, %v1269_v55, %v1265_v63 }
 0x53e   : > { %v1271_v41 = vmul.f32 %v5265_v38, %v1270_v39 }
 0x540   : > { %4364 = vmatmul.msk.f32.gmra.mxu2 %vm1097_vm6, %v1271_v41 }
 0x544   : > { %v1970_v38 = vpop.permute.xlu1 %1969 }
 0x548   : > { %4373 = vmatmul.msk.f32.vlgmr.msrb.gmra.mxu2 %vm1060_vm5, %v1434_v1 }
 0x549   : > { %4395 = vmatpush.xpose.msk.msrb.mxu2 %vm1060_vm5, %v1974_v31 }
 0x54d   : > { %4396 = vmatpush.xpose.msk.msrb.mxu2 %vm1060_vm5, %v1972_v22 }
 0x550   : > { %4374 = vmatmul.msk.f32.gmra.mxu2 %vm1060_vm5, %v1436_v62  ;;  %v5362_v21 = vpop.f32.mrf.mxu2 }
 0x552   : > { %v1100_v45 = vpop.xlane.xlu2 %1099 }
 0x553   : > { %v1104_v33 = vsub.f32 %v5274_v60, %v1100_v45 }
 0x555   : > { %v1106_v58 = vmul.f32 1.442695, %v1104_v33 }
 0x557   : > { %4669 = vpow2.f32 %v1106_v58 }
 0x558   : > { %4385 = vmatmul.msk.f32.vlgmr.msra.gmra.mxu2 %vm1060_vm5, %v1716_v10 }
 0x55a   : > { %v1103_v61 = vpop.xlane.xlu0 %1102 }
 0x55b   : > { %v1105_v5 = vsub.f32 %v5279_v3, %v1103_v61 }
 0x55d   : > { %v1108_v7 = vmul.f32 1.442695, %v1105_v5  ;;  %v5336_v10 = vpop.eup %4669 }
 0x55e   : > { %v1110_v3 = vsel %vm1097_vm6, %v5336_v10, 0.0 }
 0x560   : > { %4386 = vmatmul.msk.f32.gmra.mxu2 %vm1060_vm5, %v1718_v18 }
 0x568   : > { %4397 = vmatmul.msk.f32.vlgmr.msrb.gmra.mxu2 %vm1060_vm5, %v1968_v42 }
 0x56a   : > { %v1355_v8 = vpop.xlane.xlu0 %1354 }
 0x56b   : > { %v1357_v13 = vsub.f32 %v5290_v19, %v1355_v8 }
 0x56d   : > { %v1360_v18 = vmul.f32 1.442695, %v1357_v13 }
 0x56f   : > { %v1621_v46 = vpop.f32.mrf.mxu1  ;;  %v1352_v62 = vpop.xlane.xlu1 %1351 }
 0x570   : > { %v1627_v47 = vmul.f32 0.35355338, %v1621_v46  ;;  %4398 = vmatmul.msk.f32.gmra.mxu2 %vm1060_vm5, %v1970_v38  ;;  %v1356_v2 = vsub.f32 %v5295_v20, %v1352_v62 }
 0x572   : > { %v5319_v48 = vadd.f32 %v5315_v43, %v1627_v47  ;;  %v1358_v6 = vmul.f32 1.442695, %v1356_v2  ;;  %v5384_v47 = vpack.i.bf16 %v5232_v30, %v5238_v37 }
 0x574   : > { %v1632_v49 = vsel %vm1097_vm6, %v5319_v48, -inf  ;;  %4671 = vpow2.f32 %v1358_v6 }
 0x575   : > { %1633 = vmax.xlane.f32.xlu2 %v1632_v49  ;;  %4673 = vpow2.f32 %v1108_v7 }
 0x576   : > { %4675 = vpow2.f32 %v1360_v18 }
 0x577   : > { %v1624_v51 = vpop.f32.mrf.mxu1 }
 0x578   : > { %v1628_v52 = vmul.f32 0.35355338, %v1624_v51 }
 0x57a   : > { %v5324_v53 = vadd.f32 %v5315_v43, %v1628_v52  ;;  %v5346_v4 = vpop.eup %4671 }
 0x57b   : > { %v5348_v20 = vpop.eup %4673  ;;  %v1362_v19 = vsel %vm1097_vm6, %v5346_v4, 0.0 }
 0x57c   : > { %v1635_v54 = vsel %vm1097_vm6, %v5324_v53, -inf  ;;  %v1113_v31 = vsel %vm1097_vm6, %v5348_v20, 0.0  ;;  %v5356_v36 = vpop.eup %4675 }
 0x57d   : > { %1636 = vmax.xlane.f32.xlu1 %v1635_v54  ;;  %v1365_v40 = vsel %vm1097_vm6, %v5356_v36, 0.0 }
 0x57f   : > { %v1874_v59 = vpop.f32.mrf.mxu1 }
 0x580   : > { %v1880_v0 = vmul.f32 0.35355338, %v1874_v59 }
 0x582   : > { %v5330_v1 = vadd.f32 %v1880_v0, %v5315_v43 }
 0x584   : > { %v1884_v60 = vsel %vm1097_vm6, %v5330_v1, -inf }
 0x585   : > { %1885 = vmax.xlane.f32.xlu0 %v1884_v60 }
 0x588   : > { %v1877_v9 = vpop.f32.mrf.mxu1 }
 0x589   : > { %v1881_v12 = vmul.f32 0.35355338, %v1877_v9 }
 0x58b   : > { %v5340_v14 = vadd.f32 %v1881_v12, %v5315_v43 }
 0x58d   : > { %1111 = vadd.xlane.f32.xlu0 %v1110_v3  ;;  %v1887_v15 = vsel %vm1097_vm6, %v5340_v14, -inf }
 0x58e   : > { %1888 = vmax.xlane.f32.xlu2 %v1887_v15 }
 0x595   : > { %1363 = vadd.xlane.f32.xlu0 %v1362_v19 }
 0x596   : > { %4554 = vrot.lane.b32.xlu1 %v5190_v56, %s6461_s0  ;;  %1114 = vadd.xlane.f32.xlu2 %v1113_v31 }
 0x59d   : > { %1366 = vadd.xlane.f32.xlu0 %v1365_v40 }
 0x5ae   : > { %4549 = vrot.lane.b32.xlu2 %v5190_v56, %s6455_s2 }
 0x5c3   : > { %v5364_v35 = vpop.f32.mrf.mxu2 }
 0x5cb   : > { %v1466_v22 = vpop.f32.mrf.mxu2 }
 0x5cc   : > { %v1472_v23 = vmul.f32 0.35355338, %v1466_v22 }
 0x5ce   : > { %v5367_v24 = vadd.f32 %v1472_v23, %v5177_v34 }
 0x5d0   : > { %v1476_v27 = vsel %vm1097_vm6, %v5367_v24, -inf }
 0x5d3   : > { %v1469_v25 = vpop.f32.mrf.mxu2 }
 0x5d4   : > { %v1473_v26 = vmul.f32 0.35355338, %v1469_v25 }
 0x5d6   : > { %v5372_v28 = vadd.f32 %v1473_v26, %v5177_v34 }
 0x5d7   : > { %1477 = vmax.xlane.f32.xlu2 %v1476_v27 }
 0x5d8   : > { %v1479_v29 = vsel %vm1097_vm6, %v5372_v28, -inf }
 0x5d9   : > { %1480 = vmax.xlane.f32.xlu1 %v1479_v29 }
 0x5db   : > { %v1748_v57 = vpop.f32.mrf.mxu2 }
 0x5dc   : > { %v1754_v45 = vmul.f32 0.35355338, %v1748_v57 }
 0x5de   : > { %v5394_v54 = vadd.f32 %v1754_v45, %v5315_v43 }
 0x5e0   : > { %v1758_v37 = vsel %vm1097_vm6, %v5394_v54, -inf }
 0x5e3   : > { %v1751_v32 = vpop.f32.mrf.mxu2 }
 0x5e4   : > { %v1755_v55 = vmul.f32 0.35355338, %v1751_v32 }
 0x5e6   : > { %v5377_v63 = vadd.f32 %v1755_v55, %v5315_v43 }
 0x5e8   : > { %v1634_v39 = vpop.xlane.xlu2 %1633  ;;  %v1761_v41 = vsel %vm1097_vm6, %v5377_v63, -inf }
 0x5e9   : > { %v1638_v42 = vsub.f32 %v5319_v48, %v1634_v39  ;;  %1762 = vmax.xlane.f32.xlu2 %v1761_v41 }
 0x5eb   : > { %v1640_v38 = vmul.f32 1.442695, %v1638_v42  ;;  %v2000_v18 = vpop.f32.mrf.mxu2 }
 0x5ec   : > { %v2006_v32 = vmul.f32 0.35355338, %v2000_v18 }
 0x5ed   : > { %4677 = vpow2.f32 %v1640_v38 }
 0x5f0   : > { %v1637_v46 = vpop.xlane.xlu1 %1636 }
 0x5f1   : > { %v1639_v51 = vsub.f32 %v5324_v53, %v1637_v46 }
 0x5f2   : > { %4564 = vrot.lane.b32.xlu1 %v5384_v47, %s6455_s2  ;;  %s6459_s2 = smov 40  }
 0x5f3   : > { %v5388_v49 = vpop.eup %4677  ;;  %v1642_v48 = vmul.f32 1.442695, %v1639_v51 }
 0x5f4   : > { %v1644_v52 = vsel %vm1097_vm6, %v5388_v49, 0.0 }
 0x5f5   : > { %1645 = vadd.xlane.f32.xlu0 %v1644_v52  ;;  %4679 = vpow2.f32 %v1642_v48 }
 0x5f8   : > { %v1886_v33 = vpop.xlane.xlu0 %1885 }
 0x5f9   : > { %v1890_v30 = vsub.f32 %v5330_v1, %v1886_v33 }
 0x5fb   : > { %v1892_v58 = vmul.f32 1.442695, %v1890_v30  ;;  %v5399_v53 = vpop.eup %4679 }
 0x5fc   : > { %v1647_v0 = vsel %vm1097_vm6, %v5399_v53, 0.0 }
 0x5fd   : > { %1759 = vmax.xlane.f32.xlu0 %v1758_v37 }
 0x600   : > { %v1112_v59 = vpop.xlane.xlu0 %1111 }
 0x601   : > { %v1889_v61 = vpop.xlane.xlu2 %1888  ;;  %4681 = vrcp.f32 %v1112_v59  ;;  %4559 = vrot.lane.b32.xlu2 %v5190_v56, %s6459_s2  ;;  %v1125_v15 = vand.u32 2147483647, %v1112_v59  ;;  %vm1121_vm9 = vweird.f32 %v1112_v59 }
 0x602   : > { %4683 = vpow2.f32 %v1892_v58  ;;  %v1891_v62 = vsub.f32 %v5340_v14, %v1889_v61  ;;  %v1127_v14 = vand.u32 2147483648, %v1112_v59 }
 0x603   : > { %vm1126_vm11 = vcmp.eq.f32.partialorder %v1125_v15, 8.507059e+37 }
 0x604   : > { %v1894_v2 = vmul.f32 1.442695, %v1891_v62  ;;  %v1128_v22 = vor.u32 1.1754944e-38, %v1127_v14  ;;  %v5433_v62 = vadd.f32 %v2006_v32, %v5315_v43 }
 0x605   : > { %1648 = vadd.xlane.f32.xlu0 %v1647_v0 }
 0x606   : > { %v2010_v14 = vsel %vm1097_vm6, %v5433_v62, -inf }
 0x607   : > { %v4682_v1 = vpop.eup %4681 }
 0x608   : > { %v1117_v5 = vmul.f32 %v4682_v1, %v1112_v59  ;;  %v4555_v60 = vpop.permute.xlu1 %4554  ;;  %v5406_v6 = vpop.xlane.xlu0 %1363  ;;  %vm1122_vm8 = vweird.f32 %v4682_v1 }
 0x609   : > { %v5408_v7 = vpop.eup %4683  ;;  %v5410_v8 = vpop.xlane.xlu2 %1114  ;;  %4685 = vrcp.f32 %v5406_v6  ;;  %v4556_v56 = vunpack.i.l.bf16 %v4555_v60  ;;  %v4557_v12 = vunpack.i.h.bf16 %v4555_v60  ;;  %vm1123_vm10 = vmor %vm1121_vm9, %vm1122_vm8  ;;  %v1379_v38 = vand.u32 2147483648, %v5406_v6 }
 0x60a   : > { %v1118_v9 = vsub.f32 1.0, %v1117_v5  ;;  %4687 = vrcp.f32 %v5410_v8  ;;  %v1896_v3 = vsel %vm1097_vm6, %v5408_v7, 0.0  ;;  %v1377_v46 = vand.u32 2147483647, %v5406_v6 }
 0x60b   : > { %4689 = vpow2.f32 %v1894_v2  ;;  %1424 = vmatpush.msrb.mxu3 %v4556_v56  ;;  %v1142_v51 = vand.u32 2147483648, %v5410_v8  ;;  %v1140_v37 = vand.u32 2147483647, %v5410_v8  ;;  %vm1373_vm14 = vweird.f32 %v5406_v6 }
 0x60c   : > { %v1119_v13 = vmul.f32 %v4682_v1, %v1118_v9  ;;  %v1380_v61 = vor.u32 1.1754944e-38, %v1379_v38  ;;  %vm1136_vm1 = vweird.f32 %v5410_v8  ;;  %vm1378_vm2 = vcmp.eq.f32.partialorder %v1377_v46, 8.507059e+37 }
 0x60d   : > { %1425 = vmatpush.msrb.mxu3 %v4557_v12  ;;  %1897 = vadd.xlane.f32.xlu0 %v1896_v3  ;;  %v1143_v5 = vor.u32 1.1754944e-38, %v1142_v51  ;;  %vm1141_vm4 = vcmp.eq.f32.partialorder %v1140_v37, 8.507059e+37 }
 0x60e   : > { %v1120_v19 = vadd.f32 %v4682_v1, %v1119_v13 }
 0x60f   : > { %v4686_v31 = vpop.eup %4685 }
 0x610   : > { %v4688_v40 = vpop.eup %4687  ;;  %v1369_v23 = vmul.f32 %v4686_v31, %v5406_v6  ;;  %v5417_v25 = vpop.xlane.xlu0 %1366  ;;  %v1124_v26 = vsel %vm1123_vm10, %v4682_v1, %v1120_v19  ;;  %vm1374_vm12 = vweird.f32 %v4686_v31 }
 0x611   : > { %v5419_v27 = vpop.eup %4689  ;;  %v1132_v29 = vmul.f32 %v4688_v40, %v5410_v8  ;;  %v4550_v57 = vpop.permute.xlu2 %4549  ;;  %4691 = vrcp.f32 %v5417_v25  ;;  %v1129_v41 = vsel %vm1126_vm11, %v1128_v22, %v1124_v26  ;;  %vm1137_vm13 = vweird.f32 %v4688_v40  ;;  %vm1375_vm15 = vmor %vm1373_vm14, %vm1374_vm12 }
 0x612   : > { %v1370_v55 = vsub.f32 1.0, %v1369_v23  ;;  %v4551_v39 = vunpack.i.l.bf16 %v4550_v57  ;;  %v1899_v52 = vsel %vm1097_vm6, %v5419_v27, 0.0  ;;  %v4552_v48 = vunpack.i.h.bf16 %v4550_v57  ;;  %vm1138_vm3 = vmor %vm1136_vm1, %vm1137_vm13 }
 0x613   : > { %v1133_v42 = vsub.f32 1.0, %v1132_v29  ;;  %v1130_v33 = vmul.f32 %v5336_v10, %v1129_v41  ;;  %v2003_v10 = vpop.f32.mrf.mxu2  ;;  %v1394_v8 = vand.u32 2147483648, %v5417_v25  ;;  %v1392_v15 = vand.u32 2147483647, %v5417_v25 }
 0x614   : > { %v1371_v45 = vmul.f32 %v4686_v31, %v1370_v55  ;;  %1172 = vmatpush.msrb.mxu0 %v4551_v39  ;;  %v2007_v13 = vmul.f32 0.35355338, %v2003_v10  ;;  %vm1388_vm8 = vweird.f32 %v5417_v25 }
 0x615   : > { %1900 = vadd.xlane.f32.xlu0 %v1899_v52  ;;  %v1134_v30 = vmul.f32 %v4688_v40, %v1133_v42  ;;  %vm1393_vm10 = vcmp.eq.f32.partialorder %v1392_v15, 8.507059e+37 }
 0x616   : > { %1173 = vmatpush.msrb.mxu0 %v4552_v48  ;;  %v1372_v58 = vadd.f32 %v4686_v31, %v1371_v45 }
 0x617   : > { %v4692_v59 = vpop.eup %4691  ;;  %4357 = vmatmul.msk.f32.vlgmr.msrb.gmra.mxu0 %vm1097_vm6, %v1130_v33  ;;  %v1135_v0 = vadd.f32 %v4688_v40, %v1134_v30 }
 0x618   : > { %v1384_v1 = vmul.f32 %v4692_v59, %v5417_v25  ;;  %v1376_v2 = vsel %vm1375_vm15, %v4686_v31, %v1372_v58  ;;  %vm1389_vm7 = vweird.f32 %v4692_v59  ;;  %v1395_v31 = vor.u32 1.1754944e-38, %v1394_v8 }
 0x619   : > { %v1381_v60 = vsel %vm1378_vm2, %v1380_v61, %v1376_v2  ;;  %v1139_v6 = vsel %vm1138_vm3, %v4688_v40, %v1135_v0  ;;  %vm1390_vm9 = vmor %vm1388_vm8, %vm1389_vm7 }
 0x61a   : > { %v1385_v56 = vsub.f32 1.0, %v1384_v1  ;;  %v1382_v9 = vmul.f32 %v5346_v4, %v1381_v60  ;;  %v1144_v12 = vsel %vm1141_vm4, %v1143_v5, %v1139_v6  ;;  %v5448_v4 = vadd.f32 %v2007_v13, %v5315_v43 }
 0x61b   : > { %v1145_v18 = vmul.f32 %v5348_v20, %v1144_v12 }
 0x61c   : > { %2011 = vmax.xlane.f32.xlu1 %v2010_v14  ;;  %4369 = vmatmul.msk.f32.vlgmr.msrb.gmra.mxu3 %vm1097_vm6, %v1382_v9  ;;  %v1386_v3 = vmul.f32 %v4692_v59, %v1385_v56  ;;  %v2013_v26 = vsel %vm1097_vm6, %v5448_v4, -inf }
 0x61e   : > { %v1387_v19 = vadd.f32 %v4692_v59, %v1386_v3 }
 0x61f   : > { %4358 = vmatmul.msk.f32.gmra.mxu0 %vm1097_vm6, %v1145_v18 }
 0x620   : > { %v1391_v40 = vsel %vm1390_vm9, %v4692_v59, %v1387_v19 }
 0x621   : > { %v1396_v22 = vsel %vm1393_vm10, %v1395_v31, %v1391_v40 }
 0x622   : > { %v1397_v23 = vmul.f32 %v5356_v36, %v1396_v22 }
 0x624   : > { %2014 = vmax.xlane.f32.xlu1 %v2013_v26  ;;  %4370 = vmatmul.msk.f32.gmra.mxu3 %vm1097_vm6, %v1397_v23 }
 0x64a   : > { %v1478_v20 = vpop.xlane.xlu2 %1477 }
 0x64b   : > { %v1482_v25 = vsub.f32 %v5367_v24, %v1478_v20 }
 0x64c   : > { %v1481_v29 = vpop.xlane.xlu1 %1480 }
 0x64d   : > { %v1484_v57 = vmul.f32 1.442695, %v1482_v25  ;;  %v1483_v32 = vsub.f32 %v5372_v28, %v1481_v29 }
 0x64f   : > { %4693 = vpow2.f32 %v1484_v57  ;;  %v1486_v55 = vmul.f32 1.442695, %v1483_v32 }
 0x651   : > { %4695 = vpow2.f32 %v1486_v55 }
 0x655   : > { %v5456_v39 = vpop.eup %4693 }
 0x656   : > { %v1488_v36 = vsel %vm1097_vm6, %v5456_v39, 0.0 }
 0x657   : > { %1489 = vadd.xlane.f32.xlu1 %v1488_v36  ;;  %v5460_v41 = vpop.eup %4695 }
 0x658   : > { %v1491_v24 = vsel %vm1097_vm6, %v5460_v41, 0.0 }
 0x65c   : > { %v1763_v42 = vpop.xlane.xlu2 %1762 }
 0x65d   : > { %v1765_v38 = vsub.f32 %v5377_v63, %v1763_v42 }
 0x65f   : > { %v1768_v46 = vmul.f32 1.442695, %v1765_v38  ;;  %1492 = vadd.xlane.f32.xlu1 %v1491_v24 }
 0x661   : > { %4697 = vpow2.f32 %v1768_v46 }
 0x664   : > { %v4565_v28 = vpop.permute.xlu1 %4564  ;;  %v4560_v51 = vpop.permute.xlu2 %4559 }
 0x665   : > { %v4566_v45 = vunpack.i.l.bf16 %v4565_v28  ;;  %v4561_v52 = vunpack.i.l.bf16 %v4560_v51  ;;  %v4567_v33 = vunpack.i.h.bf16 %v4565_v28  ;;  %v4562_v30 = vunpack.i.h.bf16 %v4560_v51 }
 0x667   : > { %v5465_v48 = vpop.eup %4697  ;;  %1550 = vmatpush.msra.mxu0 %v4561_v52  ;;  %1706 = vmatpush.msra.mxu3 %v4566_v45 }
 0x668   : > { %v1646_v37 = vpop.xlane.xlu0 %1645  ;;  %v1773_v63 = vsel %vm1097_vm6, %v5465_v48, 0.0 }
 0x669   : > { %4699 = vrcp.f32 %v1646_v37  ;;  %1707 = vmatpush.msra.mxu3 %v4567_v33  ;;  %1774 = vadd.xlane.f32.xlu2 %v1773_v63  ;;  %v1661_v1 = vand.u32 2147483648, %v1646_v37  ;;  %v1659_v60 = vand.u32 2147483647, %v1646_v37  ;;  %vm1655_vm12 = vweird.f32 %v1646_v37 }
 0x66a   : > { %1551 = vmatpush.msra.mxu0 %v4562_v30 }
 0x66b   : > { %v1662_v56 = vor.u32 1.1754944e-38, %v1661_v1  ;;  %vm1660_vm14 = vcmp.eq.f32.partialorder %v1659_v60, 8.507059e+37 }
 0x66f   : > { %v4700_v58 = vpop.eup %4699 }
 0x670   : > { %v1651_v59 = vmul.f32 %v4700_v58, %v1646_v37  ;;  %v1760_v61 = vpop.xlane.xlu0 %1759  ;;  %vm1656_vm11 = vweird.f32 %v4700_v58 }
 0x671   : > { %v1764_v0 = vsub.f32 %v5394_v54, %v1760_v61  ;;  %vm1657_vm13 = vmor %vm1655_vm12, %vm1656_vm11 }
 0x672   : > { %v1652_v10 = vsub.f32 1.0, %v1651_v59 }
 0x673   : > { %v1766_v2 = vmul.f32 1.442695, %v1764_v0 }
 0x674   : > { %v1653_v5 = vmul.f32 %v4700_v58, %v1652_v10 }
 0x675   : > { %4701 = vpow2.f32 %v1766_v2 }
 0x676   : > { %v1654_v6 = vadd.f32 %v4700_v58, %v1653_v5 }
 0x678   : > { %v1658_v9 = vsel %vm1657_vm13, %v4700_v58, %v1654_v6  ;;  %4569 = vrot.lane.b32.xlu1 %v5384_v47, %s6457_s6  ;;  %v1649_v12 = vpop.xlane.xlu0 %1648  ;;  %s6469_s6 = smov 16  }
 0x679   : > { %4703 = vrcp.f32 %v1649_v12  ;;  %v1663_v13 = vsel %vm1660_vm14, %v1662_v56, %v1658_v9  ;;  %v1676_v19 = vand.u32 2147483648, %v1649_v12  ;;  %v1674_v40 = vand.u32 2147483647, %v1649_v12 }
 0x67a   : > { %v1664_v54 = vmul.f32 %v5388_v49, %v1663_v13  ;;  %vm1670_vm1 = vweird.f32 %v1649_v12 }
 0x67b   : > { %v5473_v14 = vpop.eup %4701  ;;  %v1677_v49 = vor.u32 1.1754944e-38, %v1676_v19  ;;  %vm1675_vm3 = vcmp.eq.f32.partialorder %v1674_v40, 8.507059e+37 }
 0x67c   : > { %4381 = vmatmul.msk.f32.vlgmr.msra.gmra.mxu3 %vm1097_vm6, %v1664_v54  ;;  %v1770_v8 = vsel %vm1097_vm6, %v5473_v14, 0.0 }
 0x67d   : > { %1771 = vadd.xlane.f32.xlu0 %v1770_v8 }
 0x67f   : > { %v4704_v3 = vpop.eup %4703 }
 0x680   : > { %v1666_v15 = vmul.f32 %v4704_v3, %v1649_v12  ;;  %vm1671_vm15 = vweird.f32 %v4704_v3  ;;  %v5501_v1 = vpop.xlane.xlu0 %1897 }
 0x681   : > { %4579 = vrot.lane.b32.xlu2 %v5384_v47, %s6459_s2  ;;  %vm1672_vm2 = vmor %vm1670_vm1, %vm1671_vm15  ;;  %s6474_s2 = smov 8  }
 0x682   : > { %v1667_v18 = vsub.f32 1.0, %v1666_v15 }
 0x684   : > { %v1668_v31 = vmul.f32 %v4704_v3, %v1667_v18 }
 0x686   : > { %v1669_v22 = vadd.f32 %v4704_v3, %v1668_v31 }
 0x688   : > { %v1673_v23 = vsel %vm1672_vm2, %v4704_v3, %v1669_v22 }
 0x689   : > { %v1678_v26 = vsel %vm1675_vm3, %v1677_v49, %v1673_v23 }
 0x68a   : > { %v1679_v20 = vmul.f32 %v5399_v53, %v1678_v26 }
 0x68c   : > { %4382 = vmatmul.msk.f32.gmra.mxu3 %vm1097_vm6, %v1679_v20 }
 0x68f   : > { %v2012_v25 = vpop.xlane.xlu1 %2011 }
 0x690   : > { %v2016_v29 = vsub.f32 %v5433_v62, %v2012_v25 }
 0x692   : > { %v2018_v57 = vmul.f32 1.442695, %v2016_v29 }
 0x694   : > { %4705 = vpow2.f32 %v2018_v57 }
 0x697   : > { %v2015_v32 = vpop.xlane.xlu1 %2014 }
 0x698   : > { %v2017_v55 = vsub.f32 %v5448_v4, %v2015_v32 }
 0x69a   : > { %v5484_v36 = vpop.eup %4705  ;;  %v2020_v42 = vmul.f32 1.442695, %v2017_v55 }
 0x69b   : > { %v2022_v38 = vsel %vm1097_vm6, %v5484_v36, 0.0 }
 0x69c   : > { %4707 = vpow2.f32 %v2020_v42  ;;  %2023 = vadd.xlane.f32.xlu0 %v2022_v38 }
 0x69f   : > { %v1427_v24 = vpop.f32.mrf.mxu3 }
 0x6a2   : > { %v5488_v53 = vpop.eup %4707 }
 0x6a3   : > { %v2025_v46 = vsel %vm1097_vm6, %v5488_v53, 0.0 }
 0x6a4   : > { %2026 = vadd.xlane.f32.xlu1 %v2025_v46 }
 0x6a7   : > { %v1430_v62 = vpop.f32.mrf.mxu3 }
 0x6a8   : > { %1571 = vrot.lane.b32.xlu2 %v1430_v62, %s6469_s6 }
 0x6b0   : > { %4574 = vrot.lane.b32.xlu0 %v5384_v47, %s6461_s0  ;;  %s6472_s0 = smov 24  }
 0x6b8   : > { %1561 = vrot.lane.b32.xlu0 %v5362_v21, %s6474_s2 }
 0x6bd   : > { %1563 = vrot.lane.b32.xlu1 %v5364_v35, %s6474_s2 }
 0x6c0   : > { %1569 = vrot.lane.b32.xlu0 %v1427_v24, %s6469_s6 }
 0x6ca   : > { %v1490_v4 = vpop.xlane.xlu1 %1489 }
 0x6cb   : > { %4709 = vrcp.f32 %v1490_v4  ;;  %v1505_v33 = vand.u32 2147483648, %v1490_v4  ;;  %v1503_v47 = vand.u32 2147483647, %v1490_v4  ;;  %vm1499_vm7 = vweird.f32 %v1490_v4 }
 0x6cd   : > { %v1506_v21 = vor.u32 1.1754944e-38, %v1505_v33  ;;  %vm1504_vm9 = vcmp.eq.f32.partialorder %v1503_v47, 8.507059e+37 }
 0x6d1   : > { %v4710_v28 = vpop.eup %4709 }
 0x6d2   : > { %v1495_v51 = vmul.f32 %v4710_v28, %v1490_v4  ;;  %v1493_v45 = vpop.xlane.xlu1 %1492  ;;  %vm1500_vm4 = vweird.f32 %v4710_v28 }
 0x6d3   : > { %4711 = vrcp.f32 %v1493_v45  ;;  %vm1501_vm8 = vmor %vm1499_vm7, %vm1500_vm4  ;;  %v1520_v10 = vand.u32 2147483648, %v1493_v45  ;;  %v1518_v5 = vand.u32 2147483647, %v1493_v45  ;;  %vm1514_vm11 = vweird.f32 %v1493_v45 }
 0x6d4   : > { %v1496_v52 = vsub.f32 1.0, %v1495_v51 }
 0x6d5   : > { %v1521_v6 = vor.u32 1.1754944e-38, %v1520_v10  ;;  %vm1519_vm13 = vcmp.eq.f32.partialorder %v1518_v5, 8.507059e+37  ;;  %v1913_v5 = vand.u32 2147483648, %v5501_v1 }
 0x6d6   : > { %v1497_v30 = vmul.f32 %v4710_v28, %v1496_v52 }
 0x6d8   : > { %v1498_v37 = vadd.f32 %v4710_v28, %v1497_v30 }
 0x6d9   : > { %v4712_v63 = vpop.eup %4711 }
 0x6da   : > { %v1502_v58 = vsel %vm1501_vm8, %v4710_v28, %v1498_v37  ;;  %v1510_v35 = vmul.f32 %v4712_v63, %v1493_v45  ;;  %vm1515_vm10 = vweird.f32 %v4712_v63 }
 0x6db   : > { %v1507_v59 = vsel %vm1504_vm9, %v1506_v21, %v1502_v58  ;;  %vm1516_vm12 = vmor %vm1514_vm11, %vm1515_vm10  ;;  %vm1907_vm11 = vweird.f32 %v5501_v1 }
 0x6dc   : > { %v1511_v61 = vsub.f32 1.0, %v1510_v35  ;;  %v1508_v0 = vmul.f32 %v5456_v39, %v1507_v59  ;;  %v1775_v56 = vpop.xlane.xlu2 %1774  ;;  %v5506_v39 = vpop.xlane.xlu0 %1900 }
 0x6dd   : > { %4713 = vrcp.f32 %v1775_v56  ;;  %v1802_v24 = vand.u32 2147483648, %v1775_v56  ;;  %vm1796_vm4 = vweird.f32 %v1775_v56  ;;  %v1800_v4 = vand.u32 2147483647, %v1775_v56 }
 0x6de   : > { %v1512_v2 = vmul.f32 %v4712_v63, %v1511_v61  ;;  %4375 = vmatmul.msk.f32.vlgmr.msra.gmra.mxu0 %vm1097_vm6, %v1508_v0 }
 0x6df   : > { %v1803_v51 = vor.u32 1.1754944e-38, %v1802_v24  ;;  %vm1801_vm8 = vcmp.eq.f32.partialorder %v1800_v4, 8.507059e+37 }
 0x6e0   : > { %v1513_v60 = vadd.f32 %v4712_v63, %v1512_v2 }
 0x6e2   : > { %v1517_v9 = vsel %vm1516_vm12, %v4712_v63, %v1513_v60 }
 0x6e3   : > { %v1522_v12 = vsel %vm1519_vm13, %v1521_v6, %v1517_v9  ;;  %v4714_v40 = vpop.eup %4713 }
 0x6e4   : > { %v1523_v13 = vmul.f32 %v5460_v41, %v1522_v12  ;;  %v4580_v8 = vpop.permute.xlu2 %4579  ;;  %v1792_v22 = vmul.f32 %v4714_v40, %v1775_v56  ;;  %vm1797_vm3 = vweird.f32 %v4714_v40  ;;  %v1911_v56 = vand.u32 2147483647, %v5501_v1 }
 0x6e5   : > { %v4581_v18 = vunpack.i.l.bf16 %v4580_v8  ;;  %v4582_v19 = vunpack.i.h.bf16 %v4580_v8  ;;  %vm1798_vm7 = vmor %vm1796_vm4, %vm1797_vm3 }
 0x6e6   : > { %4376 = vmatmul.msk.f32.gmra.mxu0 %vm1097_vm6, %v1523_v13  ;;  %v1793_v49 = vsub.f32 1.0, %v1792_v22 }
 0x6e8   : > { %v1794_v25 = vmul.f32 %v4714_v40, %v1793_v49 }
 0x6ea   : > { %v4570_v54 = vpop.permute.xlu1 %4569  ;;  %v1795_v38 = vadd.f32 %v4714_v40, %v1794_v25 }
 0x6eb   : > { %v4571_v3 = vunpack.i.l.bf16 %v4570_v54  ;;  %v4572_v15 = vunpack.i.h.bf16 %v4570_v54 }
 0x6ec   : > { %v1799_v28 = vsel %vm1798_vm7, %v4714_v40, %v1795_v38 }
 0x6ed   : > { %1832 = vmatpush.msrb.mxu0 %v4571_v3  ;;  %v1804_v45 = vsel %vm1801_vm8, %v1803_v51, %v1799_v28  ;;  %vm1922_vm8 = vweird.f32 %v5506_v39 }
 0x6ee   : > { %v1805_v52 = vmul.f32 %v5465_v48, %v1804_v45 }
 0x6ef   : > { %1833 = vmatpush.msrb.mxu0 %v4572_v15  ;;  %v1914_v15 = vor.u32 1.1754944e-38, %v1913_v5 }
 0x6f0   : > { %v1772_v31 = vpop.xlane.xlu0 %1771 }
 0x6f1   : > { %2084 = vmatpush.msra.mxu0 %v4581_v18  ;;  %4715 = vrcp.f32 %v1772_v31  ;;  %v1787_v20 = vand.u32 2147483648, %v1772_v31  ;;  %v1785_v57 = vand.u32 2147483647, %v1772_v31  ;;  %vm1781_vm15 = vweird.f32 %v1772_v31 }
 0x6f2   : > { %4717 = vrcp.f32 %v5501_v1 }
 0x6f3   : > { %2085 = vmatpush.msra.mxu0 %v4582_v19  ;;  %v1788_v55 = vor.u32 1.1754944e-38, %v1787_v20  ;;  %vm1786_vm2 = vcmp.eq.f32.partialorder %v1785_v57, 8.507059e+37  ;;  %4719 = vrcp.f32 %v5506_v39  ;;  %v1928_v57 = vand.u32 2147483648, %v5506_v39 }
 0x6f7   : > { %v4716_v41 = vpop.eup %4715 }
 0x6f8   : > { %v1777_v23 = vmul.f32 %v4716_v41, %v1772_v31  ;;  %vm1782_vm14 = vweird.f32 %v4716_v41  ;;  %v4718_v33 = vpop.eup %4717 }
 0x6f9   : > { %vm1783_vm1 = vmor %vm1781_vm15, %vm1782_vm14  ;;  %v1903_v30 = vmul.f32 %v4718_v33, %v5501_v1  ;;  %v5515_v37 = vpop.eup %4719  ;;  %vm1908_vm9 = vweird.f32 %v4718_v33 }
 0x6fa   : > { %v1778_v26 = vsub.f32 1.0, %v1777_v23  ;;  %v1918_v59 = vmul.f32 %v5515_v37, %v5506_v39  ;;  %vm5521_vm12 = vmor %vm1907_vm11, %vm1908_vm9  ;;  %vm1923_vm3 = vweird.f32 %v5515_v37 }
 0x6fb   : > { %v1904_v47 = vsub.f32 1.0, %v1903_v30 }
 0x6fc   : > { %v1779_v29 = vmul.f32 %v4716_v41, %v1778_v26  ;;  %v1919_v60 = vsub.f32 1.0, %v1918_v59 }
 0x6fd   : > { %v1905_v21 = vmul.f32 %v4718_v33, %v1904_v47 }
 0x6fe   : > { %v1780_v32 = vadd.f32 %v4716_v41, %v1779_v29  ;;  %v1920_v19 = vmul.f32 %v5515_v37, %v1919_v60 }
 0x6ff   : > { %v1906_v0 = vadd.f32 %v4718_v33, %v1905_v21 }
 0x700   : > { %v1784_v42 = vsel %vm1783_vm1, %v4716_v41, %v1780_v32  ;;  %vm1912_vm1 = vcmp.eq.f32.partialorder %v1911_v56, 8.507059e+37  ;;  %v1921_v20 = vadd.f32 %v5515_v37, %v1920_v19 }
 0x701   : > { %v1789_v46 = vsel %vm1786_vm2, %v1788_v55, %v1784_v42  ;;  %v1910_v54 = vsel %vm5521_vm12, %v4718_v33, %v1906_v0  ;;  %v1926_v55 = vand.u32 2147483647, %v5506_v39  ;;  %v1175_v39 = vpop.f32.mrf.mxu0  ;;  %v2124_v33 = vld [vmem:[%s6513_s8 + $0x8] sm:$0xff]  ;;  %vm1587_vm12 = vcmask 195584  }
 0x702   : > { %v1790_v62 = vmul.f32 %v5473_v14, %v1789_v46  ;;  %v1915_v41 = vsel %vm1912_vm1, %v1914_v15, %v1910_v54  ;;  %v1572_v6 = vpop.permute.xlu2 %1571 }
 0x703   : > { %v1916_v32 = vmul.f32 %v5408_v7, %v1915_v41  ;;  %vm1927_vm11 = vcmp.eq.f32.partialorder %v1926_v55, 8.507059e+37 }
 0x704   : > { %4387 = vmatmul.msk.f32.vlgmr.msrb.gmra.mxu0 %vm1097_vm6, %v1790_v62  ;;  %v1929_v62 = vor.u32 1.1754944e-38, %v1928_v57 }
 0x709   : > { %v1178_v28 = vpop.f32.mrf.mxu0 }
 0x70c   : > { %4388 = vmatmul.msk.f32.gmra.mxu0 %vm1097_vm6, %v1805_v52 }
 0x70f   : > { %v2024_v14 = vpop.xlane.xlu0 %2023 }
 0x710   : > { %4721 = vrcp.f32 %v2024_v14  ;;  %v2039_v61 = vand.u32 2147483648, %v2024_v14  ;;  %v2037_v2 = vand.u32 2147483647, %v2024_v14  ;;  %vm2033_vm13 = vweird.f32 %v2024_v14 }
 0x712   : > { %v2040_v13 = vor.u32 1.1754944e-38, %v2039_v61  ;;  %vm2038_vm15 = vcmp.eq.f32.partialorder %v2037_v2, 8.507059e+37 }
 0x716   : > { %v4722_v63 = vpop.eup %4721 }
 0x717   : > { %v2029_v58 = vmul.f32 %v4722_v63, %v2024_v14  ;;  %v2027_v35 = vpop.xlane.xlu1 %2026  ;;  %vm2034_vm10 = vweird.f32 %v4722_v63  ;;  %v1709_v14 = vpop.f32.mrf.mxu3 }
 0x718   : > { %4723 = vrcp.f32 %v2027_v35  ;;  %vm2035_vm14 = vmor %vm2033_vm13, %vm2034_vm10  ;;  %v2054_v1 = vand.u32 2147483648, %v2027_v35  ;;  %v2052_v26 = vand.u32 2147483647, %v2027_v35  ;;  %vm2048_vm4 = vweird.f32 %v2027_v35 }
 0x719   : > { %v2030_v48 = vsub.f32 1.0, %v2029_v58  ;;  %vm1924_vm10 = vmor %vm1922_vm8, %vm1923_vm3  ;;  %v2123_v58 = vld [vmem:[%s6513_s8] sm:$0xff] }
 0x71a   : > { %vm2053_vm9 = vcmp.eq.f32.partialorder %v2052_v26, 8.507059e+37  ;;  %v1925_v24 = vsel %vm1924_vm10, %v5515_v37, %v1921_v20 }
 0x71b   : > { %v2031_v10 = vmul.f32 %v4722_v63, %v2030_v48  ;;  %v1930_v7 = vsel %vm1927_vm11, %v1929_v62, %v1925_v24 }
 0x71c   : > { %v1931_v4 = vmul.f32 %v5419_v27, %v1930_v7  ;;  %v2125_v27 = vld [vmem:[%s6513_s8 + $0x10] sm:$0xff] }
 0x71d   : > { %v2032_v9 = vadd.f32 %v4722_v63, %v2031_v10 }
 0x71e   : > { %v4724_v12 = vpop.eup %4723 }
 0x71f   : > { %v2036_v8 = vsel %vm2035_vm14, %v4722_v63, %v2032_v9  ;;  %v2044_v3 = vmul.f32 %v4724_v12, %v2027_v35  ;;  %vm2049_vm2 = vweird.f32 %v4724_v12  ;;  %v1712_v37 = vpop.f32.mrf.mxu3 }
 0x720   : > { %v2041_v18 = vsel %vm2038_vm15, %v2040_v13, %v2036_v8  ;;  %vm2050_vm7 = vmor %vm2048_vm4, %vm2049_vm2 }
 0x721   : > { %v2045_v31 = vsub.f32 1.0, %v2044_v3  ;;  %v2042_v40 = vmul.f32 %v5484_v36, %v2041_v18  ;;  %v2055_v36 = vor.u32 1.1754944e-38, %v2054_v1 }
 0x722   : > { %v4575_v22 = vpop.permute.xlu0 %4574 }
 0x723   : > { %v2046_v49 = vmul.f32 %v4724_v12, %v2045_v31  ;;  %v4576_v23 = vunpack.i.l.bf16 %v4575_v22  ;;  %4399 = vmatmul.msk.f32.vlgmr.msra.gmra.mxu0 %vm1097_vm6, %v2042_v40  ;;  %v4577_v25 = vunpack.i.h.bf16 %v4575_v22 }
 0x725   : > { %1958 = vmatpush.msrb.mxu3 %v4576_v23  ;;  %v2047_v29 = vadd.f32 %v4724_v12, %v2046_v49  ;;  %v4628_v49 = vld [vmem:[%s6515_s27] ss:$0 sm:$0xff] }
 0x727   : > { %1959 = vmatpush.msrb.mxu3 %v4577_v25  ;;  %v2051_v42 = vsel %vm2050_vm7, %v4724_v12, %v2047_v29 }
 0x728   : > { %4393 = vmatmul.msk.f32.vlgmr.msrb.gmra.mxu3 %vm1097_vm6, %v1916_v32  ;;  %v2056_v38 = vsel %vm2053_vm9, %v2055_v36, %v2051_v42 }
 0x729   : > { %v2057_v46 = vmul.f32 %v5488_v53, %v2056_v38  ;;  %v2126_v53 = vld [vmem:[%s6513_s8 + $0x18] sm:$0xff] }
 0x72a   : > { %2151 = vmatpush.msra.mxu1 %v2126_v53  ;;  %v1562_v59 = vpop.permute.xlu0 %1561 }
 0x72b   : > { %4400 = vmatmul.msk.f32.gmra.mxu0 %vm1097_vm6, %v2057_v46  ;;  %v1583_v61 = vsel %vm1060_vm5, %v1175_v39, %v1562_v59  ;;  %v2287_v59 = vld [vmem:[%s6426_s12 + $0x18] sm:$0xff] }
 0x72c   : > { %2152 = vmatpush.msra.mxu1 %v2125_v27  ;;  %2316 = vmatpush.msra.mxu3 %v2287_v59 }
 0x72e   : > { %2153 = vmatpush.msra.mxu1 %v2124_v33 }
 0x72f   : > { %v1564_v5 = vpop.permute.xlu1 %1563 }
 0x730   : > { %4394 = vmatmul.msk.f32.gmra.mxu3 %vm1097_vm6, %v1931_v4  ;;  %2154 = vmatpush.msra.mxu1 %v2123_v58  ;;  %v1584_v60 = vsel %vm1060_vm5, %v1178_v28, %v1564_v5 }
 0x731   : > { %v1586_v9 = vsel %vm1097_vm6, %v1584_v60, %v1572_v6 }
 0x732   : > { %v1570_v48 = vpop.permute.xlu0 %1569 }
 0x733   : > { %v1585_v0 = vsel %vm1097_vm6, %v1583_v61, %v1570_v48  ;;  %v2286_v48 = vld [vmem:[%s6426_s12 + $0x10] sm:$0xff]  ;;  %v2285_v61 = vld [vmem:[%s6426_s12 + $0x8] sm:$0xff] }
 0x734   : > { %2317 = vmatpush.msra.mxu3 %v2286_v48 }
 0x736   : > { %2318 = vmatpush.msra.mxu3 %v2285_v61 }
 0x75b   : > { %v1553_v51 = vpop.f32.mrf.mxu0 }
 0x75c   : > { %1577 = vrot.lane.b32.xlu0 %v1553_v51, %s6472_s0 }
 0x763   : > { %v1556_v45 = vpop.f32.mrf.mxu0 }
 0x764   : > { %1579 = vrot.lane.b32.xlu0 %v1556_v45, %s6472_s0 }
 0x781   : > { %v1835_v52 = vpop.f32.mrf.mxu0 }
 0x782   : > { %2095 = vrot.lane.b32.xlu2 %v1835_v52, %s6474_s2 }
 0x789   : > { %v1838_v30 = vpop.f32.mrf.mxu0 }
 0x7a0   : > { %v2087_v47 = vpop.f32.mrf.mxu0 }
 0x7a1   : > { %2111 = vrot.lane.b32.xlu2 %v2087_v47, %s6472_s0 }
 0x7a8   : > { %v2090_v63 = vpop.f32.mrf.mxu0 }
 0x7a9   : > { %2113 = vrot.lane.b32.xlu2 %v2090_v63, %s6472_s0  ;;  %s6518_s0 = smov 104  }
 0x7ab   : > { %v1961_v21 = vpop.f32.mrf.mxu3 }
 0x7ac   : > { %2103 = vrot.lane.b32.xlu0 %v1961_v21, %s6514_s4 }
 0x7b3   : > { %v1964_v35 = vpop.f32.mrf.mxu3 }
 0x7b4   : > { %2097 = vrot.lane.b32.xlu0 %v1838_v30, %s6474_s2  ;;  %2105 = vrot.lane.b32.xlu1 %v1964_v35, %s6514_s4  ;;  %s6527_s2 = smov 8  }
 0x7ce   : > { %v1578_v10 = vpop.permute.xlu0 %1577 }
 0x7cf   : > { %v1588_v2 = vsel %vm1587_vm12, %v1585_v0, %v1578_v10  ;;  %v2284_v0 = vld [vmem:[%s6426_s12] sm:$0xff] }
 0x7d0   : > { %4401 = vmatmul.msk.f32.vlgmr.msra.gmra.mxu1 %vm790_vm0, %v1588_v2  ;;  %2319 = vmatpush.msra.mxu3 %v2284_v0  ;;  %v2375_v0 = vld [vmem:[%s6428_s14 + $0x30] sm:$0xff] }
 0x7d6   : > { %v1580_v56 = vpop.permute.xlu0 %1579 }
 0x7d7   : > { %v1589_v12 = vsel %vm1587_vm12, %v1586_v9, %v1580_v56 }
 0x7d8   : > { %4402 = vmatmul.msk.f32.gmra.mxu1 %vm790_vm0, %v1589_v12 }
 0x7dc   : > { %v2096_v13 = vpop.permute.xlu2 %2095 }
 0x7dd   : > { %v2117_v54 = vsel %vm1060_vm5, %v1709_v14, %v2096_v13 }
 0x7fb   : > { %v2112_v8 = vpop.permute.xlu2 %2111 }
 0x803   : > { %v2114_v1 = vpop.permute.xlu2 %2113 }
 0x81e   : > { %v2104_v3 = vpop.permute.xlu0 %2103 }
 0x81f   : > { %v2119_v15 = vsel %vm1097_vm6, %v2117_v54, %v2104_v3 }
 0x820   : > { %v2121_v18 = vsel %vm1587_vm12, %v2119_v15, %v2112_v8 }
 0x821   : > { %4403 = vmatmul.msk.f32.gmra.mxu1 %vm790_vm0, %v2121_v18 }
 0x826   : > { %v2098_v19 = vpop.permute.xlu0 %2097  ;;  %v2106_v31 = vpop.permute.xlu1 %2105 }
 0x827   : > { %v2118_v40 = vsel %vm1060_vm5, %v1712_v37, %v2098_v19  ;;  %v4629_v19 = vld [vmem:[%s6424_s10] ss:$0 sm:$0xff] }
 0x828   : > { %v2120_v22 = vsel %vm1097_vm6, %v2118_v40, %v2106_v31 }
 0x829   : > { %v2122_v41 = vsel %vm1587_vm12, %v2120_v22, %v2114_v1  ;;  %v4630_v22 = vld [vmem:[%s6425_s11] ss:$0 sm:$0xff] }
 0x82a   : > { %4404 = vmatmul.msk.f32.gmra.mxu1 %vm790_vm0, %v2122_v41 }
 0x84d   : > { %v2156_v23 = vpop.f32.mrf.mxu1 }
 0x84e   : > { %v2168_v26 = vadd.f32 %v2156_v23, %v5042_v44 }
 0x850   : > { %v5583_v20 = vadd.f32 %v4628_v49, %v2168_v26 }
 0x852   : > { %v2182_v25 = vsel %vm790_vm0, %v5583_v20, 0.0 }
 0x853   : > { %2183 = vadd.xlane.f32.xlu0 %v2182_v25 }
 0x855   : > { %v2159_v29 = vpop.f32.mrf.mxu1 }
 0x856   : > { %v2169_v57 = vadd.f32 %v2159_v29, %v5048_v50 }
 0x858   : > { %v5588_v36 = vadd.f32 %v4628_v49, %v2169_v57 }
 0x85a   : > { %v2185_v32 = vsel %vm790_vm0, %v5588_v36, 0.0 }
 0x85b   : > { %2186 = vadd.xlane.f32.xlu1 %v2185_v32 }
 0x89e   : > { %v2162_v55 = vpop.f32.mrf.mxu1 }
 0x89f   : > { %v2170_v42 = vadd.f32 %v2162_v55, %v5130_v16 }
 0x8a1   : > { %v5593_v38 = vadd.f32 %v4628_v49, %v2170_v42 }
 0x8a3   : > { %v2188_v44 = vsel %vm790_vm0, %v5593_v38, 0.0 }
 0x8a4   : > { %2189 = vadd.xlane.f32.xlu2 %v2188_v44 }
 0x8a7   : > { %v2165_v24 = vpop.f32.mrf.mxu1 }
 0x8a8   : > { %v2171_v46 = vadd.f32 %v2165_v24, %v5133_v17 }
 0x8aa   : > { %v5598_v62 = vadd.f32 %v4628_v49, %v2171_v46 }
 0x8ac   : > { %v2191_v50 = vsel %vm790_vm0, %v5598_v62, 0.0 }
 0x8ad   : > { %2192 = vadd.xlane.f32.xlu0 %v2191_v50 }
 0x8c6   : > { %v2184_v7 = vpop.xlane.xlu0 %2183 }
 0x8c7   : > { %v2194_v4 = vmul.f32 %v2184_v7, %v5022_v11 }
 0x8c9   : > { %v2198_v16 = vsub.f32 %v5583_v20, %v2194_v4 }
 0x8cb   : > { %v2202_v39 = vmul.f32 %v2198_v16, %v2198_v16 }
 0x8cd   : > { %v2206_v28 = vsel %vm790_vm0, %v2202_v39, 0.0 }
 0x8ce   : > { %2207 = vadd.xlane.f32.xlu1 %v2206_v28  ;;  %v2187_v51 = vpop.xlane.xlu1 %2186 }
 0x8cf   : > { %v2195_v45 = vmul.f32 %v2187_v51, %v5022_v11 }
 0x8d1   : > { %v2199_v17 = vsub.f32 %v5588_v36, %v2195_v45 }
 0x8d3   : > { %v2203_v52 = vmul.f32 %v2199_v17, %v2199_v17 }
 0x8d5   : > { %v2209_v53 = vsel %vm790_vm0, %v2203_v52, 0.0 }
 0x8d6   : > { %2210 = vadd.xlane.f32.xlu2 %v2209_v53 }
 0x917   : > { %v2190_v27 = vpop.xlane.xlu2 %2189 }
 0x918   : > { %v2196_v33 = vmul.f32 %v2190_v27, %v5022_v11 }
 0x91a   : > { %v5610_v30 = vsub.f32 %v5593_v38, %v2196_v33 }
 0x91c   : > { %v2204_v14 = vmul.f32 %v5610_v30, %v5610_v30 }
 0x91e   : > { %v2212_v47 = vsel %vm790_vm0, %v2204_v14, 0.0 }
 0x91f   : > { %2213 = vadd.xlane.f32.xlu0 %v2212_v47 }
 0x920   : > { %v2193_v37 = vpop.xlane.xlu0 %2192 }
 0x921   : > { %v2197_v63 = vmul.f32 %v2193_v37, %v5022_v11 }
 0x923   : > { %v5617_v21 = vsub.f32 %v5598_v62, %v2197_v63 }
 0x925   : > { %v2205_v58 = vmul.f32 %v5617_v21, %v5617_v21 }
 0x927   : > { %v2215_v35 = vsel %vm790_vm0, %v2205_v58, 0.0 }
 0x928   : > { %2216 = vadd.xlane.f32.xlu1 %v2215_v35 }
 0x941   : > { %v2208_v10 = vpop.xlane.xlu1 %2207 }
 0x942   : > { %v2218_v2 = vmul.f32 %v2208_v10, %v5022_v11  ;;  %v2374_v10 = vld [vmem:[%s6428_s14 + $0x28] sm:$0xff] }
 0x944   : > { %v2222_v5 = vadd.f32 1e-12, %v2218_v2  ;;  %v2372_v2 = vld [vmem:[%s6428_s14 + $0x18] sm:$0xff] }
 0x946   : > { %4725 = vrsqrt.f32 %v2222_v5  ;;  %vm2232_vm14 = vweird.f32 %v2222_v5 }
 0x949   : > { %v2211_v60 = vpop.xlane.xlu2 %2210 }
 0x94a   : > { %v2219_v6 = vmul.f32 %v2211_v60, %v5022_v11  ;;  %v2370_v60 = vld [vmem:[%s6428_s14 + $0x8] sm:$0xff] }
 0x94c   : > { %v4726_v56 = vpop.eup %4725  ;;  %v2223_v9 = vadd.f32 1e-12, %v2219_v6  ;;  %v2369_v6 = vld [vmem:[%s6428_s14] sm:$0xff] }
 0x94d   : > { %v2227_v12 = vmul.f32 %v4726_v56, %v2222_v5  ;;  %vm2233_vm13 = vweird.f32 %v4726_v56  ;;  %v2371_v5 = vld [vmem:[%s6428_s14 + $0x10] sm:$0xff] }
 0x94e   : > { %4727 = vrsqrt.f32 %v2223_v9  ;;  %vm2234_vm15 = vmor %vm2232_vm14, %vm2233_vm13  ;;  %vm2242_vm2 = vweird.f32 %v2223_v9  ;;  %vm2377_vm13 = vcmask 523264  }
 0x94f   : > { %v2228_v13 = vmul.f32 %v4726_v56, %v2227_v12 }
 0x951   : > { %v2229_v54 = vmul.f32 0.5, %v2228_v13 }
 0x953   : > { %v2230_v8 = vsub.f32 1.5, %v2229_v54 }
 0x954   : > { %v4728_v3 = vpop.eup %4727 }
 0x955   : > { %v2231_v15 = vmul.f32 %v4726_v56, %v2230_v8  ;;  %v2237_v18 = vmul.f32 %v4728_v3, %v2223_v9  ;;  %vm2243_vm1 = vweird.f32 %v4728_v3 }
 0x956   : > { %vm2244_vm3 = vmor %vm2242_vm2, %vm2243_vm1 }
 0x957   : > { %v2235_v31 = vsel %vm2234_vm15, %v4726_v56, %v2231_v15  ;;  %v2238_v40 = vmul.f32 %v4728_v3, %v2237_v18  ;;  %v4631_v56 = vld [vmem:[%s6427_s13] ss:$0 sm:$0xff] }
 0x958   : > { %v2266_v1 = vmul.f32 %v2235_v31, %v2198_v16 }
 0x959   : > { %v2239_v41 = vmul.f32 0.5, %v2238_v40 }
 0x95a   : > { %v2273_v49 = vmul.f32 %v4629_v19, %v2266_v1 }
 0x95b   : > { %v2240_v23 = vsub.f32 1.5, %v2239_v41 }
 0x95c   : > { %v2280_v26 = vadd.f32 %v4630_v22, %v2273_v49 }
 0x95d   : > { %v2241_v25 = vmul.f32 %v4728_v3, %v2240_v23 }
 0x95e   : > { %4405 = vmatmul.msk.f32.vlgmr.msra.gmra.mxu3 %vm790_vm0, %v2280_v26 }
 0x95f   : > { %v2245_v29 = vsel %vm2244_vm3, %v4728_v3, %v2241_v25 }
 0x960   : > { %v2267_v57 = vmul.f32 %v2245_v29, %v2199_v17 }
 0x962   : > { %v2274_v32 = vmul.f32 %v4629_v19, %v2267_v57 }
 0x964   : > { %v2281_v55 = vadd.f32 %v4630_v22, %v2274_v32 }
 0x966   : > { %4406 = vmatmul.msk.f32.gmra.mxu3 %vm790_vm0, %v2281_v55 }
 0x992   : > { %v2214_v42 = vpop.xlane.xlu0 %2213 }
 0x993   : > { %v2220_v44 = vmul.f32 %v2214_v42, %v5022_v11 }
 0x995   : > { %v2224_v24 = vadd.f32 1e-12, %v2220_v44 }
 0x997   : > { %4729 = vrsqrt.f32 %v2224_v24  ;;  %vm2252_vm7 = vweird.f32 %v2224_v24 }
 0x99b   : > { %v2217_v46 = vpop.xlane.xlu1 %2216 }
 0x99c   : > { %v2221_v50 = vmul.f32 %v2217_v46, %v5022_v11 }
 0x99d   : > { %v4730_v7 = vpop.eup %4729 }
 0x99e   : > { %v2247_v4 = vmul.f32 %v4730_v7, %v2224_v24  ;;  %v2225_v16 = vadd.f32 1e-12, %v2221_v50  ;;  %vm2253_vm4 = vweird.f32 %v4730_v7 }
 0x99f   : > { %vm2254_vm8 = vmor %vm2252_vm7, %vm2253_vm4 }
 0x9a0   : > { %v2248_v39 = vmul.f32 %v4730_v7, %v2247_v4  ;;  %4731 = vrsqrt.f32 %v2225_v16  ;;  %vm2262_vm10 = vweird.f32 %v2225_v16 }
 0x9a2   : > { %v2249_v28 = vmul.f32 0.5, %v2248_v39 }
 0x9a4   : > { %v2250_v51 = vsub.f32 1.5, %v2249_v28 }
 0x9a6   : > { %v4732_v45 = vpop.eup %4731  ;;  %v2251_v17 = vmul.f32 %v4730_v7, %v2250_v51 }
 0x9a7   : > { %v2257_v52 = vmul.f32 %v4732_v45, %v2225_v16  ;;  %vm2263_vm9 = vweird.f32 %v4732_v45 }
 0x9a8   : > { %v2255_v53 = vsel %vm2254_vm8, %v4730_v7, %v2251_v17  ;;  %vm2264_vm11 = vmor %vm2262_vm10, %vm2263_vm9 }
 0x9a9   : > { %v2258_v27 = vmul.f32 %v4732_v45, %v2257_v52  ;;  %v2268_v33 = vmul.f32 %v2255_v53, %v5610_v30  ;;  %v2376_v30 = vld [vmem:[%s6428_s14 + $0x38] sm:$0xff] }
 0x9aa   : > { %2398 = vmatpush.msra.mxu2 %v2376_v30 }
 0x9ab   : > { %v2259_v14 = vmul.f32 0.5, %v2258_v27  ;;  %v2275_v47 = vmul.f32 %v4629_v19, %v2268_v33 }
 0x9ac   : > { %2399 = vmatpush.msra.mxu2 %v2375_v0 }
 0x9ad   : > { %v2260_v37 = vsub.f32 1.5, %v2259_v14  ;;  %v2282_v63 = vadd.f32 %v4630_v22, %v2275_v47 }
 0x9ae   : > { %2400 = vmatpush.msra.mxu2 %v2374_v10 }
 0x9af   : > { %v2261_v58 = vmul.f32 %v4732_v45, %v2260_v37  ;;  %4407 = vmatmul.msk.f32.gmra.mxu3 %vm790_vm0, %v2282_v63 }
 0x9b1   : > { %v2265_v35 = vsel %vm2264_vm11, %v4732_v45, %v2261_v58 }
 0x9b2   : > { %v2269_v59 = vmul.f32 %v2265_v35, %v5617_v21  ;;  %v2373_v21 = vld [vmem:[%s6428_s14 + $0x20] sm:$0xff] }
 0x9b3   : > { %2401 = vmatpush.msra.mxu2 %v2373_v21  ;;  %v4632_v35 = vld [vmem:[%s6429_s15] ss:$0 sm:$0xff] }
 0x9b4   : > { %v2276_v48 = vmul.f32 %v4629_v19, %v2269_v59 }
 0x9b5   : > { %2402 = vmatpush.msra.mxu2 %v2372_v2 }
 0x9b6   : > { %v2283_v61 = vadd.f32 %v4630_v22, %v2276_v48 }
 0x9b7   : > { %2403 = vmatpush.msra.mxu2 %v2371_v5 }
 0x9b8   : > { %4408 = vmatmul.msk.f32.gmra.mxu3 %vm790_vm0, %v2283_v61 }
 0x9b9   : > { %2404 = vmatpush.msra.mxu2 %v2370_v60 }
 0x9bb   : > { %2405 = vmatpush.msra.mxu2 %v2369_v6 }
 0x9e1   : > { %v2321_v9 = vpop.f32.mrf.mxu3 }
 0x9e2   : > { %v2322_v12 = vadd.f32 %v4631_v56, %v2321_v9 }
 0x9e4   : > { %v2333_v13 = vmul.f32 %v2322_v12, %v2322_v12 }
 0x9e6   : > { %v2337_v54 = vmul.f32 %v2333_v13, %v2322_v12 }
 0x9e8   : > { %v2341_v8 = vmul.f32 0.044715, %v2337_v54 }
 0x9e9   : > { %v2324_v3 = vpop.f32.mrf.mxu3 }
 0x9ea   : > { %v2345_v15 = vadd.f32 %v2341_v8, %v2322_v12  ;;  %v2325_v18 = vadd.f32 %v4631_v56, %v2324_v3 }
 0x9ec   : > { %v2349_v19 = vmul.f32 0.7978846, %v2345_v15  ;;  %v2334_v31 = vmul.f32 %v2325_v18, %v2325_v18 }
 0x9ee   : > { %4733 = vtanh.f32 %v2349_v19  ;;  %v2338_v40 = vmul.f32 %v2334_v31, %v2325_v18 }
 0x9f0   : > { %v2342_v1 = vmul.f32 0.044715, %v2338_v40 }
 0x9f2   : > { %v2346_v22 = vadd.f32 %v2342_v1, %v2325_v18 }
 0x9f4   : > { %v4734_v41 = vpop.eup %4733  ;;  %v2350_v49 = vmul.f32 0.7978846, %v2346_v22 }
 0x9f5   : > { %v2357_v23 = vadd.f32 1.0, %v4734_v41 }
 0x9f6   : > { %4735 = vtanh.f32 %v2350_v49 }
 0x9f7   : > { %v2361_v26 = vmul.f32 0.5, %v2357_v23 }
 0x9f9   : > { %v2365_v25 = vmul.f32 %v2361_v26, %v2322_v12 }
 0x9fb   : > { %4409 = vmatmul.msk.f32.vlgmr.msra.gmra.mxu2 %vm2377_vm13, %v2365_v25 }
 0x9fc   : > { %v4736_v29 = vpop.eup %4735 }
 0x9fd   : > { %v2358_v57 = vadd.f32 1.0, %v4736_v29 }
 0x9ff   : > { %v2362_v32 = vmul.f32 0.5, %v2358_v57 }
 0xa01   : > { %v2366_v55 = vmul.f32 %v2362_v32, %v2325_v18  ;;  %v4418_v32 = vld [vmem:[%s6500_s7 + $0x38] sm:$0xff] }
 0xa02   : > { %2571 = vmatpush.msrb.mxu0 %v4418_v32 }
 0xa03   : > { %4410 = vmatmul.msk.f32.gmra.mxu2 %vm2377_vm13, %v2366_v55  ;;  %v4417_v55 = vld [vmem:[%s6500_s7 + $0x30] sm:$0xff] }
 0xa04   : > { %2572 = vmatpush.msrb.mxu0 %v4417_v55 }
 0xa32   : > { %v2327_v42 = vpop.f32.mrf.mxu3 }
 0xa33   : > { %v2328_v44 = vadd.f32 %v4631_v56, %v2327_v42  ;;  %v4416_v42 = vld [vmem:[%s6500_s7 + $0x28] sm:$0xff] }
 0xa34   : > { %2573 = vmatpush.msrb.mxu0 %v4416_v42 }
 0xa35   : > { %v2335_v24 = vmul.f32 %v2328_v44, %v2328_v44 }
 0xa37   : > { %v2339_v46 = vmul.f32 %v2335_v24, %v2328_v44 }
 0xa39   : > { %v2343_v50 = vmul.f32 0.044715, %v2339_v46 }
 0xa3b   : > { %v2347_v7 = vadd.f32 %v2343_v50, %v2328_v44  ;;  %v2330_v4 = vpop.f32.mrf.mxu3 }
 0xa3c   : > { %v2331_v16 = vadd.f32 %v4631_v56, %v2330_v4 }
 0xa3d   : > { %v2351_v39 = vmul.f32 0.7978846, %v2347_v7 }
 0xa3e   : > { %v2336_v28 = vmul.f32 %v2331_v16, %v2331_v16 }
 0xa3f   : > { %4737 = vtanh.f32 %v2351_v39 }
 0xa40   : > { %v2340_v51 = vmul.f32 %v2336_v28, %v2331_v16 }
 0xa42   : > { %v2344_v45 = vmul.f32 0.044715, %v2340_v51 }
 0xa44   : > { %v2348_v17 = vadd.f32 %v2344_v45, %v2331_v16 }
 0xa45   : > { %v4738_v52 = vpop.eup %4737 }
 0xa46   : > { %v2359_v53 = vadd.f32 1.0, %v4738_v52  ;;  %v2352_v27 = vmul.f32 0.7978846, %v2348_v17 }
 0xa48   : > { %v2363_v33 = vmul.f32 0.5, %v2359_v53  ;;  %4739 = vtanh.f32 %v2352_v27 }
 0xa4a   : > { %v2367_v14 = vmul.f32 %v2363_v33, %v2328_v44  ;;  %v4415_v44 = vld [vmem:[%s6500_s7 + $0x20] sm:$0xff] }
 0xa4b   : > { %2574 = vmatpush.msrb.mxu0 %v4415_v44  ;;  %v4633_v33 = vld [vmem:[%s6501_s9 + $0x1] ss:$0 sm:$0xff] }
 0xa4c   : > { %4411 = vmatmul.msk.f32.gmra.mxu2 %vm2377_vm13, %v2367_v14 }
 0xa4e   : > { %v4740_v47 = vpop.eup %4739 }
 0xa4f   : > { %v2360_v37 = vadd.f32 1.0, %v4740_v47 }
 0xa51   : > { %v2364_v63 = vmul.f32 0.5, %v2360_v37 }
 0xa53   : > { %v2368_v58 = vmul.f32 %v2364_v63, %v2331_v16  ;;  %v4634_v63 = vld [vmem:[%s6502_s29 + $0x1] ss:$0 sm:$0xff] }
 0xa55   : > { %4412 = vmatmul.msk.f32.gmra.mxu2 %vm2377_vm13, %v2368_v58 }
 0xa7e   : > { %v2407_v59 = vpop.f32.mrf.mxu2 }
 0xa7f   : > { %v2419_v48 = vadd.f32 %v2407_v59, %v5583_v20 }
 0xa81   : > { %v5685_v61 = vadd.f32 %v4632_v35, %v2419_v48 }
 0xa83   : > { %v2435_v30 = vsel %vm790_vm0, %v5685_v61, 0.0 }
 0xa84   : > { %2436 = vadd.xlane.f32.xlu2 %v2435_v30 }
 0xa86   : > { %v2410_v0 = vpop.f32.mrf.mxu2 }
 0xa87   : > { %v2420_v10 = vadd.f32 %v2410_v0, %v5588_v36 }
 0xa89   : > { %v5690_v21 = vadd.f32 %v4632_v35, %v2420_v10 }
 0xa8b   : > { %v2438_v2 = vsel %vm790_vm0, %v5690_v21, 0.0 }
 0xa8c   : > { %2439 = vadd.xlane.f32.xlu0 %v2438_v2 }
 0xacf   : > { %v2413_v5 = vpop.f32.mrf.mxu2 }
 0xad0   : > { %v2421_v60 = vadd.f32 %v2413_v5, %v5593_v38 }
 0xad2   : > { %v5695_v6 = vadd.f32 %v4632_v35, %v2421_v60 }
 0xad4   : > { %v2441_v20 = vsel %vm790_vm0, %v5695_v6, 0.0 }
 0xad5   : > { %2442 = vadd.xlane.f32.xlu1 %v2441_v20 }
 0xad8   : > { %v2416_v56 = vpop.f32.mrf.mxu2 }
 0xad9   : > { %v2422_v9 = vadd.f32 %v2416_v56, %v5598_v62 }
 0xadb   : > { %v5700_v12 = vadd.f32 %v4632_v35, %v2422_v9 }
 0xadd   : > { %v2444_v36 = vsel %vm790_vm0, %v5700_v12, 0.0 }
 0xade   : > { %2445 = vadd.xlane.f32.xlu2 %v2444_v36 }
 0xaf7   : > { %v2437_v13 = vpop.xlane.xlu2 %2436 }
 0xaf8   : > { %v2447_v54 = vmul.f32 %v2437_v13, %v5022_v11 }
 0xafa   : > { %v2451_v38 = vsub.f32 %v5685_v61, %v2447_v54 }
 0xafc   : > { %v2455_v8 = vmul.f32 %v2451_v38, %v2451_v38 }
 0xafe   : > { %v2459_v3 = vsel %vm790_vm0, %v2455_v8, 0.0 }
 0xaff   : > { %2460 = vadd.xlane.f32.xlu0 %v2459_v3  ;;  %v2440_v15 = vpop.xlane.xlu0 %2439 }
 0xb00   : > { %v2448_v18 = vmul.f32 %v2440_v15, %v5022_v11 }
 0xb02   : > { %v2452_v62 = vsub.f32 %v5690_v21, %v2448_v18 }
 0xb04   : > { %v2456_v19 = vmul.f32 %v2452_v62, %v2452_v62 }
 0xb06   : > { %v2462_v31 = vsel %vm790_vm0, %v2456_v19, 0.0 }
 0xb07   : > { %2463 = vadd.xlane.f32.xlu1 %v2462_v31 }
 0xb48   : > { %v2443_v40 = vpop.xlane.xlu1 %2442 }
 0xb49   : > { %v2449_v1 = vmul.f32 %v2443_v40, %v5022_v11 }
 0xb4b   : > { %v5712_v22 = vsub.f32 %v5695_v6, %v2449_v1 }
 0xb4d   : > { %v2457_v41 = vmul.f32 %v5712_v22, %v5712_v22 }
 0xb4f   : > { %v2465_v49 = vsel %vm790_vm0, %v2457_v41, 0.0 }
 0xb50   : > { %2466 = vadd.xlane.f32.xlu2 %v2465_v49 }
 0xb51   : > { %v2446_v23 = vpop.xlane.xlu2 %2445 }
 0xb52   : > { %v2450_v26 = vmul.f32 %v2446_v23, %v5022_v11 }
 0xb54   : > { %v5719_v25 = vsub.f32 %v5700_v12, %v2450_v26 }
 0xb56   : > { %v2458_v29 = vmul.f32 %v5719_v25, %v5719_v25 }
 0xb58   : > { %v2468_v57 = vsel %vm790_vm0, %v2458_v29, 0.0 }
 0xb59   : > { %2469 = vadd.xlane.f32.xlu0 %v2468_v57 }
 0xb72   : > { %v2461_v24 = vpop.xlane.xlu0 %2460 }
 0xb73   : > { %v2471_v46 = vmul.f32 %v2461_v24, %v5022_v11 }
 0xb75   : > { %v2475_v50 = vadd.f32 1e-12, %v2471_v46 }
 0xb77   : > { %4741 = vrsqrt.f32 %v2475_v50  ;;  %vm2485_vm15 = vweird.f32 %v2475_v50 }
 0xb7a   : > { %v2464_v7 = vpop.xlane.xlu1 %2463 }
 0xb7b   : > { %v2472_v4 = vmul.f32 %v2464_v7, %v5022_v11 }
 0xb7d   : > { %v4742_v16 = vpop.eup %4741  ;;  %v2476_v39 = vadd.f32 1e-12, %v2472_v4 }
 0xb7e   : > { %v2480_v28 = vmul.f32 %v4742_v16, %v2475_v50  ;;  %vm2486_vm14 = vweird.f32 %v4742_v16 }
 0xb7f   : > { %4743 = vrsqrt.f32 %v2476_v39  ;;  %vm2487_vm1 = vmor %vm2485_vm15, %vm2486_vm14  ;;  %vm2495_vm3 = vweird.f32 %v2476_v39 }
 0xb80   : > { %v2481_v51 = vmul.f32 %v4742_v16, %v2480_v28 }
 0xb82   : > { %v2482_v45 = vmul.f32 0.5, %v2481_v51 }
 0xb84   : > { %v2483_v17 = vsub.f32 1.5, %v2482_v45 }
 0xb85   : > { %v4744_v52 = vpop.eup %4743 }
 0xb86   : > { %v2484_v53 = vmul.f32 %v4742_v16, %v2483_v17  ;;  %v2490_v27 = vmul.f32 %v4744_v52, %v2476_v39  ;;  %vm2496_vm2 = vweird.f32 %v4744_v52 }
 0xb87   : > { %vm2497_vm4 = vmor %vm2495_vm3, %vm2496_vm2 }
 0xb88   : > { %v2488_v14 = vsel %vm2487_vm1, %v4742_v16, %v2484_v53  ;;  %v2491_v47 = vmul.f32 %v4744_v52, %v2490_v27 }
 0xb89   : > { %v2519_v37 = vmul.f32 %v2488_v14, %v2451_v38 }
 0xb8a   : > { %v2492_v58 = vmul.f32 0.5, %v2491_v47 }
 0xb8b   : > { %v2526_v35 = vmul.f32 %v4633_v33, %v2519_v37 }
 0xb8c   : > { %v2493_v59 = vsub.f32 1.5, %v2492_v58 }
 0xb8d   : > { %v2533_v48 = vadd.f32 %v4634_v63, %v2526_v35 }
 0xb8e   : > { %v2494_v30 = vmul.f32 %v4744_v52, %v2493_v59 }
 0xb8f   : > { %4420 = vmatmul.msk.f32.vlgmr.msrb.gmra.mxu0 %vm790_vm0, %v2533_v48 }
 0xb90   : > { %v2498_v0 = vsel %vm2497_vm4, %v4744_v52, %v2494_v30 }
 0xb91   : > { %v2520_v10 = vmul.f32 %v2498_v0, %v2452_v62 }
 0xb93   : > { %v2527_v2 = vmul.f32 %v4633_v33, %v2520_v10 }
 0xb95   : > { %v2534_v5 = vadd.f32 %v4634_v63, %v2527_v2 }
 0xb97   : > { %4421 = vmatmul.msk.f32.gmra.mxu0 %vm790_vm0, %v2534_v5 }
 0xbc3   : > { %v2467_v60 = vpop.xlane.xlu2 %2466 }
 0xbc4   : > { %v2473_v20 = vmul.f32 %v2467_v60, %v5022_v11 }
 0xbc6   : > { %v2477_v56 = vadd.f32 1e-12, %v2473_v20 }
 0xbc8   : > { %4745 = vrsqrt.f32 %v2477_v56  ;;  %vm2505_vm8 = vweird.f32 %v2477_v56 }
 0xbcc   : > { %v2470_v9 = vpop.xlane.xlu0 %2469 }
 0xbcd   : > { %v2474_v36 = vmul.f32 %v2470_v9, %v5022_v11 }
 0xbce   : > { %v4746_v13 = vpop.eup %4745 }
 0xbcf   : > { %v2500_v54 = vmul.f32 %v4746_v13, %v2477_v56  ;;  %v2478_v38 = vadd.f32 1e-12, %v2474_v36  ;;  %vm2506_vm7 = vweird.f32 %v4746_v13 }
 0xbd0   : > { %vm2507_vm9 = vmor %vm2505_vm8, %vm2506_vm7 }
 0xbd1   : > { %v2501_v8 = vmul.f32 %v4746_v13, %v2500_v54  ;;  %4747 = vrsqrt.f32 %v2478_v38  ;;  %vm2515_vm11 = vweird.f32 %v2478_v38 }
 0xbd3   : > { %v2502_v3 = vmul.f32 0.5, %v2501_v8 }
 0xbd5   : > { %v2503_v15 = vsub.f32 1.5, %v2502_v3 }
 0xbd7   : > { %v4748_v18 = vpop.eup %4747  ;;  %v2504_v62 = vmul.f32 %v4746_v13, %v2503_v15 }
 0xbd8   : > { %v2510_v19 = vmul.f32 %v4748_v18, %v2478_v38  ;;  %vm2516_vm10 = vweird.f32 %v4748_v18 }
 0xbd9   : > { %v2508_v31 = vsel %vm2507_vm9, %v4746_v13, %v2504_v62  ;;  %vm2517_vm14 = vmor %vm2515_vm11, %vm2516_vm10 }
 0xbda   : > { %v2511_v40 = vmul.f32 %v4748_v18, %v2510_v19  ;;  %v2521_v1 = vmul.f32 %v2508_v31, %v5712_v22  ;;  %v4635_v22 = vld [vmem:[%s6503_s3 + $0x1] ss:$0 sm:$0xff] }
 0xbdc   : > { %v2512_v41 = vmul.f32 0.5, %v2511_v40  ;;  %v2528_v49 = vmul.f32 %v4633_v33, %v2521_v1 }
 0xbde   : > { %v2513_v23 = vsub.f32 1.5, %v2512_v41  ;;  %v2535_v26 = vadd.f32 %v4634_v63, %v2528_v49 }
 0xbe0   : > { %v2514_v29 = vmul.f32 %v4748_v18, %v2513_v23  ;;  %4422 = vmatmul.msk.f32.gmra.mxu0 %vm790_vm0, %v2535_v26 }
 0xbe2   : > { %v2518_v57 = vsel %vm2517_vm14, %v4748_v18, %v2514_v29 }
 0xbe3   : > { %v2522_v32 = vmul.f32 %v2518_v57, %v5719_v25 }
 0xbe5   : > { %v2529_v55 = vmul.f32 %v4633_v33, %v2522_v32 }
 0xbe7   : > { %v2536_v42 = vadd.f32 %v4634_v63, %v2529_v55 }
 0xbe9   : > { %4423 = vmatmul.msk.f32.gmra.mxu0 %vm790_vm0, %v2536_v42 }
 0xc0c   : > { %v2576_v44 = vpop.f32.mrf.mxu0 }
 0xc0d   : > { %v2577_v24 = vadd.f32 %v4635_v22, %v2576_v44 }
 0xc0f   : > { %2712 = vrot.lane.b32.xlu1 %v2577_v24, %s6510_s5  ;;  %2590 = vrot.lane.b32.xlu0 %v2577_v24, %s6507_s26 }
 0xc10   : > { %2716 = vrot.lane.b32.xlu2 %v2577_v24, %s6509_s28 }
 0xc14   : > { %v2579_v46 = vpop.f32.mrf.mxu0 }
 0xc15   : > { %v2580_v50 = vadd.f32 %v4635_v22, %v2579_v46 }
 0xc17   : > { %2842 = vrot.lane.b32.xlu0 %v2577_v24, %s6516_s18  ;;  %2592 = vrot.lane.b32.xlu1 %v2580_v50, %s6507_s26  ;;  %v4583_v51 = vpack.i.bf16 %v2577_v24, %v2580_v50 }
 0xc18   : > { %2718 = vrot.lane.b32.xlu2 %v2580_v50, %s6509_s28 }
 0xc1f   : > { %2714 = vrot.lane.b32.xlu0 %v2580_v50, %s6510_s5  ;;  %2838 = vrot.lane.b32.xlu1 %v2577_v24, %s6517_s19 }
 0xc20   : > { %2968 = vrot.lane.b32.xlu2 %v2577_v24, %s6508_s1 }
 0xc27   : > { %2964 = vrot.lane.b32.xlu0 %v2577_v24, %s6518_s0  ;;  %2970 = vrot.lane.b32.xlu1 %v2580_v50, %s6508_s1 }
 0xc28   : > { %2844 = vrot.lane.b32.xlu2 %v2580_v50, %s6516_s18 }
 0xc2f   : > { %2966 = vrot.lane.b32.xlu1 %v2580_v50, %s6518_s0 }
 0xc30   : > { %2840 = vrot.lane.b32.xlu2 %v2580_v50, %s6517_s19 }
 0xc5d   : > { %v2582_v25 = vpop.f32.mrf.mxu0 }
 0xc5e   : > { %v5769_v7 = vadd.f32 %v4635_v22, %v2582_v25 }
 0xc60   : > { %3122 = vrot.lane.b32.xlu1 %v5769_v7, %s6507_s26 }
 0xc66   : > { %v2585_v4 = vpop.f32.mrf.mxu0 }
 0xc67   : > { %v5773_v16 = vadd.f32 %v4635_v22, %v2585_v4 }
 0xc68   : > { %3374 = vrot.lane.b32.xlu1 %v5769_v7, %s6516_s18 }
 0xc69   : > { %3124 = vrot.lane.b32.xlu0 %v5773_v16, %s6507_s26  ;;  %3250 = vrot.lane.b32.xlu2 %v5773_v16, %s6509_s28  ;;  %s6519_s26 = smov 64  }
 0xc6a   : > { %v2717_v39 = vpop.permute.xlu2 %2716 }
 0xc70   : > { %3246 = vrot.lane.b32.xlu1 %v5773_v16, %s6510_s5 }
 0xc71   : > { %3248 = vrot.lane.b32.xlu0 %v5769_v7, %s6509_s28  ;;  %3244 = vrot.lane.b32.xlu2 %v5769_v7, %s6510_s5  ;;  %s6520_s28 = smov 48   ;;  %s6522_s5 = smov 56  }
 0xc72   : > { %v2719_v28 = vpop.permute.xlu2 %2718 }
 0xc73   : > { %4430 = vmatpush.xpose.msk.msrb.mxu2 %vm1060_vm5, %v2719_v28 }
 0xc77   : > { %4431 = vmatpush.xpose.msk.msrb.mxu2 %vm1060_vm5, %v2717_v39 }
 0xc78   : > { %3496 = vrot.lane.b32.xlu1 %v5769_v7, %s6518_s0 }
 0xc79   : > { %3376 = vrot.lane.b32.xlu0 %v5773_v16, %s6516_s18  ;;  %3502 = vrot.lane.b32.xlu2 %v5773_v16, %s6508_s1 }
 0xc7a   : > { %v2969_v52 = vpop.permute.xlu2 %2968 }
 0xc80   : > { %4584 = vrot.lane.b32.xlu1 %v4583_v51, %s6519_s26 }
 0xc81   : > { %v2591_v45 = vpop.permute.xlu0 %2590  ;;  %v2713_v17 = vpop.permute.xlu1 %2712  ;;  %3500 = vrot.lane.b32.xlu0 %v5769_v7, %s6508_s1  ;;  %3370 = vrot.lane.b32.xlu2 %v5769_v7, %s6517_s19  ;;  %s6521_s1 = smov 40  }
 0xc82   : > { %4432 = vmatmul.msk.f32.vlgmr.msrb.gmra.mxu2 %vm1060_vm5, %v2713_v17  ;;  %v2845_v33 = vpop.permute.xlu2 %2844 }
 0xc88   : > { %4594 = vrot.lane.b32.xlu1 %v4583_v51, %s6520_s28 }
 0xc89   : > { %v2843_v53 = vpop.permute.xlu0 %2842  ;;  %v2593_v27 = vpop.permute.xlu1 %2592  ;;  %3372 = vrot.lane.b32.xlu0 %v5773_v16, %s6517_s19  ;;  %3498 = vrot.lane.b32.xlu2 %v5773_v16, %s6518_s0  ;;  %s6533_s0 = sld [smem:[#allocation15_spill]] (!%p4505_p5) }
 0xc8a   : > { %4424 = vmatpush.xpose.msk.msrb.mxu1 %vm1060_vm5, %v2593_v27  ;;  %v2841_v58 = vpop.permute.xlu2 %2840 }
 0xc8e   : > { %4425 = vmatpush.xpose.msk.msrb.mxu1 %vm1060_vm5, %v2591_v45 }
 0xc91   : > { %v2715_v14 = vpop.permute.xlu0 %2714  ;;  %4426 = vmatmul.msk.f32.vlgmr.msrb.gmra.mxu1 %vm1060_vm5, %v2577_v24  ;;  %v2839_v47 = vpop.permute.xlu1 %2838  ;;  %4599 = vrot.lane.b32.xlu0 %v4583_v51, %s6521_s1 }
 0xc92   : > { %4436 = vmatpush.xpose.msk.msra.mxu1 %vm1060_vm5, %v2845_v33  ;;  %4589 = vrot.lane.b32.xlu2 %v4583_v51, %s6522_s5 }
 0xc93   : > { %4433 = vmatmul.msk.f32.gmra.mxu2 %vm1060_vm5, %v2715_v14 }
 0xc96   : > { %4437 = vmatpush.xpose.msk.msra.mxu1 %vm1060_vm5, %v2843_v53 }
 0xc99   : > { %4427 = vmatmul.msk.f32.gmra.mxu1 %vm1060_vm5, %v2580_v50  ;;  %v2971_v37 = vpop.permute.xlu1 %2970  ;;  %v2965_v63 = vpop.permute.xlu0 %2964 }
 0xc9a   : > { %4442 = vmatpush.xpose.msk.msra.mxu2 %vm1060_vm5, %v2971_v37 }
 0xc9e   : > { %4443 = vmatpush.xpose.msk.msra.mxu2 %vm1060_vm5, %v2969_v52 }
 0xca1   : > { %4438 = vmatmul.msk.f32.vlgmr.msra.gmra.mxu1 %vm1060_vm5, %v2839_v47  ;;  %4444 = vmatmul.msk.f32.vlgmr.msra.gmra.mxu2 %vm1060_vm5, %v2965_v63  ;;  %v2967_v35 = vpop.permute.xlu1 %2966 }
 0xca9   : > { %4439 = vmatmul.msk.f32.gmra.mxu1 %vm1060_vm5, %v2841_v58  ;;  %4445 = vmatmul.msk.f32.gmra.mxu2 %vm1060_vm5, %v2967_v35 }
 0xcc3   : > { %v3251_v59 = vpop.permute.xlu2 %3250 }
 0xcc4   : > { %4454 = vmatpush.xpose.msk.msrb.mxu2 %vm1060_vm5, %v3251_v59 }
 0xccb   : > { %v3245_v48 = vpop.permute.xlu2 %3244 }
 0xcd2   : > { %v3123_v30 = vpop.permute.xlu1 %3122 }
 0xcd3   : > { %v3503_v0 = vpop.permute.xlu2 %3502 }
 0xcda   : > { %v3375_v10 = vpop.permute.xlu1 %3374 }
 0xcdb   : > { %v3125_v2 = vpop.permute.xlu0 %3124  ;;  %v3371_v5 = vpop.permute.xlu2 %3370 }
 0xcdc   : > { %4448 = vmatpush.xpose.msk.msrb.mxu1 %vm1060_vm5, %v3125_v2 }
 0xce0   : > { %4449 = vmatpush.xpose.msk.msrb.mxu1 %vm1060_vm5, %v3123_v30 }
 0xce2   : > { %v3247_v60 = vpop.permute.xlu1 %3246 }
 0xce3   : > { %v3249_v20 = vpop.permute.xlu0 %3248  ;;  %v3499_v56 = vpop.permute.xlu2 %3498  ;;  %4450 = vmatmul.msk.f32.vlgmr.msrb.gmra.mxu1 %vm1060_vm5, %v5769_v7 }
 0xce4   : > { %4455 = vmatpush.xpose.msk.msrb.mxu2 %vm1060_vm5, %v3249_v20 }
 0xce7   : > { %4456 = vmatmul.msk.f32.vlgmr.msrb.gmra.mxu2 %vm1060_vm5, %v3245_v48 }
 0xce8   : > { %4466 = vmatpush.xpose.msk.msra.mxu2 %vm1060_vm5, %v3503_v0 }
 0xcea   : > { %v3497_v9 = vpop.permute.xlu1 %3496 }
 0xceb   : > { %v3377_v36 = vpop.permute.xlu0 %3376  ;;  %4451 = vmatmul.msk.f32.gmra.mxu1 %vm1060_vm5, %v5773_v16 }
 0xcec   : > { %v4590_v13 = vpop.permute.xlu2 %4589  ;;  %4460 = vmatpush.xpose.msk.msra.mxu1 %vm1060_vm5, %v3377_v36 }
 0xced   : > { %v4591_v54 = vunpack.i.l.bf16 %v4590_v13  ;;  %v4592_v38 = vunpack.i.h.bf16 %v4590_v13 }
 0xcef   : > { %2829 = vmatpush.msra.mxu0 %v4591_v54  ;;  %4457 = vmatmul.msk.f32.gmra.mxu2 %vm1060_vm5, %v3247_v60 }
 0xcf0   : > { %4461 = vmatpush.xpose.msk.msra.mxu1 %vm1060_vm5, %v3375_v10 }
 0xcf1   : > { %2830 = vmatpush.msra.mxu0 %v4592_v38 }
 0xcf2   : > { %v4585_v8 = vpop.permute.xlu1 %4584 }
 0xcf3   : > { %v4586_v3 = vunpack.i.l.bf16 %v4585_v8  ;;  %v3501_v15 = vpop.permute.xlu0 %3500  ;;  %4462 = vmatmul.msk.f32.vlgmr.msra.gmra.mxu1 %vm1060_vm5, %v3371_v5  ;;  %v4587_v18 = vunpack.i.h.bf16 %v4585_v8 }
 0xcf4   : > { %4467 = vmatpush.xpose.msk.msra.mxu2 %vm1060_vm5, %v3501_v15 }
 0xcf5   : > { %2703 = vmatpush.msrb.mxu3 %v4586_v3 }
 0xcf7   : > { %2704 = vmatpush.msrb.mxu3 %v4587_v18  ;;  %4468 = vmatmul.msk.f32.vlgmr.msra.gmra.mxu2 %vm1060_vm5, %v3497_v9 }
 0xcfa   : > { %v4595_v62 = vpop.permute.xlu1 %4594 }
 0xcfb   : > { %v4596_v19 = vunpack.i.l.bf16 %v4595_v62  ;;  %v3373_v31 = vpop.permute.xlu0 %3372  ;;  %v4597_v40 = vunpack.i.h.bf16 %v4595_v62 }
 0xcfc   : > { %4463 = vmatmul.msk.f32.gmra.mxu1 %vm1060_vm5, %v3373_v31 }
 0xcfd   : > { %2955 = vmatpush.msra.mxu3 %v4596_v19 }
 0xcff   : > { %2956 = vmatpush.msra.mxu3 %v4597_v40  ;;  %4469 = vmatmul.msk.f32.gmra.mxu2 %vm1060_vm5, %v3499_v56 }
 0xd03   : > { %v4600_v1 = vpop.permute.xlu0 %4599 }
 0xd04   : > { %v4601_v41 = vunpack.i.l.bf16 %v4600_v1  ;;  %v4602_v23 = vunpack.i.h.bf16 %v4600_v1 }
 0xd05   : > { %v2745_v49 = vpop.f32.mrf.mxu2 }
 0xd06   : > { %v2751_v26 = vmul.f32 0.35355338, %v2745_v49  ;;  %3081 = vmatpush.msrb.mxu0 %v4601_v41 }
 0xd08   : > { %v5840_v29 = vadd.f32 %v2751_v26, %v5177_v34  ;;  %3082 = vmatpush.msrb.mxu0 %v4602_v23 }
 0xd0a   : > { %v2755_v57 = vsel %vm1097_vm6, %v5840_v29, -inf }
 0xd0b   : > { %2756 = vmax.xlane.f32.xlu0 %v2755_v57 }
 0xd0e   : > { %v2619_v32 = vpop.f32.mrf.mxu1 }
 0xd0f   : > { %v2625_v55 = vmul.f32 0.35355338, %v2619_v32 }
 0xd11   : > { %v5845_v42 = vadd.f32 %v2625_v55, %v5177_v34 }
 0xd13   : > { %v2629_v22 = vsel %vm1097_vm6, %v5845_v42, -inf }
 0xd14   : > { %2630 = vmax.xlane.f32.xlu1 %v2629_v22 }
 0xd16   : > { %v2748_v44 = vpop.f32.mrf.mxu2  ;;  %v2622_v46 = vpop.f32.mrf.mxu1 }
 0xd17   : > { %v2752_v24 = vmul.f32 0.35355338, %v2748_v44  ;;  %v2626_v50 = vmul.f32 0.35355338, %v2622_v46 }
 0xd19   : > { %v5850_v25 = vadd.f32 %v2752_v24, %v5177_v34  ;;  %v5853_v4 = vadd.f32 %v2626_v50, %v5177_v34 }
 0xd1b   : > { %v2758_v39 = vsel %vm1097_vm6, %v5850_v25, -inf  ;;  %v2632_v28 = vsel %vm1097_vm6, %v5853_v4, -inf }
 0xd1c   : > { %2759 = vmax.xlane.f32.xlu1 %v2758_v39  ;;  %2633 = vmax.xlane.f32.xlu2 %v2632_v28 }
 0xd1e   : > { %v2871_v51 = vpop.f32.mrf.mxu1 }
 0xd1f   : > { %v2877_v45 = vmul.f32 0.35355338, %v2871_v51 }
 0xd21   : > { %v5860_v17 = vadd.f32 %v2877_v45, %v5177_v34 }
 0xd23   : > { %v2881_v52 = vsel %vm1097_vm6, %v5860_v17, -inf }
 0xd24   : > { %2882 = vmax.xlane.f32.xlu0 %v2881_v52  ;;  %v2997_v53 = vpop.f32.mrf.mxu2 }
 0xd25   : > { %v3003_v27 = vmul.f32 0.35355338, %v2997_v53 }
 0xd26   : > { %v2874_v33 = vpop.f32.mrf.mxu1 }
 0xd27   : > { %v2878_v14 = vmul.f32 0.35355338, %v2874_v33  ;;  %v5865_v47 = vadd.f32 %v3003_v27, %v5177_v34 }
 0xd29   : > { %v3007_v37 = vsel %vm1097_vm6, %v5865_v47, -inf  ;;  %v5870_v63 = vadd.f32 %v2878_v14, %v5177_v34 }
 0xd2a   : > { %3008 = vmax.xlane.f32.xlu2 %v3007_v37 }
 0xd2b   : > { %v2884_v58 = vsel %vm1097_vm6, %v5870_v63, -inf }
 0xd2c   : > { %2885 = vmax.xlane.f32.xlu1 %v2884_v58  ;;  %v3000_v35 = vpop.f32.mrf.mxu2 }
 0xd2d   : > { %v3004_v59 = vmul.f32 0.35355338, %v3000_v35 }
 0xd2f   : > { %v5875_v48 = vadd.f32 %v3004_v59, %v5177_v34 }
 0xd31   : > { %v3010_v30 = vsel %vm1097_vm6, %v5875_v48, -inf }
 0xd32   : > { %3011 = vmax.xlane.f32.xlu0 %v3010_v30 }
 0xd60   : > { %v3151_v0 = vpop.f32.mrf.mxu1 }
 0xd61   : > { %v3157_v10 = vmul.f32 0.35355338, %v3151_v0 }
 0xd63   : > { %v5880_v2 = vadd.f32 %v3157_v10, %v5315_v43 }
 0xd65   : > { %v3161_v5 = vsel %vm1097_vm6, %v5880_v2, -inf }
 0xd66   : > { %3162 = vmax.xlane.f32.xlu2 %v3161_v5 }
 0xd68   : > { %v3154_v60 = vpop.f32.mrf.mxu1 }
 0xd69   : > { %v3158_v20 = vmul.f32 0.35355338, %v3154_v60 }
 0xd6a   : > { %v3277_v56 = vpop.f32.mrf.mxu2 }
 0xd6b   : > { %v5885_v9 = vadd.f32 %v3158_v20, %v5315_v43  ;;  %v3283_v34 = vmul.f32 0.35355338, %v3277_v56 }
 0xd6d   : > { %v3164_v36 = vsel %vm1097_vm6, %v5885_v9, -inf  ;;  %v5890_v13 = vadd.f32 %v3283_v34, %v5315_v43 }
 0xd6e   : > { %3165 = vmax.xlane.f32.xlu0 %v3164_v36 }
 0xd6f   : > { %v3287_v54 = vsel %vm1097_vm6, %v5890_v13, -inf }
 0xd70   : > { %3288 = vmax.xlane.f32.xlu1 %v3287_v54  ;;  %v3403_v38 = vpop.f32.mrf.mxu1 }
 0xd71   : > { %v3409_v8 = vmul.f32 0.35355338, %v3403_v38 }
 0xd72   : > { %v3280_v3 = vpop.f32.mrf.mxu2 }
 0xd73   : > { %v5895_v15 = vadd.f32 %v3409_v8, %v5315_v43  ;;  %v3284_v18 = vmul.f32 0.35355338, %v3280_v3 }
 0xd75   : > { %v5898_v62 = vadd.f32 %v3284_v18, %v5315_v43  ;;  %v3413_v19 = vsel %vm1097_vm6, %v5895_v15, -inf }
 0xd77   : > { %v3290_v31 = vsel %vm1097_vm6, %v5898_v62, -inf }
 0xd78   : > { %3414 = vmax.xlane.f32.xlu1 %v3413_v19  ;;  %3291 = vmax.xlane.f32.xlu2 %v3290_v31 }
 0xd79   : > { %v3406_v40 = vpop.f32.mrf.mxu1 }
 0xd7a   : > { %v3410_v1 = vmul.f32 0.35355338, %v3406_v40  ;;  %v3529_v41 = vpop.f32.mrf.mxu2 }
 0xd7b   : > { %v3535_v49 = vmul.f32 0.35355338, %v3529_v41 }
 0xd7c   : > { %v5905_v23 = vadd.f32 %v3410_v1, %v5315_v43 }
 0xd7d   : > { %v5908_v26 = vadd.f32 %v3535_v49, %v5315_v43 }
 0xd7e   : > { %v3416_v57 = vsel %vm1097_vm6, %v5905_v23, -inf  ;;  %v2757_v24 = vpop.xlane.xlu0 %2756 }
 0xd7f   : > { %v3539_v32 = vsel %vm1097_vm6, %v5908_v26, -inf  ;;  %v2761_v28 = vsub.f32 %v5840_v29, %v2757_v24 }
 0xd80   : > { %3417 = vmax.xlane.f32.xlu1 %v3416_v57  ;;  %3540 = vmax.xlane.f32.xlu2 %v3539_v32 }
 0xd81   : > { %v2763_v45 = vmul.f32 1.442695, %v2761_v28 }
 0xd82   : > { %v3532_v55 = vpop.f32.mrf.mxu2 }
 0xd83   : > { %v3536_v22 = vmul.f32 0.35355338, %v3532_v55 }
 0xd85   : > { %v5915_v44 = vadd.f32 %v3536_v22, %v5315_v43 }
 0xd87   : > { %v2631_v46 = vpop.xlane.xlu1 %2630  ;;  %v3542_v50 = vsel %vm1097_vm6, %v5915_v44, -inf }
 0xd88   : > { %v2635_v39 = vsub.f32 %v5845_v42, %v2631_v46  ;;  %3543 = vmax.xlane.f32.xlu1 %v3542_v50 }
 0xd8a   : > { %v2637_v51 = vmul.f32 1.442695, %v2635_v39 }
 0xd8c   : > { %4749 = vpow2.f32 %v2637_v51 }
 0xd8d   : > { %4751 = vpow2.f32 %v2763_v45 }
 0xd8f   : > { %v2634_v52 = vpop.xlane.xlu2 %2633  ;;  %v2760_v53 = vpop.xlane.xlu1 %2759 }
 0xd90   : > { %v2636_v27 = vsub.f32 %v5853_v4, %v2634_v52  ;;  %v2762_v14 = vsub.f32 %v5850_v25, %v2760_v53 }
 0xd92   : > { %v5922_v33 = vpop.eup %4749  ;;  %v2639_v43 = vmul.f32 1.442695, %v2636_v27  ;;  %v2765_v42 = vmul.f32 1.442695, %v2762_v14 }
 0xd93   : > { %v2641_v37 = vsel %vm1097_vm6, %v5922_v33, 0.0  ;;  %v5927_v58 = vpop.eup %4751 }
 0xd94   : > { %4753 = vpow2.f32 %v2639_v43  ;;  %2642 = vadd.xlane.f32.xlu0 %v2641_v37  ;;  %v2767_v25 = vsel %vm1097_vm6, %v5927_v58, 0.0 }
 0xd95   : > { %4755 = vpow2.f32 %v2765_v42 }
 0xd97   : > { %v2883_v29 = vpop.xlane.xlu0 %2882 }
 0xd98   : > { %v2887_v35 = vsub.f32 %v5860_v17, %v2883_v29  ;;  %v5988_v29 = vpack.i.bf16 %v5769_v7, %v5773_v16 }
 0xd9a   : > { %v5930_v59 = vpop.eup %4753  ;;  %v2889_v4 = vmul.f32 1.442695, %v2887_v35 }
 0xd9b   : > { %v2644_v30 = vsel %vm1097_vm6, %v5930_v59, 0.0  ;;  %v5937_v60 = vpop.eup %4755 }
 0xd9c   : > { %4757 = vpow2.f32 %v2889_v4  ;;  %2645 = vadd.xlane.f32.xlu2 %v2644_v30  ;;  %2768 = vadd.xlane.f32.xlu0 %v2767_v25  ;;  %v2770_v36 = vsel %vm1097_vm6, %v5937_v60, 0.0 }
 0xd9d   : > { %v3009_v0 = vpop.xlane.xlu2 %3008 }
 0xd9e   : > { %v3013_v10 = vsub.f32 %v5865_v47, %v3009_v0 }
 0xd9f   : > { %v2886_v5 = vpop.xlane.xlu1 %2885 }
 0xda0   : > { %v3015_v17 = vmul.f32 1.442695, %v3013_v10  ;;  %v2888_v56 = vsub.f32 %v5870_v63, %v2886_v5 }
 0xda2   : > { %v5939_v20 = vpop.eup %4757  ;;  %4759 = vpow2.f32 %v3015_v17  ;;  %v2891_v54 = vmul.f32 1.442695, %v2888_v56 }
 0xda3   : > { %v2893_v34 = vsel %vm1097_vm6, %v5939_v20, 0.0 }
 0xda4   : > { %2894 = vadd.xlane.f32.xlu2 %v2893_v34  ;;  %2771 = vadd.xlane.f32.xlu0 %v2770_v36  ;;  %4761 = vpow2.f32 %v2891_v54 }
 0xda5   : > { %v3012_v38 = vpop.xlane.xlu0 %3011 }
 0xda6   : > { %v3014_v8 = vsub.f32 %v5875_v48, %v3012_v38 }
 0xda8   : > { %v5946_v47 = vpop.eup %4759  ;;  %v3017_v63 = vmul.f32 1.442695, %v3014_v8 }
 0xda9   : > { %v3019_v3 = vsel %vm1097_vm6, %v5946_v47, 0.0 }
 0xdaa   : > { %v5951_v18 = vpop.eup %4761  ;;  %4763 = vpow2.f32 %v3017_v63 }
 0xdab   : > { %v2896_v19 = vsel %vm1097_vm6, %v5951_v18, 0.0 }
 0xdac   : > { %3020 = vadd.xlane.f32.xlu0 %v3019_v3 }
 0xdb0   : > { %v5955_v31 = vpop.eup %4763 }
 0xdb1   : > { %v3022_v40 = vsel %vm1097_vm6, %v5955_v31, 0.0 }
 0xdb4   : > { %2897 = vadd.xlane.f32.xlu0 %v2896_v19 }
 0xdbc   : > { %3023 = vadd.xlane.f32.xlu0 %v3022_v40 }
 0xdd9   : > { %v3163_v1 = vpop.xlane.xlu2 %3162 }
 0xdda   : > { %v3167_v48 = vsub.f32 %v5880_v2, %v3163_v1 }
 0xddc   : > { %v3169_v41 = vmul.f32 1.442695, %v3167_v48 }
 0xdde   : > { %4765 = vpow2.f32 %v3169_v41 }
 0xde1   : > { %v3166_v49 = vpop.xlane.xlu0 %3165 }
 0xde2   : > { %v3168_v57 = vsub.f32 %v5885_v9, %v3166_v49 }
 0xde3   : > { %v3289_v32 = vpop.xlane.xlu1 %3288 }
 0xde4   : > { %v5961_v55 = vpop.eup %4765  ;;  %v3171_v22 = vmul.f32 1.442695, %v3168_v57  ;;  %v3293_v24 = vsub.f32 %v5890_v13, %v3289_v32 }
 0xde5   : > { %v3173_v46 = vsel %vm1097_vm6, %v5961_v55, 0.0 }
 0xde6   : > { %4767 = vpow2.f32 %v3171_v22  ;;  %v3295_v50 = vmul.f32 1.442695, %v3293_v24  ;;  %3174 = vadd.xlane.f32.xlu0 %v3173_v46 }
 0xde8   : > { %4769 = vpow2.f32 %v3295_v50 }
 0xdeb   : > { %v3292_v39 = vpop.xlane.xlu2 %3291  ;;  %v5966_v2 = vpop.xlane.xlu1 %3414 }
 0xdec   : > { %v5968_v28 = vpop.eup %4767  ;;  %v3294_v9 = vsub.f32 %v5898_v62, %v3292_v39  ;;  %v3419_v48 = vsub.f32 %v5895_v15, %v5966_v2 }
 0xded   : > { %v3176_v51 = vsel %vm1097_vm6, %v5968_v28, 0.0 }
 0xdee   : > { %v5973_v45 = vpop.eup %4769  ;;  %v3297_v13 = vmul.f32 1.442695, %v3294_v9  ;;  %3177 = vadd.xlane.f32.xlu1 %v3176_v51  ;;  %v3421_v2 = vmul.f32 1.442695, %v3419_v48 }
 0xdef   : > { %v3299_v52 = vsel %vm1097_vm6, %v5973_v45, 0.0 }
 0xdf0   : > { %4771 = vpow2.f32 %v3297_v13  ;;  %3300 = vadd.xlane.f32.xlu2 %v3299_v52 }
 0xdf3   : > { %v3418_v53 = vpop.xlane.xlu1 %3417  ;;  %v5990_v35 = vpop.xlane.xlu2 %3540 }
 0xdf4   : > { %v3420_v27 = vsub.f32 %v5905_v23, %v3418_v53 }
 0xdf6   : > { %v5978_v43 = vpop.eup %4771  ;;  %v3423_v14 = vmul.f32 1.442695, %v3420_v27 }
 0xdf7   : > { %v3302_v62 = vsel %vm1097_vm6, %v5978_v43, 0.0 }
 0xdf8   : > { %3303 = vadd.xlane.f32.xlu0 %v3302_v62  ;;  %4773 = vpow2.f32 %v3423_v14 }
 0xdfb   : > { %v3544_v34 = vpop.xlane.xlu1 %3543 }
 0xdfc   : > { %v3546_v41 = vsub.f32 %v5915_v44, %v3544_v34 }
 0xdfe   : > { %v5982_v37 = vpop.eup %4773  ;;  %v3549_v13 = vmul.f32 1.442695, %v3546_v41 }
 0xdff   : > { %v3428_v42 = vsel %vm1097_vm6, %v5982_v37, 0.0 }
 0xe00   : > { %3429 = vadd.xlane.f32.xlu0 %v3428_v42 }
 0xe07   : > { %v2643_v23 = vpop.xlane.xlu0 %2642  ;;  %4604 = vrot.lane.b32.xlu1 %v5988_v29, %s6519_s26  ;;  %s6532_s26 = sld [smem:[#allocation17_spill]] (!%p4505_p5) }
 0xe08   : > { %4775 = vrcp.f32 %v2643_v23  ;;  %4609 = vrot.lane.b32.xlu2 %v5988_v29, %s6522_s5  ;;  %v2658_v5 = vand.u32 2147483648, %v2643_v23  ;;  %v2656_v16 = vand.u32 2147483647, %v2643_v23  ;;  %vm2652_vm1 = vweird.f32 %v2643_v23 }
 0xe0a   : > { %v2659_v36 = vor.u32 1.1754944e-38, %v2658_v5  ;;  %vm2657_vm3 = vcmp.eq.f32.partialorder %v2656_v16, 8.507059e+37 }
 0xe0e   : > { %v4776_v4 = vpop.eup %4775 }
 0xe0f   : > { %v2648_v30 = vmul.f32 %v4776_v4, %v2643_v23  ;;  %v2646_v25 = vpop.xlane.xlu2 %2645  ;;  %v2769_v0 = vpop.xlane.xlu0 %2768  ;;  %vm2653_vm15 = vweird.f32 %v4776_v4 }
 0xe10   : > { %4777 = vrcp.f32 %v2646_v25  ;;  %vm2654_vm2 = vmor %vm2652_vm1, %vm2653_vm15  ;;  %v2784_v32 = vand.u32 2147483648, %v2769_v0  ;;  %v2673_v24 = vand.u32 2147483648, %v2646_v25  ;;  %v2782_v50 = vand.u32 2147483647, %v2769_v0 }
 0xe11   : > { %v2649_v10 = vsub.f32 1.0, %v2648_v30  ;;  %4779 = vrcp.f32 %v2769_v0  ;;  %vm2667_vm8 = vweird.f32 %v2646_v25  ;;  %v2671_v9 = vand.u32 2147483647, %v2646_v25 }
 0xe12   : > { %vm2778_vm9 = vweird.f32 %v2769_v0  ;;  %v2674_v62 = vor.u32 1.1754944e-38, %v2673_v24  ;;  %vm2783_vm14 = vcmp.eq.f32.partialorder %v2782_v50, 8.507059e+37 }
 0xe13   : > { %v2650_v7 = vmul.f32 %v4776_v4, %v2649_v10  ;;  %vm2672_vm15 = vcmp.eq.f32.partialorder %v2671_v9, 8.507059e+37 }
 0xe14   : > { %4614 = vrot.lane.b32.xlu0 %v5988_v29, %s6520_s28 }
 0xe15   : > { %v2651_v17 = vadd.f32 %v4776_v4, %v2650_v7 }
 0xe16   : > { %v4778_v56 = vpop.eup %4777 }
 0xe17   : > { %v4780_v54 = vpop.eup %4779  ;;  %v2655_v38 = vsel %vm2654_vm2, %v4776_v4, %v2651_v17  ;;  %v2663_v8 = vmul.f32 %v4778_v56, %v2646_v25  ;;  %v5998_v3 = vpop.xlane.xlu2 %2894  ;;  %vm2668_vm4 = vweird.f32 %v4778_v56 }
 0xe18   : > { %v6000_v63 = vpop.xlane.xlu0 %2771  ;;  %v2660_v19 = vsel %vm2657_vm3, %v2659_v36, %v2655_v38  ;;  %v2774_v40 = vmul.f32 %v4780_v54, %v2769_v0  ;;  %4781 = vrcp.f32 %v5998_v3  ;;  %vm2779_vm7 = vweird.f32 %v4780_v54  ;;  %vm6009_vm10 = vmor %vm2667_vm8, %vm2668_vm4 }
 0xe19   : > { %v2664_v1 = vsub.f32 1.0, %v2663_v8  ;;  %4783 = vrcp.f32 %v6000_v63  ;;  %v2661_v22 = vmul.f32 %v5922_v33, %v2660_v19  ;;  %vm2780_vm11 = vmor %vm2778_vm9, %vm2779_vm7  ;;  %v2785_v33 = vor.u32 1.1754944e-38, %v2784_v32 }
 0xe1a   : > { %v2775_v49 = vsub.f32 1.0, %v2774_v40  ;;  %v2908_v25 = vand.u32 2147483647, %v5998_v3  ;;  %v2910_v0 = vand.u32 2147483648, %v5998_v3  ;;  %vm2904_vm2 = vweird.f32 %v5998_v3 }
 0xe1b   : > { %v2665_v57 = vmul.f32 %v4778_v56, %v2664_v1  ;;  %4428 = vmatmul.msk.f32.vlgmr.msrb.gmra.mxu3 %vm1097_vm6, %v2661_v22  ;;  %v3545_v38 = vsub.f32 %v5908_v26, %v5990_v35  ;;  %vm2793_vm7 = vweird.f32 %v6000_v63 }
 0xe1c   : > { %v2776_v46 = vmul.f32 %v4780_v54, %v2775_v49  ;;  %vm2909_vm8 = vcmp.eq.f32.partialorder %v2908_v25, 8.507059e+37 }
 0xe1d   : > { %v2666_v39 = vadd.f32 %v4778_v56, %v2665_v57  ;;  %v3547_v57 = vmul.f32 1.442695, %v3545_v38 }
 0xe1e   : > { %v4782_v15 = vpop.eup %4781  ;;  %v2777_v44 = vadd.f32 %v4780_v54, %v2776_v46 }
 0xe1f   : > { %v2900_v52 = vmul.f32 %v4782_v15, %v5998_v3  ;;  %v2670_v27 = vsel %vm6009_vm10, %v4778_v56, %v2666_v39  ;;  %v4784_v14 = vpop.eup %4783  ;;  %vm2905_vm1 = vweird.f32 %v4782_v15  ;;  %v2799_v56 = vand.u32 2147483648, %v6000_v63 }
 0xe20   : > { %v6014_v53 = vpop.xlane.xlu0 %3020  ;;  %v2781_v42 = vsel %vm2780_vm11, %v4780_v54, %v2777_v44  ;;  %v2789_v30 = vmul.f32 %v4784_v14, %v6000_v63  ;;  %v2675_v10 = vsel %vm2672_vm15, %v2674_v62, %v2670_v27  ;;  %vm2794_vm3 = vweird.f32 %v4784_v14  ;;  %vm2906_vm4 = vmor %vm2904_vm2, %vm2905_vm1 }
 0xe21   : > { %4785 = vrcp.f32 %v6014_v53  ;;  %v2786_v23 = vsel %vm2783_vm14, %v2785_v33, %v2781_v42  ;;  %v2901_v4 = vsub.f32 1.0, %v2900_v52  ;;  %v2676_v17 = vmul.f32 %v5930_v59, %v2675_v10  ;;  %vm2795_vm9 = vmor %vm2793_vm7, %vm2794_vm3 }
 0xe22   : > { %v2787_v5 = vmul.f32 %v5927_v58, %v2786_v23  ;;  %v2790_v16 = vsub.f32 1.0, %v2789_v30  ;;  %4787 = vpow2.f32 %v3421_v2  ;;  %v2797_v54 = vand.u32 2147483647, %v6000_v63 }
 0xe23   : > { %v2902_v7 = vmul.f32 %v4782_v15, %v2901_v4  ;;  %4429 = vmatmul.msk.f32.gmra.mxu3 %vm1097_vm6, %v2676_v17  ;;  %4789 = vpow2.f32 %v3549_v13  ;;  %v2911_v59 = vor.u32 1.1754944e-38, %v2910_v0  ;;  %v2800_v48 = vor.u32 1.1754944e-38, %v2799_v56 }
 0xe24   : > { %4434 = vmatmul.msk.f32.vlgmr.msra.gmra.mxu0 %vm1097_vm6, %v2787_v5  ;;  %v2791_v36 = vmul.f32 %v4784_v14, %v2790_v16  ;;  %vm2798_vm10 = vcmp.eq.f32.partialorder %v2797_v54, 8.507059e+37  ;;  %v3036_v63 = vand.u32 2147483648, %v6014_v53  ;;  %v3034_v24 = vand.u32 2147483647, %v6014_v53 }
 0xe25   : > { %v2903_v34 = vadd.f32 %v4782_v15, %v2902_v7  ;;  %vm3030_vm14 = vweird.f32 %v6014_v53 }
 0xe26   : > { %v2792_v40 = vadd.f32 %v4784_v14, %v2791_v36  ;;  %v3037_v9 = vor.u32 1.1754944e-38, %v3036_v63  ;;  %vm3035_vm1 = vcmp.eq.f32.partialorder %v3034_v24, 8.507059e+37 }
 0xe27   : > { %v4786_v58 = vpop.eup %4785  ;;  %v2907_v8 = vsel %vm2906_vm4, %v4782_v15, %v2903_v34 }
 0xe28   : > { %v3026_v3 = vmul.f32 %v4786_v58, %v6014_v53  ;;  %v2898_v19 = vpop.xlane.xlu0 %2897  ;;  %v2912_v1 = vsel %vm2909_vm8, %v2911_v59, %v2907_v8  ;;  %v2796_v49 = vsel %vm2795_vm9, %v4784_v14, %v2792_v40  ;;  %v6036_v35 = vpop.eup %4787  ;;  %vm3031_vm11 = vweird.f32 %v4786_v58 }
 0xe29   : > { %4791 = vrcp.f32 %v2898_v19  ;;  %v2913_v26 = vmul.f32 %v5939_v20, %v2912_v1  ;;  %v2801_v32 = vsel %vm2798_vm10, %v2800_v48, %v2796_v49  ;;  %v6041_v50 = vpop.eup %4789  ;;  %vm3032_vm15 = vmor %vm3030_vm14, %vm3031_vm11  ;;  %v2925_v53 = vand.u32 2147483648, %v2898_v19 }
 0xe2a   : > { %v3027_v41 = vsub.f32 1.0, %v3026_v3  ;;  %v2802_v46 = vmul.f32 %v5937_v60, %v2801_v32  ;;  %4793 = vpow2.f32 %v3547_v57  ;;  %v3425_v60 = vsel %vm1097_vm6, %v6036_v35, 0.0 }
 0xe2b   : > { %4440 = vmatmul.msk.f32.vlgmr.msra.gmra.mxu3 %vm1097_vm6, %v2913_v26  ;;  %v3554_v13 = vsel %vm1097_vm6, %v6041_v50, 0.0  ;;  %v2923_v14 = vand.u32 2147483647, %v2898_v19  ;;  %vm2919_vm3 = vweird.f32 %v2898_v19  ;;  %v2926_v4 = vor.u32 1.1754944e-38, %v2925_v53 }
 0xe2c   : > { %v3028_v22 = vmul.f32 %v4786_v58, %v3027_v41  ;;  %4435 = vmatmul.msk.f32.gmra.mxu0 %vm1097_vm6, %v2802_v46 }
 0xe2d   : > { %vm2924_vm7 = vcmp.eq.f32.partialorder %v2923_v14, 8.507059e+37 }
 0xe2e   : > { %v3029_v39 = vadd.f32 %v4786_v58, %v3028_v22 }
 0xe2f   : > { %v4792_v20 = vpop.eup %4791 }
 0xe30   : > { %v3033_v15 = vsel %vm3032_vm15, %v4786_v58, %v3029_v39  ;;  %v2915_v2 = vmul.f32 %v4792_v20, %v2898_v19  ;;  %v3024_v44 = vpop.xlane.xlu0 %3023  ;;  %vm2920_vm2 = vweird.f32 %v4792_v20  ;;  %v6051_v62 = vpop.eup %4793 }
 0xe31   : > { %v3038_v51 = vsel %vm3035_vm1, %v3037_v9, %v3033_v15  ;;  %4795 = vrcp.f32 %v3024_v44  ;;  %3426 = vadd.xlane.f32.xlu2 %v3425_v60  ;;  %3555 = vadd.xlane.f32.xlu1 %v3554_v13  ;;  %vm2921_vm4 = vmor %vm2919_vm3, %vm2920_vm2  ;;  %v3551_v0 = vsel %vm1097_vm6, %v6051_v62, 0.0  ;;  %v3051_v7 = vand.u32 2147483648, %v3024_v44 }
 0xe32   : > { %v2916_v33 = vsub.f32 1.0, %v2915_v2  ;;  %v3039_v52 = vmul.f32 %v5946_v47, %v3038_v51  ;;  %v3049_v17 = vand.u32 2147483647, %v3024_v44  ;;  %vm3045_vm9 = vweird.f32 %v3024_v44 }
 0xe33   : > { %v3052_v34 = vor.u32 1.1754944e-38, %v3051_v7 }
 0xe34   : > { %v2917_v27 = vmul.f32 %v4792_v20, %v2916_v33  ;;  %4446 = vmatmul.msk.f32.vlgmr.msrb.gmra.mxu0 %vm1097_vm6, %v3039_v52  ;;  %vm3050_vm11 = vcmp.eq.f32.partialorder %v3049_v17, 8.507059e+37 }
 0xe36   : > { %v2918_v42 = vadd.f32 %v4792_v20, %v2917_v27 }
 0xe37   : > { %v4796_v23 = vpop.eup %4795 }
 0xe38   : > { %v3041_v30 = vmul.f32 %v4796_v23, %v3024_v44  ;;  %v2922_v25 = vsel %vm2921_vm4, %v4792_v20, %v2918_v42  ;;  %vm3046_vm8 = vweird.f32 %v4796_v23 }
 0xe39   : > { %v2927_v47 = vsel %vm2924_vm7, %v2926_v4, %v2922_v25  ;;  %3552 = vadd.xlane.f32.xlu2 %v3551_v0  ;;  %vm3047_vm10 = vmor %vm3045_vm9, %vm3046_vm8 }
 0xe3a   : > { %v3042_v10 = vsub.f32 1.0, %v3041_v30  ;;  %v2928_v5 = vmul.f32 %v5951_v18, %v2927_v47 }
 0xe3c   : > { %v3043_v16 = vmul.f32 %v4796_v23, %v3042_v10  ;;  %4441 = vmatmul.msk.f32.gmra.mxu3 %vm1097_vm6, %v2928_v5 }
 0xe3e   : > { %v3044_v56 = vadd.f32 %v4796_v23, %v3043_v16 }
 0xe40   : > { %v3048_v36 = vsel %vm3047_vm10, %v4796_v23, %v3044_v56 }
 0xe41   : > { %v3053_v54 = vsel %vm3050_vm11, %v3052_v34, %v3048_v36 }
 0xe42   : > { %v3054_v58 = vmul.f32 %v5955_v31, %v3053_v54 }
 0xe44   : > { %4447 = vmatmul.msk.f32.gmra.mxu0 %vm1097_vm6, %v3054_v58 }
 0xe51   : > { %4619 = vrot.lane.b32.xlu2 %v5988_v29, %s6521_s1 }
 0xe59   : > { %v3175_v18 = vpop.xlane.xlu0 %3174 }
 0xe5a   : > { %4797 = vrcp.f32 %v3175_v18  ;;  %vm3184_vm4 = vweird.f32 %v3175_v18  ;;  %v3190_v51 = vand.u32 2147483648, %v3175_v18  ;;  %v3188_v33 = vand.u32 2147483647, %v3175_v18 }
 0xe5c   : > { %v3191_v30 = vor.u32 1.1754944e-38, %v3190_v51  ;;  %vm3189_vm9 = vcmp.eq.f32.partialorder %v3188_v33, 8.507059e+37 }
 0xe60   : > { %v4798_v38 = vpop.eup %4797 }
 0xe61   : > { %v6062_v59 = vpop.xlane.xlu1 %3177  ;;  %v3180_v3 = vmul.f32 %v4798_v38, %v3175_v18  ;;  %vm3185_vm1 = vweird.f32 %v4798_v38 }
 0xe62   : > { %vm6069_vm7 = vmor %vm3184_vm4, %vm3185_vm1  ;;  %v3205_v16 = vand.u32 2147483648, %v6062_v59  ;;  %vm3199_vm1 = vweird.f32 %v6062_v59  ;;  %v3203_v54 = vand.u32 2147483647, %v6062_v59 }
 0xe63   : > { %v3301_v8 = vpop.xlane.xlu2 %3300  ;;  %v3181_v40 = vsub.f32 1.0, %v3180_v3 }
 0xe64   : > { %4799 = vrcp.f32 %v3301_v8  ;;  %v3314_v57 = vand.u32 2147483647, %v3301_v8  ;;  %v3316_v63 = vand.u32 2147483648, %v3301_v8  ;;  %vm3310_vm15 = vweird.f32 %v3301_v8 }
 0xe65   : > { %4801 = vrcp.f32 %v6062_v59  ;;  %v3182_v26 = vmul.f32 %v4798_v38, %v3181_v40 }
 0xe66   : > { %v3317_v9 = vor.u32 1.1754944e-38, %v3316_v63  ;;  %vm3315_vm3 = vcmp.eq.f32.partialorder %v3314_v57, 8.507059e+37 }
 0xe67   : > { %v3183_v20 = vadd.f32 %v4798_v38, %v3182_v26 }
 0xe69   : > { %v3187_v53 = vsel %vm6069_vm7, %v4798_v38, %v3183_v20  ;;  %v3206_v38 = vor.u32 1.1754944e-38, %v3205_v16 }
 0xe6a   : > { %v4800_v19 = vpop.eup %4799  ;;  %v3192_v47 = vsel %vm3189_vm9, %v3191_v30, %v3187_v53 }
 0xe6b   : > { %v3306_v1 = vmul.f32 %v4800_v19, %v3301_v8  ;;  %v3304_v48 = vpop.xlane.xlu0 %3303  ;;  %v4610_v31 = vpop.permute.xlu2 %4609  ;;  %vm3311_vm14 = vweird.f32 %v4800_v19  ;;  %v3193_v34 = vmul.f32 %v5961_v55, %v3192_v47 }
 0xe6c   : > { %v6065_v41 = vpop.eup %4801  ;;  %4803 = vrcp.f32 %v3304_v48  ;;  %v4611_v29 = vunpack.i.l.bf16 %v4610_v31  ;;  %v4612_v24 = vunpack.i.h.bf16 %v4610_v31  ;;  %vm3312_vm2 = vmor %vm3310_vm15, %vm3311_vm14  ;;  %v3331_v27 = vand.u32 2147483648, %v3304_v48 }
 0xe6d   : > { %v3307_v49 = vsub.f32 1.0, %v3306_v1  ;;  %v3195_v32 = vmul.f32 %v6065_v41, %v6062_v59  ;;  %v3329_v4 = vand.u32 2147483647, %v3304_v48  ;;  %vm3325_vm10 = vweird.f32 %v3304_v48 }
 0xe6e   : > { %3361 = vmatpush.msra.mxu0 %v4611_v29  ;;  %v3332_v10 = vor.u32 1.1754944e-38, %v3331_v27  ;;  %vm3200_vm15 = vweird.f32 %v6065_v41 }
 0xe6f   : > { %v3308_v22 = vmul.f32 %v4800_v19, %v3307_v49  ;;  %v3196_v15 = vsub.f32 1.0, %v3195_v32  ;;  %vm3330_vm14 = vcmp.eq.f32.partialorder %v3329_v4, 8.507059e+37 }
 0xe70   : > { %3362 = vmatpush.msra.mxu0 %v4612_v24 }
 0xe71   : > { %v3309_v46 = vadd.f32 %v4800_v19, %v3308_v22  ;;  %v3197_v42 = vmul.f32 %v6065_v41, %v3196_v15 }
 0xe72   : > { %v4804_v39 = vpop.eup %4803 }
 0xe73   : > { %v3313_v2 = vsel %vm3312_vm2, %v4800_v19, %v3309_v46  ;;  %v3321_v44 = vmul.f32 %v4804_v39, %v3304_v48  ;;  %vm3326_vm8 = vweird.f32 %v4804_v39  ;;  %vm3201_vm2 = vmor %vm3199_vm1, %vm3200_vm15  ;;  %v6085_v58 = vpop.xlane.xlu0 %3429 }
 0xe74   : > { %v3318_v60 = vsel %vm3315_vm3, %v3317_v9, %v3313_v2  ;;  %vm3327_vm11 = vmor %vm3325_vm10, %vm3326_vm8  ;;  %vm3204_vm3 = vcmp.eq.f32.partialorder %v3203_v54, 8.507059e+37  ;;  %4805 = vrcp.f32 %v6085_v58 }
 0xe75   : > { %v3322_v52 = vsub.f32 1.0, %v3321_v44  ;;  %v3319_v14 = vmul.f32 %v5973_v45, %v3318_v60  ;;  %v3198_v45 = vadd.f32 %v6065_v41, %v3197_v42 }
 0xe77   : > { %v3323_v23 = vmul.f32 %v4804_v39, %v3322_v52  ;;  %4458 = vmatmul.msk.f32.vlgmr.msra.gmra.mxu0 %vm1097_vm6, %v3319_v14  ;;  %v3202_v18 = vsel %vm3201_vm2, %v6065_v41, %v3198_v45  ;;  %v3457_v14 = vand.u32 2147483648, %v6085_v58 }
 0xe78   : > { %v3207_v8 = vsel %vm3204_vm3, %v3206_v38, %v3202_v18 }
 0xe79   : > { %v4605_v25 = vpop.permute.xlu1 %4604  ;;  %v3324_v0 = vadd.f32 %v4804_v39, %v3323_v23  ;;  %v3208_v3 = vmul.f32 %v5968_v28, %v3207_v8 }
 0xe7a   : > { %v4606_v5 = vunpack.i.l.bf16 %v4605_v25  ;;  %v4607_v17 = vunpack.i.h.bf16 %v4605_v25  ;;  %v6096_v1 = vpop.eup %4805 }
 0xe7b   : > { %v3328_v7 = vsel %vm3327_vm11, %v4804_v39, %v3324_v0  ;;  %v3447_v28 = vmul.f32 %v6096_v1, %v6085_v58  ;;  %vm3452_vm9 = vweird.f32 %v6096_v1  ;;  %vm3451_vm11 = vweird.f32 %v6085_v58 }
 0xe7c   : > { %3235 = vmatpush.msrb.mxu3 %v4606_v5  ;;  %v3333_v56 = vsel %vm3330_vm14, %v3332_v10, %v3328_v7  ;;  %vm6118_vm14 = vmor %vm3451_vm11, %vm3452_vm9  ;;  %v3455_v0 = vand.u32 2147483647, %v6085_v58 }
 0xe7d   : > { %v3334_v36 = vmul.f32 %v5978_v43, %v3333_v56  ;;  %v3448_v26 = vsub.f32 1.0, %v3447_v28  ;;  %v4473_v28 = vld [vmem:[%s6513_s8 + $0x28] sm:$0xff] }
 0xe7e   : > { %3236 = vmatpush.msrb.mxu3 %v4607_v17  ;;  %vm3456_vm2 = vcmp.eq.f32.partialorder %v3455_v0, 8.507059e+37 }
 0xe7f   : > { %4452 = vmatmul.msk.f32.vlgmr.msrb.gmra.mxu3 %vm1097_vm6, %v3193_v34  ;;  %4459 = vmatmul.msk.f32.gmra.mxu0 %vm1097_vm6, %v3334_v36  ;;  %v3449_v24 = vmul.f32 %v6096_v1, %v3448_v26 }
 0xe81   : > { %v3450_v13 = vadd.f32 %v6096_v1, %v3449_v24 }
 0xe83   : > { %v3454_v5 = vsel %vm6118_vm14, %v6096_v1, %v3450_v13  ;;  %v4636_v13 = vld [vmem:[%s6515_s27 + $0x1] ss:$0 sm:$0xff] }
 0xe86   : > { %v4615_v55 = vpop.permute.xlu0 %4614 }
 0xe87   : > { %4453 = vmatmul.msk.f32.gmra.mxu3 %vm1097_vm6, %v3208_v3  ;;  %v4616_v43 = vunpack.i.l.bf16 %v4615_v55  ;;  %v4617_v59 = vunpack.i.h.bf16 %v4615_v55 }
 0xe89   : > { %3487 = vmatpush.msra.mxu3 %v4616_v43 }
 0xe8b   : > { %3488 = vmatpush.msra.mxu3 %v4617_v59 }
 0xe9e   : > { %v6093_v19 = vpop.f32.mrf.mxu3 }
 0xea1   : > { %v2832_v40 = vpop.f32.mrf.mxu0 }
 0xea2   : > { %3092 = vrot.lane.b32.xlu2 %v2832_v40, %s6527_s2 }
 0xea4   : > { %v3427_v48 = vpop.xlane.xlu2 %3426  ;;  %v6098_v31 = vpop.xlane.xlu1 %3555 }
 0xea5   : > { %4807 = vrcp.f32 %v3427_v48  ;;  %v3442_v46 = vand.u32 2147483648, %v3427_v48  ;;  %v3440_v20 = vand.u32 2147483647, %v3427_v48  ;;  %vm3436_vm7 = vweird.f32 %v3427_v48 }
 0xea6   : > { %4809 = vrcp.f32 %v6098_v31  ;;  %v6103_v41 = vpop.f32.mrf.mxu3  ;;  %v3583_v58 = vand.u32 2147483648, %v6098_v31  ;;  %v3581_v55 = vand.u32 2147483647, %v6098_v31 }
 0xea7   : > { %v3443_v60 = vor.u32 1.1754944e-38, %v3442_v46  ;;  %vm3441_vm10 = vcmp.eq.f32.partialorder %v3440_v20, 8.507059e+37 }
 0xea8   : > { %v3584_v40 = vor.u32 1.1754944e-38, %v3583_v58 }
 0xea9   : > { %v2835_v49 = vpop.f32.mrf.mxu0 }
 0xeaa   : > { %3094 = vrot.lane.b32.xlu0 %v2835_v49, %s6527_s2 }
 0xeab   : > { %v4808_v29 = vpop.eup %4807 }
 0xeac   : > { %v3432_v57 = vmul.f32 %v4808_v29, %v3427_v48  ;;  %v3553_v63 = vpop.xlane.xlu2 %3552  ;;  %v6106_v32 = vpop.eup %4809  ;;  %vm3437_vm4 = vweird.f32 %v4808_v29  ;;  %v4475_v48 = vld [vmem:[%s6513_s8 + $0x38] sm:$0xff] }
 0xead   : > { %4811 = vrcp.f32 %v3553_v63  ;;  %v3573_v9 = vmul.f32 %v6106_v32, %v6098_v31  ;;  %vm3438_vm8 = vmor %vm3436_vm7, %vm3437_vm4  ;;  %v3568_v47 = vand.u32 2147483648, %v3553_v63  ;;  %v3566_v16 = vand.u32 2147483647, %v3553_v63  ;;  %3681 = vmatpush.msrb.mxu1 %v4475_v48 }
 0xeae   : > { %v3433_v22 = vsub.f32 1.0, %v3432_v57  ;;  %v2958_v2 = vpop.f32.mrf.mxu3  ;;  %vm3562_vm1 = vweird.f32 %v3553_v63  ;;  %vm3578_vm7 = vweird.f32 %v6106_v32 }
 0xeaf   : > { %v3574_v52 = vsub.f32 1.0, %v3573_v9  ;;  %v3569_v56 = vor.u32 1.1754944e-38, %v3568_v47  ;;  %vm3567_vm4 = vcmp.eq.f32.partialorder %v3566_v16, 8.507059e+37 }
 0xeb0   : > { %v3434_v39 = vmul.f32 %v4808_v29, %v3433_v22 }
 0xeb1   : > { %v3084_v44 = vpop.f32.mrf.mxu0  ;;  %v3575_v7 = vmul.f32 %v6106_v32, %v3574_v52 }
 0xeb2   : > { %v3435_v15 = vadd.f32 %v4808_v29, %v3434_v39  ;;  %3108 = vrot.lane.b32.xlu2 %v3084_v44, %s6528_s20  ;;  %3100 = vrot.lane.b32.xlu0 %v2958_v2, %s6514_s4 }
 0xeb3   : > { %v4812_v51 = vpop.eup %4811  ;;  %v3576_v54 = vadd.f32 %v6106_v32, %v3575_v7 }
 0xeb4   : > { %v3439_v33 = vsel %vm3438_vm8, %v4808_v29, %v3435_v15  ;;  %v3558_v53 = vmul.f32 %v4812_v51, %v3553_v63  ;;  %v4620_v27 = vpop.permute.xlu2 %4619  ;;  %vm3563_vm15 = vweird.f32 %v4812_v51  ;;  %vm3577_vm8 = vweird.f32 %v6098_v31  ;;  %v4474_v31 = vld [vmem:[%s6513_s8 + $0x30] sm:$0xff] }
 0xeb5   : > { %v3444_v42 = vsel %vm3441_vm10, %v3443_v60, %v3439_v33  ;;  %v4621_v23 = vunpack.i.l.bf16 %v4620_v27  ;;  %v4622_v10 = vunpack.i.h.bf16 %v4620_v27  ;;  %vm3564_vm3 = vmor %vm3562_vm1, %vm3563_vm15  ;;  %vm3582_vm10 = vcmp.eq.f32.partialorder %v3581_v55, 8.507059e+37  ;;  %3682 = vmatpush.msrb.mxu1 %v4474_v31 }
 0xeb6   : > { %v3559_v4 = vsub.f32 1.0, %v3558_v53  ;;  %v3445_v30 = vmul.f32 %v6036_v35, %v3444_v42  ;;  %v3458_v35 = vor.u32 1.1754944e-38, %v3457_v14  ;;  %vm3579_vm9 = vmor %vm3577_vm8, %vm3578_vm7 }
 0xeb7   : > { %3613 = vmatpush.msrb.mxu0 %v4621_v23  ;;  %v3580_v59 = vsel %vm3579_vm9, %v6106_v32, %v3576_v54  ;;  %3683 = vmatpush.msrb.mxu1 %v4473_v28 }
 0xeb8   : > { %v3560_v45 = vmul.f32 %v4812_v51, %v3559_v4  ;;  %4464 = vmatmul.msk.f32.vlgmr.msra.gmra.mxu3 %vm1097_vm6, %v3445_v30  ;;  %v3459_v34 = vsel %vm3456_vm2, %v3458_v35, %v3454_v5  ;;  %v3585_v1 = vsel %vm3582_vm10, %v3584_v40, %v3580_v59 }
 0xeb9   : > { %3614 = vmatpush.msrb.mxu0 %v4622_v10  ;;  %v3460_v8 = vmul.f32 %v5982_v37, %v3459_v34  ;;  %v3586_v37 = vmul.f32 %v6041_v50, %v3585_v1  ;;  %v4472_v50 = vld [vmem:[%s6513_s8 + $0x20] sm:$0xff] }
 0xeba   : > { %v3561_v17 = vadd.f32 %v4812_v51, %v3560_v45  ;;  %3684 = vmatpush.msrb.mxu1 %v4472_v50 }
 0xebc   : > { %v3565_v36 = vsel %vm3564_vm3, %v4812_v51, %v3561_v17 }
 0xebd   : > { %v3570_v18 = vsel %vm3567_vm4, %v3569_v56, %v3565_v36 }
 0xebe   : > { %v3571_v3 = vmul.f32 %v6051_v62, %v3570_v18 }
 0xebf   : > { %v2961_v38 = vpop.f32.mrf.mxu3 }
 0xec0   : > { %3102 = vrot.lane.b32.xlu2 %v2961_v38, %s6514_s4  ;;  %4465 = vmatmul.msk.f32.gmra.mxu3 %vm1097_vm6, %v3460_v8 }
 0xec1   : > { %v3087_v43 = vpop.f32.mrf.mxu0  ;;  %4470 = vmatmul.msk.f32.vlgmr.msrb.gmra.mxu0 %vm1097_vm6, %v3571_v3 }
 0xec2   : > { %3110 = vrot.lane.b32.xlu0 %v3087_v43, %s6528_s20 }
 0xec9   : > { %4471 = vmatmul.msk.f32.gmra.mxu0 %vm1097_vm6, %v3586_v37 }
 0xef4   : > { %v3364_v62 = vpop.f32.mrf.mxu0 }
 0xef5   : > { %3624 = vrot.lane.b32.xlu1 %v3364_v62, %s6527_s2 }
 0xefc   : > { %v3093_v29 = vpop.permute.xlu2 %3092 }
 0xefd   : > { %v3114_v26 = vsel %vm1060_vm5, %v6093_v19, %v3093_v29  ;;  %v3367_v19 = vpop.f32.mrf.mxu0  ;;  %v4485_v29 = vld [vmem:[%s6426_s12 + $0x30] sm:$0xff] }
 0xf02   : > { %v3238_v24 = vpop.f32.mrf.mxu3 }
 0xf0a   : > { %v3241_v20 = vpop.f32.mrf.mxu3 }
 0xf0c   : > { %v3109_v63 = vpop.permute.xlu2 %3108 }
 0xf1a   : > { %v3103_v39 = vpop.permute.xlu2 %3102 }
 0xf1c   : > { %v3095_v49 = vpop.permute.xlu0 %3094 }
 0xf1d   : > { %v3115_v46 = vsel %vm1060_vm5, %v6103_v41, %v3095_v49 }
 0xf1e   : > { %v3117_v15 = vsel %vm1097_vm6, %v3115_v46, %v3103_v39 }
 0xf24   : > { %v3101_v57 = vpop.permute.xlu0 %3100 }
 0xf25   : > { %v3116_v32 = vsel %vm1097_vm6, %v3114_v26, %v3101_v57  ;;  %v4484_v57 = vld [vmem:[%s6426_s12 + $0x28] sm:$0xff] }
 0xf26   : > { %v3118_v22 = vsel %vm1587_vm12, %v3116_v32, %v3109_v63  ;;  %v4483_v32 = vld [vmem:[%s6426_s12 + $0x20] sm:$0xff] }
 0xf27   : > { %4476 = vmatmul.msk.f32.vlgmr.msrb.gmra.mxu1 %vm790_vm0, %v3118_v22 }
 0xf34   : > { %v3111_v9 = vpop.permute.xlu0 %3110 }
 0xf35   : > { %v3119_v2 = vsel %vm1587_vm12, %v3117_v15, %v3111_v9 }
 0xf36   : > { %4477 = vmatmul.msk.f32.gmra.mxu1 %vm790_vm0, %v3119_v2 }
 0xf3b   : > { %v3490_v44 = vpop.f32.mrf.mxu3 }
 0xf3c   : > { %3632 = vrot.lane.b32.xlu2 %v3490_v44, %s6514_s4 }
 0xf3e   : > { %v3616_v51 = vpop.f32.mrf.mxu0 }
 0xf3f   : > { %3640 = vrot.lane.b32.xlu0 %v3616_v51, %s6528_s20 }
 0xf43   : > { %v3493_v60 = vpop.f32.mrf.mxu3 }
 0xf44   : > { %3626 = vrot.lane.b32.xlu2 %v3367_v19, %s6527_s2 }
 0xf46   : > { %v3619_v41 = vpop.f32.mrf.mxu0 }
 0xf47   : > { %3634 = vrot.lane.b32.xlu0 %v3493_v60, %s6514_s4 }
 0xf4c   : > { %3642 = vrot.lane.b32.xlu2 %v3619_v41, %s6528_s20 }
 0xf67   : > { %v3625_v42 = vpop.permute.xlu1 %3624 }
 0xf68   : > { %v3646_v23 = vsel %vm1060_vm5, %v3238_v24, %v3625_v42 }
 0xf96   : > { %v3633_v33 = vpop.permute.xlu2 %3632 }
 0xf97   : > { %v3648_v30 = vsel %vm1097_vm6, %v3646_v23, %v3633_v33 }
 0xf9e   : > { %v3627_v4 = vpop.permute.xlu2 %3626 }
 0xf9f   : > { %v3647_v7 = vsel %vm1060_vm5, %v3241_v20, %v3627_v4 }
 0xfa4   : > { %v3686_v52 = vpop.f32.mrf.mxu1 }
 0xfa5   : > { %v3698_v53 = vadd.f32 %v3686_v52, %v5685_v61 }
 0xfa6   : > { %v3643_v16 = vpop.permute.xlu2 %3642 }
 0xfa7   : > { %v6174_v27 = vadd.f32 %v4636_v13, %v3698_v53 }
 0xfa9   : > { %v3715_v14 = vsel %vm790_vm0, %v6174_v27, 0.0 }
 0xfaa   : > { %3716 = vadd.xlane.f32.xlu0 %v3715_v14 }
 0xfb1   : > { %v3641_v25 = vpop.permute.xlu0 %3640 }
 0xfb2   : > { %v3650_v0 = vsel %vm1587_vm12, %v3648_v30, %v3641_v25  ;;  %v4637_v25 = vld [vmem:[%s6424_s10 + $0x1] ss:$0 sm:$0xff] }
 0xfb3   : > { %v3689_v47 = vpop.f32.mrf.mxu1  ;;  %4478 = vmatmul.msk.f32.gmra.mxu1 %vm790_vm0, %v3650_v0 }
 0xfb4   : > { %v3699_v61 = vadd.f32 %v3689_v47, %v5690_v21 }
 0xfb6   : > { %v6183_v10 = vadd.f32 %v4636_v13, %v3699_v61 }
 0xfb8   : > { %v3718_v5 = vsel %vm790_vm0, %v6183_v10, 0.0 }
 0xfb9   : > { %3719 = vadd.xlane.f32.xlu1 %v3718_v5  ;;  %v3635_v45 = vpop.permute.xlu0 %3634  ;;  %v4638_v5 = vld [vmem:[%s6425_s11 + $0x1] ss:$0 sm:$0xff] }
 0xfba   : > { %v3649_v35 = vsel %vm1097_vm6, %v3647_v7, %v3635_v45 }
 0xfbb   : > { %v3651_v17 = vsel %vm1587_vm12, %v3649_v35, %v3643_v16 }
 0xfbc   : > { %4479 = vmatmul.msk.f32.gmra.mxu1 %vm790_vm0, %v3651_v17 }
0x101d   : > { %v3717_v21 = vpop.xlane.xlu0 %3716 }
0x101e   : > { %v3727_v58 = vmul.f32 %v3717_v21, %v5022_v11 }
0x1020   : > { %v3731_v55 = vsub.f32 %v6174_v27, %v3727_v58 }
0x1022   : > { %v3735_v40 = vmul.f32 %v3731_v55, %v3731_v55 }
0x102c   : > { %v3720_v56 = vpop.xlane.xlu1 %3719 }
0x102d   : > { %v3728_v34 = vmul.f32 %v3720_v56, %v5022_v11 }
0x102f   : > { %v6193_v36 = vsub.f32 %v6183_v10, %v3728_v34 }
0x1030   : > { %v3692_v54 = vpop.f32.mrf.mxu1 }
0x1031   : > { %v3700_v18 = vadd.f32 %v3692_v54, %v5695_v6  ;;  %v3736_v38 = vmul.f32 %v6193_v36, %v6193_v36  ;;  %v3739_v6 = vsel %vm790_vm0, %v3735_v40, 0.0 }
0x1033   : > { %v6199_v8 = vadd.f32 %v4636_v13, %v3700_v18  ;;  %v3742_v3 = vsel %vm790_vm0, %v3736_v38, 0.0 }
0x1034   : > { %3743 = vadd.xlane.f32.xlu1 %v3742_v3 }
0x1035   : > { %v3721_v43 = vsel %vm790_vm0, %v6199_v8, 0.0 }
0x1036   : > { %3722 = vadd.xlane.f32.xlu2 %v3721_v43 }
0x1039   : > { %v3695_v59 = vpop.f32.mrf.mxu1 }
0x103a   : > { %v3701_v1 = vadd.f32 %v3695_v59, %v5700_v12  ;;  %v4486_v12 = vld [vmem:[%s6426_s12 + $0x38] sm:$0xff] }
0x103b   : > { %3851 = vmatpush.msrb.mxu3 %v4486_v12 }
0x103c   : > { %v6206_v37 = vadd.f32 %v4636_v13, %v3701_v1 }
0x103d   : > { %3852 = vmatpush.msrb.mxu3 %v4485_v29  ;;  %v4498_v29 = vld [vmem:[%s6428_s14 + $0x70] sm:$0xff] }
0x103e   : > { %3740 = vadd.xlane.f32.xlu2 %v3739_v6  ;;  %v3724_v62 = vsel %vm790_vm0, %v6206_v37, 0.0 }
0x103f   : > { %3725 = vadd.xlane.f32.xlu0 %v3724_v62  ;;  %3853 = vmatpush.msrb.mxu3 %v4484_v57 }
0x1041   : > { %3854 = vmatpush.msrb.mxu3 %v4483_v32 }
0x10a7   : > { %v3744_v48 = vpop.xlane.xlu1 %3743 }
0x10a8   : > { %v3752_v31 = vmul.f32 %v3744_v48, %v5022_v11 }
0x10a9   : > { %v3723_v28 = vpop.xlane.xlu2 %3722 }
0x10aa   : > { %v3756_v50 = vadd.f32 1e-12, %v3752_v31  ;;  %v3729_v49 = vmul.f32 %v3723_v28, %v5022_v11 }
0x10ac   : > { %4813 = vrsqrt.f32 %v3756_v50  ;;  %v6220_v26 = vsub.f32 %v6199_v8, %v3729_v49  ;;  %vm3775_vm14 = vweird.f32 %v3756_v50  ;;  %v4499_v49 = vld [vmem:[%s6428_s14 + $0x78] sm:$0xff] }
0x10ad   : > { %3933 = vmatpush.msrb.mxu2 %v4499_v49 }
0x10ae   : > { %v3737_v63 = vmul.f32 %v6220_v26, %v6220_v26 }
0x10af   : > { %3934 = vmatpush.msrb.mxu2 %v4498_v29 }
0x10b0   : > { %v3745_v22 = vsel %vm790_vm0, %v3737_v63, 0.0  ;;  %v4497_v63 = vld [vmem:[%s6428_s14 + $0x68] sm:$0xff] }
0x10b1   : > { %3746 = vadd.xlane.f32.xlu0 %v3745_v22  ;;  %v3741_v24 = vpop.xlane.xlu2 %3740  ;;  %3935 = vmatpush.msrb.mxu2 %v4497_v63  ;;  %v4496_v22 = vld [vmem:[%s6428_s14 + $0x60] sm:$0xff] }
0x10b2   : > { %v4814_v46 = vpop.eup %4813  ;;  %v3751_v39 = vmul.f32 %v3741_v24, %v5022_v11  ;;  %v3726_v20 = vpop.xlane.xlu0 %3725 }
0x10b3   : > { %v3730_v9 = vmul.f32 %v3726_v20, %v5022_v11  ;;  %v3770_v2 = vmul.f32 %v4814_v46, %v3756_v50  ;;  %vm3776_vm6 = vweird.f32 %v4814_v46  ;;  %3936 = vmatpush.msrb.mxu2 %v4496_v22  ;;  %v4493_v20 = vld [vmem:[%s6428_s14 + $0x48] sm:$0xff] }
0x10b4   : > { %v3755_v15 = vadd.f32 1e-12, %v3751_v39  ;;  %vm3777_vm15 = vmor %vm3775_vm14, %vm3776_vm6  ;;  %v4494_v39 = vld [vmem:[%s6428_s14 + $0x50] sm:$0xff] }
0x10b5   : > { %v6234_v19 = vsub.f32 %v6206_v37, %v3730_v9  ;;  %v3771_v51 = vmul.f32 %v4814_v46, %v3770_v2  ;;  %v4492_v9 = vld [vmem:[%s6428_s14 + $0x40] sm:$0xff] }
0x10b6   : > { %4815 = vrsqrt.f32 %v3755_v15  ;;  %vm3765_vm12 = vweird.f32 %v3755_v15 }
0x10b7   : > { %v3738_v44 = vmul.f32 %v6234_v19, %v6234_v19  ;;  %v3772_v13 = vmul.f32 0.5, %v3771_v51 }
0x10b9   : > { %v3748_v60 = vsel %vm790_vm0, %v3738_v44, 0.0  ;;  %v3773_v53 = vsub.f32 1.5, %v3772_v13 }
0x10ba   : > { %3749 = vadd.xlane.f32.xlu2 %v3748_v60 }
0x10bb   : > { %v3774_v23 = vmul.f32 %v4814_v46, %v3773_v53 }
0x10bc   : > { %v4816_v41 = vpop.eup %4815 }
0x10bd   : > { %v3760_v33 = vmul.f32 %v4816_v41, %v3755_v15  ;;  %vm3766_vm5 = vweird.f32 %v4816_v41  ;;  %v3778_v47 = vsel %vm3777_vm15, %v4814_v46, %v3774_v23  ;;  %v4495_v46 = vld [vmem:[%s6428_s14 + $0x58] sm:$0xff]  ;;  %v4639_v15 = vld [vmem:[%s6427_s13 + $0x1] ss:$0 sm:$0xff] }
0x10be   : > { %vm3767_vm11 = vmor %vm3765_vm12, %vm3766_vm5  ;;  %v3800_v45 = vmul.f32 %v3778_v47, %v6193_v36  ;;  %3937 = vmatpush.msrb.mxu2 %v4495_v46 }
0x10bf   : > { %v3761_v52 = vmul.f32 %v4816_v41, %v3760_v33 }
0x10c0   : > { %v3807_v16 = vmul.f32 %v4637_v25, %v3800_v45  ;;  %3938 = vmatpush.msrb.mxu2 %v4494_v39 }
0x10c1   : > { %v3762_v14 = vmul.f32 0.5, %v3761_v52 }
0x10c2   : > { %v3814_v35 = vadd.f32 %v4638_v5, %v3807_v16  ;;  %3939 = vmatpush.msrb.mxu2 %v4493_v20 }
0x10c3   : > { %v3763_v42 = vsub.f32 1.5, %v3762_v14 }
0x10c4   : > { %3940 = vmatpush.msrb.mxu2 %v4492_v9 }
0x10c5   : > { %v3764_v4 = vmul.f32 %v4816_v41, %v3763_v42 }
0x10c7   : > { %v3768_v30 = vsel %vm3767_vm11, %v4816_v41, %v3764_v4 }
0x10c8   : > { %v3799_v0 = vmul.f32 %v3768_v30, %v3731_v55 }
0x10ca   : > { %v3806_v61 = vmul.f32 %v4637_v25, %v3799_v0 }
0x10cc   : > { %v3813_v7 = vadd.f32 %v4638_v5, %v3806_v61 }
0x10ce   : > { %4488 = vmatmul.msk.f32.vlgmr.msrb.gmra.mxu3 %vm790_vm0, %v3813_v7 }
0x10d6   : > { %4489 = vmatmul.msk.f32.gmra.mxu3 %vm790_vm0, %v3814_v35 }
0x1124   : > { %v3747_v17 = vpop.xlane.xlu0 %3746 }
0x1125   : > { %v3753_v56 = vmul.f32 %v3747_v17, %v5022_v11 }
0x1127   : > { %v3757_v34 = vadd.f32 1e-12, %v3753_v56 }
0x1129   : > { %4817 = vrsqrt.f32 %v3757_v34  ;;  %vm3785_vm2 = vweird.f32 %v3757_v34 }
0x112d   : > { %v3750_v21 = vpop.xlane.xlu2 %3749 }
0x112e   : > { %v3754_v54 = vmul.f32 %v3750_v21, %v5022_v11 }
0x112f   : > { %v4818_v58 = vpop.eup %4817 }
0x1130   : > { %v3780_v18 = vmul.f32 %v4818_v58, %v3757_v34  ;;  %v3758_v38 = vadd.f32 1e-12, %v3754_v54  ;;  %vm3786_vm1 = vweird.f32 %v4818_v58 }
0x1131   : > { %vm3787_vm3 = vmor %vm3785_vm2, %vm3786_vm1  ;;  %vm4074_vm2 = vcmask 1040384  }
0x1132   : > { %v3781_v3 = vmul.f32 %v4818_v58, %v3780_v18  ;;  %4819 = vrsqrt.f32 %v3758_v38  ;;  %vm3795_vm7 = vweird.f32 %v3758_v38 }
0x1134   : > { %v3782_v36 = vmul.f32 0.5, %v3781_v3 }
0x1136   : > { %v3783_v55 = vsub.f32 1.5, %v3782_v36 }
0x1138   : > { %v4820_v43 = vpop.eup %4819  ;;  %v3784_v59 = vmul.f32 %v4818_v58, %v3783_v55 }
0x1139   : > { %v3790_v40 = vmul.f32 %v4820_v43, %v3758_v38  ;;  %vm3796_vm4 = vweird.f32 %v4820_v43 }
0x113a   : > { %v3788_v1 = vsel %vm3787_vm3, %v4818_v58, %v3784_v59  ;;  %vm3797_vm8 = vmor %vm3795_vm7, %vm3796_vm4 }
0x113b   : > { %v3791_v6 = vmul.f32 %v4820_v43, %v3790_v40  ;;  %v3801_v62 = vmul.f32 %v3788_v1, %v6220_v26 }
0x113d   : > { %v3792_v48 = vmul.f32 0.5, %v3791_v6  ;;  %v3808_v31 = vmul.f32 %v4637_v25, %v3801_v62 }
0x113f   : > { %v3793_v28 = vsub.f32 1.5, %v3792_v48  ;;  %v3815_v50 = vadd.f32 %v4638_v5, %v3808_v31 }
0x1141   : > { %v3794_v12 = vmul.f32 %v4820_v43, %v3793_v28  ;;  %4490 = vmatmul.msk.f32.gmra.mxu3 %vm790_vm0, %v3815_v50  ;;  %v4640_v50 = vld [vmem:[%s6429_s15 + $0x1] ss:$0 sm:$0xff] }
0x1143   : > { %v3798_v26 = vsel %vm3797_vm8, %v4820_v43, %v3794_v12 }
0x1144   : > { %v3802_v57 = vmul.f32 %v3798_v26, %v6234_v19 }
0x1146   : > { %v3809_v32 = vmul.f32 %v4637_v25, %v3802_v57 }
0x1148   : > { %v3816_v24 = vadd.f32 %v4638_v5, %v3809_v32 }
0x114a   : > { %4491 = vmatmul.msk.f32.gmra.mxu3 %vm790_vm0, %v3816_v24 }
0x1151   : > { %v3856_v2 = vpop.f32.mrf.mxu3 }
0x1152   : > { %v3857_v19 = vadd.f32 %v4639_v15, %v3856_v2 }
0x1154   : > { %v3868_v44 = vmul.f32 %v3857_v19, %v3857_v19 }
0x1156   : > { %v3872_v51 = vmul.f32 %v3868_v44, %v3857_v19 }
0x1158   : > { %v3876_v60 = vmul.f32 0.044715, %v3872_v51 }
0x1159   : > { %v3859_v41 = vpop.f32.mrf.mxu3 }
0x115a   : > { %v3880_v13 = vadd.f32 %v3876_v60, %v3857_v19  ;;  %v3860_v33 = vadd.f32 %v4639_v15, %v3859_v41 }
0x115c   : > { %v3884_v52 = vmul.f32 0.7978846, %v3880_v13  ;;  %v3869_v53 = vmul.f32 %v3860_v33, %v3860_v33 }
0x115e   : > { %4821 = vtanh.f32 %v3884_v52  ;;  %v3873_v14 = vmul.f32 %v3869_v53, %v3860_v33 }
0x1160   : > { %v3877_v42 = vmul.f32 0.044715, %v3873_v14 }
0x1162   : > { %v3881_v23 = vadd.f32 %v3877_v42, %v3860_v33 }
0x1164   : > { %v4822_v4 = vpop.eup %4821  ;;  %v3885_v30 = vmul.f32 0.7978846, %v3881_v23 }
0x1165   : > { %v3892_v25 = vadd.f32 1.0, %v4822_v4 }
0x1166   : > { %4823 = vtanh.f32 %v3885_v30 }
0x1167   : > { %v3896_v0 = vmul.f32 0.5, %v3892_v25 }
0x1169   : > { %v3900_v47 = vmul.f32 %v3896_v0, %v3857_v19 }
0x116b   : > { %4500 = vmatmul.msk.f32.vlgmr.msrb.gmra.mxu2 %vm2377_vm13, %v3900_v47 }
0x116c   : > { %v4824_v61 = vpop.eup %4823 }
0x116d   : > { %v3893_v5 = vadd.f32 1.0, %v4824_v61 }
0x116f   : > { %v3897_v7 = vmul.f32 0.5, %v3893_v5 }
0x1171   : > { %v3901_v45 = vmul.f32 %v3897_v7, %v3860_v33 }
0x1173   : > { %4501 = vmatmul.msk.f32.gmra.mxu2 %vm2377_vm13, %v3901_v45 }
0x11c4   : > { %v3862_v16 = vpop.f32.mrf.mxu3 }
0x11c5   : > { %v3863_v35 = vadd.f32 %v4639_v15, %v3862_v16 }
0x11c7   : > { %v3870_v17 = vmul.f32 %v3863_v35, %v3863_v35 }
0x11c9   : > { %v3874_v56 = vmul.f32 %v3870_v17, %v3863_v35 }
0x11cb   : > { %v3878_v34 = vmul.f32 0.044715, %v3874_v56 }
0x11cd   : > { %v3882_v21 = vadd.f32 %v3878_v34, %v3863_v35  ;;  %v3865_v54 = vpop.f32.mrf.mxu3 }
0x11ce   : > { %v3866_v58 = vadd.f32 %v4639_v15, %v3865_v54  ;;  %v4641_v54 = vld [vmem:[%s6430_s16] ss:$0 sm:$0xff] }
0x11cf   : > { %v3886_v18 = vmul.f32 0.7978846, %v3882_v21 }
0x11d0   : > { %v3871_v38 = vmul.f32 %v3866_v58, %v3866_v58 }
0x11d1   : > { %4825 = vtanh.f32 %v3886_v18  ;;  %v4642_v18 = vld [vmem:[%s6431_s17] ss:$0 sm:$0xff] }
0x11d2   : > { %v3875_v3 = vmul.f32 %v3871_v38, %v3866_v58 }
0x11d4   : > { %v3879_v36 = vmul.f32 0.044715, %v3875_v3 }
0x11d6   : > { %v3883_v55 = vadd.f32 %v3879_v36, %v3866_v58 }
0x11d7   : > { %v4826_v43 = vpop.eup %4825 }
0x11d8   : > { %v3894_v59 = vadd.f32 1.0, %v4826_v43  ;;  %v3887_v40 = vmul.f32 0.7978846, %v3883_v55 }
0x11da   : > { %v3898_v1 = vmul.f32 0.5, %v3894_v59  ;;  %4827 = vtanh.f32 %v3887_v40 }
0x11dc   : > { %v3902_v6 = vmul.f32 %v3898_v1, %v3863_v35 }
0x11de   : > { %4502 = vmatmul.msk.f32.gmra.mxu2 %vm2377_vm13, %v3902_v6 }
0x11e0   : > { %v4828_v62 = vpop.eup %4827 }
0x11e1   : > { %v3895_v48 = vadd.f32 1.0, %v4828_v62 }
0x11e3   : > { %v3899_v31 = vmul.f32 0.5, %v3895_v48 }
0x11e5   : > { %v3903_v28 = vmul.f32 %v3899_v31, %v3866_v58 }
0x11e7   : > { %4503 = vmatmul.msk.f32.gmra.mxu2 %vm2377_vm13, %v3903_v28 }
0x11ee   : > { %v3942_v49 = vpop.f32.mrf.mxu2 }
0x11ef   : > { %v3954_v12 = vadd.f32 %v3942_v49, %v6174_v27 }
0x11f1   : > { %v3963_v29 = vadd.f32 %v4640_v50, %v3954_v12 }
0x11f3   : > { %v3969_v26 = vsel %vm790_vm0, %v3963_v29, 0.0 }
0x11f4   : > { %3970 = vadd.xlane.f32.xlu0 %v3969_v26 }
0x11f6   : > { %v3945_v57 = vpop.f32.mrf.mxu2 }
0x11f7   : > { %v3955_v63 = vadd.f32 %v3945_v57, %v6183_v10 }
0x11f9   : > { %v3964_v32 = vadd.f32 %v4640_v50, %v3955_v63 }
0x11fb   : > { %v3972_v22 = vsel %vm790_vm0, %v3964_v32, 0.0 }
0x11fc   : > { %3973 = vadd.xlane.f32.xlu2 %v3972_v22 }
0x1261   : > { %v3948_v24 = vpop.f32.mrf.mxu2 }
0x1262   : > { %v3956_v46 = vadd.f32 %v3948_v24, %v6199_v8 }
0x1264   : > { %v3965_v39 = vadd.f32 %v4640_v50, %v3956_v46 }
0x1266   : > { %v3975_v20 = vsel %vm790_vm0, %v3965_v39, 0.0 }
0x1267   : > { %3976 = vadd.xlane.f32.xlu1 %v3975_v20  ;;  %v3971_v9 = vpop.xlane.xlu0 %3970 }
0x1268   : > { %v3981_v27 = vmul.f32 %v3971_v9, %v5022_v11 }
0x126a   : > { %v6295_v15 = vsub.f32 %v3963_v29, %v3981_v27  ;;  %v3951_v2 = vpop.f32.mrf.mxu2 }
0x126b   : > { %v3957_v19 = vadd.f32 %v3951_v2, %v6206_v37 }
0x126c   : > { %v3989_v10 = vmul.f32 %v6295_v15, %v6295_v15 }
0x126d   : > { %v3966_v44 = vadd.f32 %v4640_v50, %v3957_v19 }
0x126e   : > { %v3993_v51 = vsel %vm790_vm0, %v3989_v10, 0.0 }
0x126f   : > { %v3974_v60 = vpop.xlane.xlu2 %3973  ;;  %3994 = vadd.xlane.f32.xlu2 %v3993_v51  ;;  %v3978_v8 = vsel %vm790_vm0, %v3966_v44, 0.0 }
0x1270   : > { %v3982_v41 = vmul.f32 %v3974_v60, %v5022_v11  ;;  %3979 = vadd.xlane.f32.xlu1 %v3978_v8 }
0x1272   : > { %v3986_v13 = vsub.f32 %v3964_v32, %v3982_v41 }
0x1274   : > { %v3990_v33 = vmul.f32 %v3986_v13, %v3986_v13 }
0x1276   : > { %v3996_v52 = vsel %vm790_vm0, %v3990_v33, 0.0 }
0x1278   : > { %3997 = vadd.xlane.f32.xlu1 %v3996_v52 }
0x12da   : > { %v3977_v53 = vpop.xlane.xlu1 %3976 }
0x12db   : > { %v3983_v37 = vmul.f32 %v3977_v53, %v5022_v11 }
0x12dd   : > { %v6305_v14 = vsub.f32 %v3965_v39, %v3983_v37 }
0x12df   : > { %v3991_v42 = vmul.f32 %v6305_v14, %v6305_v14 }
0x12e1   : > { %v3999_v23 = vsel %vm790_vm0, %v3991_v42, 0.0 }
0x12e2   : > { %4000 = vadd.xlane.f32.xlu0 %v3999_v23  ;;  %v3995_v36 = vpop.xlane.xlu2 %3994 }
0x12e3   : > { %v3980_v4 = vpop.xlane.xlu1 %3979  ;;  %v4005_v55 = vmul.f32 %v3995_v36, %v5022_v11 }
0x12e4   : > { %v3984_v30 = vmul.f32 %v3980_v4, %v5022_v11 }
0x12e5   : > { %v4009_v43 = vadd.f32 1e-12, %v4005_v55 }
0x12e6   : > { %v6311_v25 = vsub.f32 %v3966_v44, %v3984_v30 }
0x12e7   : > { %vm4019_vm6 = vweird.f32 %v4009_v43 }
0x12e8   : > { %v3992_v0 = vmul.f32 %v6311_v25, %v6311_v25 }
0x12ea   : > { %v4002_v47 = vsel %vm790_vm0, %v3992_v0, 0.0 }
0x12eb   : > { %4003 = vadd.xlane.f32.xlu0 %v4002_v47  ;;  %v3998_v61 = vpop.xlane.xlu1 %3997 }
0x12ec   : > { %v4006_v5 = vmul.f32 %v3998_v61, %v5022_v11 }
0x12ee   : > { %v4010_v7 = vadd.f32 1e-12, %v4006_v5 }
0x12f0   : > { %4829 = vrsqrt.f32 %v4010_v7  ;;  %vm4029_vm9 = vweird.f32 %v4010_v7 }
0x12f1   : > { %4831 = vrsqrt.f32 %v4009_v43 }
0x12f6   : > { %v4830_v45 = vpop.eup %4829 }
0x12f7   : > { %v4024_v16 = vmul.f32 %v4830_v45, %v4010_v7  ;;  %vm4030_vm13 = vweird.f32 %v4830_v45  ;;  %v4832_v59 = vpop.eup %4831 }
0x12f8   : > { %vm4031_vm10 = vmor %vm4029_vm9, %vm4030_vm13  ;;  %v4014_v40 = vmul.f32 %v4832_v59, %v4009_v43  ;;  %vm4020_vm5 = vweird.f32 %v4832_v59 }
0x12f9   : > { %v4025_v35 = vmul.f32 %v4830_v45, %v4024_v16  ;;  %vm4021_vm12 = vmor %vm4019_vm6, %vm4020_vm5 }
0x12fa   : > { %v4015_v62 = vmul.f32 %v4832_v59, %v4014_v40 }
0x12fb   : > { %v4026_v17 = vmul.f32 0.5, %v4025_v35 }
0x12fc   : > { %v4016_v31 = vmul.f32 0.5, %v4015_v62 }
0x12fd   : > { %v4027_v56 = vsub.f32 1.5, %v4026_v17 }
0x12fe   : > { %v4017_v50 = vsub.f32 1.5, %v4016_v31 }
0x12ff   : > { %v4028_v34 = vmul.f32 %v4830_v45, %v4027_v56 }
0x1300   : > { %v4018_v57 = vmul.f32 %v4832_v59, %v4017_v50 }
0x1301   : > { %v4032_v21 = vsel %vm4031_vm10, %v4830_v45, %v4028_v34 }
0x1302   : > { %v4054_v58 = vmul.f32 %v4032_v21, %v3986_v13  ;;  %v4022_v22 = vsel %vm4021_vm12, %v4832_v59, %v4018_v57 }
0x1303   : > { %v4053_v20 = vmul.f32 %v4022_v22, %v6295_v15 }
0x1304   : > { %v4061_v38 = vmul.f32 %v4641_v54, %v4054_v58 }
0x1305   : > { %v4060_v19 = vmul.f32 %v4641_v54, %v4053_v20 }
0x1306   : > { %v6323_v3 = vadd.f32 %v4642_v18, %v4061_v38 }
0x1307   : > { %v4067_v8 = vadd.f32 %v4642_v18, %v4060_v19 }
0x1355   : > { %v4001_v1 = vpop.xlane.xlu0 %4000 }
0x1356   : > { %v4007_v6 = vmul.f32 %v4001_v1, %v5022_v11 }
0x1358   : > { %v4011_v48 = vadd.f32 1e-12, %v4007_v6 }
0x135a   : > { %4833 = vrsqrt.f32 %v4011_v48  ;;  %vm4039_vm14 = vweird.f32 %v4011_v48 }
0x135e   : > { %v4004_v28 = vpop.xlane.xlu0 %4003 }
0x135f   : > { %v4008_v49 = vmul.f32 %v4004_v28, %v5022_v11 }
0x1360   : > { %v4834_v12 = vpop.eup %4833 }
0x1361   : > { %v4034_v29 = vmul.f32 %v4834_v12, %v4011_v48  ;;  %v4012_v26 = vadd.f32 1e-12, %v4008_v49  ;;  %vm4040_vm11 = vweird.f32 %v4834_v12 }
0x1362   : > { %vm4041_vm15 = vmor %vm4039_vm14, %vm4040_vm11 }
0x1363   : > { %v4035_v63 = vmul.f32 %v4834_v12, %v4034_v29  ;;  %4835 = vrsqrt.f32 %v4012_v26  ;;  %vm4049_vm3 = vweird.f32 %v4012_v26 }
0x1365   : > { %v4036_v32 = vmul.f32 0.5, %v4035_v63 }
0x1367   : > { %v4037_v24 = vsub.f32 1.5, %v4036_v32 }
0x1369   : > { %v4836_v46 = vpop.eup %4835  ;;  %v4038_v39 = vmul.f32 %v4834_v12, %v4037_v24 }
0x136a   : > { %v4044_v11 = vmul.f32 %v4836_v46, %v4012_v26  ;;  %vm4050_vm1 = vweird.f32 %v4836_v46 }
0x136b   : > { %v4042_v9 = vsel %vm4041_vm15, %v4834_v12, %v4038_v39  ;;  %vm4051_vm4 = vmor %vm4049_vm3, %vm4050_vm1 }
0x136c   : > { %v4055_v27 = vmul.f32 %v4042_v9, %v6305_v14  ;;  %v4045_v2 = vmul.f32 %v4836_v46, %v4044_v11 }
0x136e   : > { %v4062_v10 = vmul.f32 %v4641_v54, %v4055_v27  ;;  %v4046_v44 = vmul.f32 0.5, %v4045_v2 }
0x1370   : > { %v4069_v51 = vadd.f32 %v4642_v18, %v4062_v10  ;;  %v4047_v60 = vsub.f32 1.5, %v4046_v44 }
0x1372   : > { %v4072_v41 = vrot.slane %v4069_v51, 7  ;;  %v4048_v13 = vmul.f32 %v4836_v46, %v4047_v60 }
0x1374   : > { %v6331_v15 = vsel %vm4074_vm2, %v4067_v8, %v4072_v41  ;;  %v4052_v33 = vsel %vm4051_vm4, %v4836_v46, %v4048_v13 }
0x1375   : > { %v4056_v52 = vmul.f32 %v4052_v33, %v6311_v25  ;;  %4080 = sbr.rel (%p4505_p5) target bundleno = 5408 (0x1520), region = 124 }
0x1377   : > { %v4063_v53 = vmul.f32 %v4641_v54, %v4056_v52 }
0x1379   : > { %v4070_v37 = vadd.f32 %v4642_v18, %v4063_v53 }
0x137a   : > { %v4143_v14 = vld [vmem:[%s6435_s21 + $0x18] sm:$0xff]  ;;  %v4142_v42 = vld [vmem:[%s6435_s21 + $0x10] sm:$0xff]  ;;  %vm4168_vm7 = vcmask 254976   ;;  %v4141_v25 = vld [vmem:[%s6435_s21 + $0x8] sm:$0xff]  ;;  %vm4234_vm12 = vcmask 17408   ;;  %vm4236_vm11 = vcmask 9216  }
0x137b   : > { %v4082_v23 = vrot.slane %v4070_v37, 7  ;;  %4159 = vmatpush.msra.mxu2 %v4143_v14  ;;  %4232 = vst.msk [vmem:[%s6531_s23] sm:$0x3] %vm4168_vm7, %v6331_v15  ;;  %v4119_v4 = vld [vmem:[%s6532_s26 + $0x18] sm:$0xff]  ;;  %v4118_v30 = vld [vmem:[%s6532_s26 + $0x10] sm:$0xff]  ;;  %v4117_v47 = vld [vmem:[%s6532_s26 + $0x8] sm:$0xff] }
0x137c   : > { %4132 = vmatpush.msra.mxu1 %v4119_v4  ;;  %v4140_v61 = vld [vmem:[%s6435_s21] sm:$0xff]  ;;  %v4088_v34 = vld [vmem:[%s6533_s0 + $0x18] sm:$0xff]  ;;  %v4087_v21 = vld [vmem:[%s6533_s0 + $0x10] sm:$0xff] }
0x137d   : > { %v4084_v0 = vsel %vm4074_vm2, %v6323_v3, %v4082_v23  ;;  %4160 = vmatpush.msra.mxu2 %v4142_v42  ;;  %v4116_v5 = vld [vmem:[%s6532_s26] sm:$0xff]  ;;  %4108 = vmatpush.msra.mxu0 %v4088_v34  ;;  %v4086_v54 = vld [vmem:[%s6533_s0 + $0x8] sm:$0xff] }
0x137e   : > { %4233 = vst.msk [vmem:[%s6531_s23 + $0x2] sm:$0x3] %vm4168_vm7, %v4084_v0  ;;  %4133 = vmatpush.msra.mxu1 %v4118_v30  ;;  %v4224_v58 = vld [vmem:[#allocation2] sm:$0x1] }
0x137f   : > { %4161 = vmatpush.msra.mxu2 %v4141_v25  ;;  %4109 = vmatpush.msra.mxu0 %v4087_v21  ;;  %v4085_v18 = vld [vmem:[%s6533_s0] sm:$0xff]  ;;  %4515 = vpush %v4224_v58 }
0x1380   : > { %4134 = vmatpush.msra.mxu1 %v4117_v47  ;;  %v4837_v22 = vld [vmem:[%s6534_s24] ss:$0 sm:$0xff] }
0x1381   : > { %4162 = vmatpush.msra.mxu2 %v4140_v61  ;;  %4110 = vmatpush.msra.mxu0 %v4086_v54 }
0x1382   : > { %4508 = vmatmul.msk.f32.vlgmr.msra.gmra.mxu2 %vm790_vm0, %v4084_v0  ;;  %4135 = vmatpush.msra.mxu1 %v4116_v5 }
0x1383   : > { %4507 = vmatmul.msk.f32.vlgmr.msra.gmra.mxu1 %vm790_vm0, %v6331_v15  ;;  %4111 = vmatpush.msra.mxu0 %v4085_v18 }
0x1384   : > { %4506 = vmatmul.msk.f32.vlgmr.msra.gmra.mxu0 %vm790_vm0, %v6331_v15 }
0x13b0   : > { %s4516_s22 = spop %4515 }
0x13b1   : > { %v4226_v57 = vstv %s4516_s22 }
0x13b2   : > { %v4227_v63 = vmul.f32 1.442695, %v4226_v57 }
0x1400   : > { %v4137_v16 = vpop.f32.mrf.mxu1 }
0x1401   : > { %v4167_v17 = vmul.f32 %v4137_v16, %v4137_v16  ;;  %v4113_v24 = vpop.f32.mrf.mxu0 }
0x1402   : > { %v4114_v46 = vadd.f32 %v4837_v22, %v4113_v24 }
0x1403   : > { %v4169_v56 = vsel %vm4168_vm7, %v4167_v17, 0.0 }
0x1404   : > { %4235 = vst.msk [vmem:[%s6531_s23 + $0x4] sm:$0x3] %vm4234_vm12, %v4114_v46 }
0x1405   : > { %v4164_v7 = vpop.f32.mrf.mxu2 }
0x1406   : > { %v4183_v45 = vmul.f32 %v4164_v7, %v4164_v7 }
0x1408   : > { %v4184_v35 = vsel %vm4168_vm7, %v4183_v45, 0.0 }
0x1409   : > { %4185 = vadd.xlane.f32.xlu0 %v4184_v35 }
0x1411   : > { %4170 = vadd.xlane.f32.xlu0 %v4169_v56 }
0x147c   : > { %v4186_v38 = vpop.xlane.xlu0 %4185 }
0x147d   : > { %4838 = vrsqrt.f32 %v4186_v38  ;;  %vm4193_vm13 = vweird.f32 %v4186_v38 }
0x1483   : > { %v4839_v3 = vpop.eup %4838 }
0x1484   : > { %v4188_v36 = vmul.f32 %v4839_v3, %v4186_v38  ;;  %v4171_v55 = vpop.xlane.xlu0 %4170  ;;  %vm4194_vm8 = vweird.f32 %v4839_v3 }
0x1485   : > { %4840 = vrsqrt.f32 %v4171_v55  ;;  %vm4195_vm9 = vmor %vm4193_vm13, %vm4194_vm8  ;;  %vm4178_vm5 = vweird.f32 %v4171_v55 }
0x1486   : > { %v4189_v43 = vmul.f32 %v4839_v3, %v4188_v36  ;;  %4842 = vpow2.f32 %v4227_v63 }
0x1488   : > { %v4190_v59 = vmul.f32 0.5, %v4189_v43 }
0x148a   : > { %v4191_v40 = vsub.f32 1.5, %v4190_v59 }
0x148b   : > { %v4841_v1 = vpop.eup %4840 }
0x148c   : > { %v4173_v6 = vmul.f32 %v4841_v1, %v4171_v55  ;;  %v4192_v62 = vmul.f32 %v4839_v3, %v4191_v40  ;;  %vm4179_vm10 = vweird.f32 %v4841_v1  ;;  %v4843_v32 = vpop.eup %4842 }
0x148d   : > { %vm4180_vm6 = vmor %vm4178_vm5, %vm4179_vm10  ;;  %4517 = vpush %v4843_v32 }
0x148e   : > { %v4174_v48 = vmul.f32 %v4841_v1, %v4173_v6  ;;  %v4196_v31 = vsel %vm4195_vm9, %v4839_v3, %v4192_v62 }
0x148f   : > { %v4197_v28 = vmul.f32 %v4196_v31, %v4164_v7 }
0x1490   : > { %v4175_v50 = vmul.f32 0.5, %v4174_v48 }
0x1491   : > { %4509 = vmatpush.xpose.msk.msra.mxu3 %vm790_vm0, %v4197_v28 }
0x1492   : > { %v4176_v49 = vsub.f32 1.5, %v4175_v50 }
0x1494   : > { %v4177_v12 = vmul.f32 %v4841_v1, %v4176_v49 }
0x1496   : > { %v4181_v29 = vsel %vm4180_vm6, %v4841_v1, %v4177_v12 }
0x1497   : > { %v4182_v26 = vmul.f32 %v4181_v29, %v4137_v16 }
0x1499   : > { %4510 = vmatmul.msk.f32.vlgmr.msra.gmra.mxu3 %vm790_vm0, %v4182_v26 }
0x14be   : > { %s4518_s18 = spop %4517 }
0x14bf   : > { %v4230_v39 = vstv %s4518_s18 }
0x151c   : > { %v4221_v20 = vpop.f32.mrf.mxu3 }
0x151d   : > { %v4231_v11 = vmul.f32 %v4230_v39, %v4221_v20 }
0x151f   : > { %4237 = vst.msk [vmem:[%s6531_s23 + $0x6] sm:$0x3] %vm4236_vm11, %v4231_v11 }
0x1520 PF: > { %p4511_p6 = scmp.ne.s32.totalorder %s5008_s30, 1 }
0x1521   : > { %s6535_s4 = sld [smem:[#allocation18_spill]] (!%p4511_p6) }
0x1522   : > { %4241 = sbr.rel (%p4511_p6) target bundleno = 5552 (0x15b0), region = 128  ;;  %s6536_s1 = sld [smem:[#allocation4_spill]] (!%p4511_p6) }
0x1523   : > { %s6537_s24 = sld [smem:[#allocation19_spill]] (!%p4511_p6) }
0x1527   : > { %v4245_v9 = vld [vmem:[%s6535_s4 + $0x18] sm:$0xff]  ;;  %v4244_v27 = vld [vmem:[%s6535_s4 + $0x10] sm:$0xff]  ;;  %v4243_v2 = vld [vmem:[%s6535_s4 + $0x8] sm:$0xff]  ;;  %vm4273_vm14 = vcmask 9216  }
0x1528   : > { %4265 = vmatpush.msra.mxu0 %v4245_v9  ;;  %v4242_v19 = vld [vmem:[%s6535_s4] sm:$0xff] }
0x1529   : > { %v4844_v10 = vld [vmem:[%s6537_s24] ss:$0 sm:$0xff] }
0x152a   : > { %4266 = vmatpush.msra.mxu0 %v4244_v27 }
0x152c   : > { %4267 = vmatpush.msra.mxu0 %v4243_v2 }
0x152e   : > { %4268 = vmatpush.msra.mxu0 %v4242_v19 }
0x152f   : > { %4512 = vmatmul.msk.f32.vlgmr.msra.gmra.mxu0 %vm790_vm0, %v6331_v15 }
0x15ac   : > { %v4270_v44 = vpop.f32.mrf.mxu0 }
0x15ad   : > { %v4271_v51 = vadd.f32 %v4844_v10, %v4270_v44 }
0x15af   : > { %4274 = vst.msk [vmem:[%s6536_s1] sm:$0x3] %vm4273_vm14, %v4271_v51 }
0x15b0 PF: > { %s6538_s18 = sld [smem:[#allocation3_spill]] }
0x15b6   : > { %s37_s6 = sadd.s32 1, %s6538_s18  }
0x15b7   : > { %p34_p7 = scmp.ge.s32.totalorder %s37_s6, 4  }
0x15b9   :  { %36 = sbr.rel (!%p34_p7) target bundleno = 17 (0x11), region = 173 }

</bundles_post_ra>
